<compile_context>
chip_gen: v6e
topology: v6e:2x2x1
jax: 0.10.0
libtpu: 0.0.40
codegen_flags: <defaults>
</compile_context>

<pallas_src>
import jax
import jax.numpy as jnp
from jax.experimental import pallas as pl
from jax.experimental.pallas import tpu as pltpu


def _elu(x):
    # ELU(alpha=1). Clamp before exp so large positive inputs never evaluate exp().
    # Computed in the dtype of x (bf16 inside the kernel -> bf16 EUP/VPU on v6e/v7x).
    return jnp.where(x > 0, x, jnp.exp(jnp.minimum(x, 0.0)) - 1.0)


def fcn_kernel(x_ref, w1_ref, b1_ref, w2_ref, b2_ref, w3_ref, b3_ref,
               probs_ref, logits_ref):
    x = x_ref[...]                                                     # (TB, P_pad) bf16

    h1 = jnp.dot(x, w1_ref[...], preferred_element_type=jnp.float32)  # f32 MXU accumulate
    h1 = _elu((h1 + b1_ref[...]).astype(jnp.bfloat16))                 # bf16 ELU (TB, 1024)

    h2 = jnp.dot(h1, w2_ref[...], preferred_element_type=jnp.float32)
    h2 = _elu((h2 + b2_ref[...]).astype(jnp.bfloat16))                 # bf16 ELU (TB, 1024)

    logits = jnp.dot(h2, w3_ref[...], preferred_element_type=jnp.float32)
    logits = logits + b3_ref[...]                                      # (TB, C_pad) f32
    logits_ref[...] = logits.astype(logits_ref.dtype)                  # bf16 writeback

    # softmax over classes (padded class columns carry a -1e9 bias -> exp ~ 0)
    m = jnp.max(logits, axis=1, keepdims=True)
    e = jnp.exp(logits - m)
    denom = jnp.sum(e, axis=1, keepdims=True)
    probs_ref[...] = e * pl.reciprocal(denom, approx=True)


def _round_up(n, m):
    return ((n + m - 1) // m) * m


def _choose_batch_tiling(B, tile_b):
    """Pick (tb, B_pad, n_steps): 16-aligned bf16 tiles, bounded padding waste,
    and >=2 grid steps (when the batch allows) so v7x megacore engages."""
    B16 = _round_up(max(B, 1), 16)
    n_steps = pl.cdiv(B16, tile_b)
    if n_steps == 1 and B16 >= 32:
        n_steps = 2
    tb = _round_up(pl.cdiv(B16, n_steps), 16)
    return tb, tb * n_steps, n_steps


def simple_fcn2_forward(x, params, *, tile_b=1024):
    """x: (B, H, W) float32. Returns (probs, logits) like the PyTorch module."""
    w1, b1, w2, b2, w3, b3 = params
    B = x.shape[0]
    P = w1.shape[0]            # 784
    H = w1.shape[1]            # 1024
    C = w3.shape[1]            # 10

    x2d = x.reshape(B, -1).astype(jnp.float32)     # glue: flatten(1)

    # Lane-dense padding of feature / class dims, 16-sublane padding of batch (bf16).
    P_pad = _round_up(P, 128)                      # 784 -> 896
    C_pad = _round_up(C, 128)                      # 10  -> 128
    tb, B_pad, n_steps = _choose_batch_tiling(B, tile_b)

    # bf16 weights/activations (f32 accumulation inside the kernel); biases stay f32.
    x_p = jnp.pad(x2d, ((0, B_pad - B), (0, P_pad - P))).astype(jnp.bfloat16)
    w1_p = jnp.pad(w1, ((0, P_pad - P), (0, 0))).astype(jnp.bfloat16)
    w2_p = w2.astype(jnp.bfloat16)
    w3_p = jnp.pad(w3, ((0, 0), (0, C_pad - C))).astype(jnp.bfloat16)
    b1_p = b1.astype(jnp.float32)
    b2_p = b2.astype(jnp.float32)
    # Padded class columns get a very negative bias so softmax ignores them.
    b3_p = jnp.pad(b3.astype(jnp.float32), ((0, 0), (0, C_pad - C)),
                   constant_values=-1e9)

    grid = (n_steps,)
    resident = dict(pipeline_mode=pl.Buffered(1))  # constant-index blocks: single-buffer

    probs, logits = pl.pallas_call(
        fcn_kernel,
        out_shape=(
            jax.ShapeDtypeStruct((B_pad, C_pad), jnp.float32),
            jax.ShapeDtypeStruct((B_pad, C_pad), jnp.bfloat16),
        ),
        grid=grid,
        in_specs=[
            pl.BlockSpec((tb, P_pad), lambda i: (i, 0)),               # x: tiled batch
            pl.BlockSpec((P_pad, H), lambda i: (0, 0), **resident),    # weights resident
            pl.BlockSpec((1, H), lambda i: (0, 0), **resident),
            pl.BlockSpec((H, H), lambda i: (0, 0), **resident),
            pl.BlockSpec((1, H), lambda i: (0, 0), **resident),
            pl.BlockSpec((H, C_pad), lambda i: (0, 0), **resident),
            pl.BlockSpec((1, C_pad), lambda i: (0, 0), **resident),
        ],
        out_specs=(
            pl.BlockSpec((tb, C_pad), lambda i: (i, 0)),
            pl.BlockSpec((tb, C_pad), lambda i: (i, 0)),
        ),
        compiler_params=pltpu.CompilerParams(
            dimension_semantics=("parallel",),     # batch steps across TCs on v7x
            vmem_limit_bytes=48 << 20,             # safe on v7x (64 MiB physical VMEM)
        ),
    )(x_p, w1_p, b1_p, w2_p, b2_p, w3_p, b3_p)

    return probs[:B, :C], logits[:B, :C].astype(jnp.float32)


def init_params(key, num_pixels, hidden, num_classes):
    """Deterministic init mimicking torch.nn.Linear (uniform(-1/sqrt(in), 1/sqrt(in)))."""
    def linear(k, fan_in, fan_out):
        kw, kb = jax.random.split(k)
        bound = 1.0 / jnp.sqrt(fan_in)
        w = jax.random.uniform(kw, (fan_in, fan_out), jnp.float32, -bound, bound)
        b = jax.random.uniform(kb, (1, fan_out), jnp.float32, -bound, bound)
        return w, b

    k1, k2, k3 = jax.random.split(key, 3)
    w1, b1 = linear(k1, num_pixels, hidden)
    w2, b2 = linear(k2, hidden, hidden)
    w3, b3 = linear(k3, hidden, num_classes)
    return (w1, b1, w2, b2, w3, b3)


if __name__ == "__main__":
    H_IN, W_IN = 28, 28        # SimpleFCN2 default input_size
    HIDDEN = 1024
    NUM_CLASSES = 10
    B = 2

    key = jax.random.PRNGKey(0)
    k_x, k_p = jax.random.split(key)
    x = jax.random.normal(k_x, (B, H_IN, W_IN), jnp.float32)
    params = init_params(k_p, H_IN * W_IN, HIDDEN, NUM_CLASSES)

    probs, logits = jax.jit(simple_fcn2_forward)(x, params)
    jax.block_until_ready((probs, logits))

    # Pure-JAX reference matching the kernel's bf16-weight / bf16-ELU / f32-accumulate
    # numerics (logits writeback is bf16-rounded in the kernel, hence 1e-2 tolerance).
    w1, b1, w2, b2, w3, b3 = params
    xr = x.reshape(B, -1).astype(jnp.bfloat16).astype(jnp.float32)
    w1r = w1.astype(jnp.bfloat16).astype(jnp.float32)
    w2r = w2.astype(jnp.bfloat16).astype(jnp.float32)
    w3r = w3.astype(jnp.bfloat16).astype(jnp.float32)

    def elu_bf16(v):
        v = v.astype(jnp.bfloat16)
        return jnp.where(v > 0, v, jnp.exp(jnp.minimum(v, 0.0)) - 1.0)

    h1 = elu_bf16(xr @ w1r + b1).astype(jnp.float32)
    h2 = elu_bf16(h1 @ w2r + b2).astype(jnp.float32)
    ref_logits = h2 @ w3r + b3
    ref_probs = jax.nn.softmax(ref_logits, axis=1)

    assert probs.shape == (B, NUM_CLASSES) and logits.shape == (B, NUM_CLASSES)
    assert jnp.allclose(logits, ref_logits, atol=1e-2, rtol=1e-2), (
        "logits max err", float(jnp.max(jnp.abs(logits - ref_logits))))
    assert jnp.allclose(probs, ref_probs, atol=5e-3, rtol=5e-3), (
        "probs max err", float(jnp.max(jnp.abs(probs - ref_probs))))
    assert jnp.allclose(jnp.sum(probs, axis=1), 1.0, atol=1e-2)

    print("KERNEL_OK")
</pallas_src>

<mosaic_0001>
module attributes {stable_mosaic.version = 11 : i64} {
  func.func @fcn_kernel(%arg0: i32, %arg1: memref<16x896xbf16, #tpu.memory_space<vmem>>, %arg2: memref<896x1024xbf16, #tpu.memory_space<vmem>>, %arg3: memref<1x1024xf32, #tpu.memory_space<vmem>>, %arg4: memref<1024x1024xbf16, #tpu.memory_space<vmem>>, %arg5: memref<1x1024xf32, #tpu.memory_space<vmem>>, %arg6: memref<1024x128xbf16, #tpu.memory_space<vmem>>, %arg7: memref<1x128xf32, #tpu.memory_space<vmem>>, %arg8: memref<16x128xf32, #tpu.memory_space<vmem>>, %arg9: memref<16x128xbf16, #tpu.memory_space<vmem>>) attributes {dimension_semantics = [#tpu.dimension_semantics<parallel>], iteration_bounds = array<i64: 1>, scalar_prefetch = 0 : i64, scratch_operands = 0 : i64, tpu.core_type = #tpu.core_type<tc>, window_params = [{transform_indices = @transform_0, window_bounds = array<i64: 16, 896>}, {pipeline_mode = #tpu.pipeline_mode<synchronous>, transform_indices = @transform_1, window_bounds = array<i64: 896, 1024>}, {pipeline_mode = #tpu.pipeline_mode<synchronous>, transform_indices = @transform_2, window_bounds = array<i64: 1, 1024>}, {pipeline_mode = #tpu.pipeline_mode<synchronous>, transform_indices = @transform_3, window_bounds = array<i64: 1024, 1024>}, {pipeline_mode = #tpu.pipeline_mode<synchronous>, transform_indices = @transform_4, window_bounds = array<i64: 1, 1024>}, {pipeline_mode = #tpu.pipeline_mode<synchronous>, transform_indices = @transform_5, window_bounds = array<i64: 1024, 128>}, {pipeline_mode = #tpu.pipeline_mode<synchronous>, transform_indices = @transform_6, window_bounds = array<i64: 1, 128>}, {transform_indices = @transform_7, window_bounds = array<i64: 16, 128>}, {transform_indices = @transform_8, window_bounds = array<i64: 16, 128>}]} {
    %c0 = arith.constant 0 : index
    %c0_0 = arith.constant 0 : index
    %0 = vector.load %arg1[%c0, %c0_0] : memref<16x896xbf16, #tpu.memory_space<vmem>>, vector<16x896xbf16>
    %c0_1 = arith.constant 0 : index
    %c0_2 = arith.constant 0 : index
    %1 = vector.load %arg2[%c0_1, %c0_2] : memref<896x1024xbf16, #tpu.memory_space<vmem>>, vector<896x1024xbf16>
    %cst = arith.constant dense<0.000000e+00> : vector<16x1024xf32>
    %2 = tpu.matmul %0, %1, %cst {dimension_numbers = #tpu.dot_dimension_numbers<[1], [0], [0], [1], [0, 0, 1, 1], [], []>} : vector<16x896xbf16>, vector<896x1024xbf16>, vector<16x1024xf32> -> vector<16x1024xf32>
    %c0_3 = arith.constant 0 : index
    %c0_4 = arith.constant 0 : index
    %3 = vector.load %arg3[%c0_3, %c0_4] : memref<1x1024xf32, #tpu.memory_space<vmem>>, vector<1x1024xf32>
    %4 = vector.broadcast %3 : vector<1x1024xf32> to vector<16x1024xf32>
    %5 = arith.addf %2, %4 : vector<16x1024xf32>
    %6 = arith.truncf %5 : vector<16x1024xf32> to vector<16x1024xbf16>
    %cst_5 = arith.constant 0.000000e+00 : bf16
    %7 = vector.broadcast %cst_5 : bf16 to vector<16x1024xbf16>
    %8 = arith.cmpf ogt, %6, %7 : vector<16x1024xbf16>
    %cst_6 = arith.constant 0.000000e+00 : bf16
    %9 = vector.broadcast %cst_6 : bf16 to vector<16x1024xbf16>
    %10 = arith.minimumf %6, %9 : vector<16x1024xbf16>
    %11 = math.exp %10 : vector<16x1024xbf16>
    %cst_7 = arith.constant 1.000000e+00 : bf16
    %12 = vector.broadcast %cst_7 : bf16 to vector<16x1024xbf16>
    %13 = arith.subf %11, %12 : vector<16x1024xbf16>
    %14 = arith.select %8, %6, %13 : vector<16x1024xi1>, vector<16x1024xbf16>
    %c0_8 = arith.constant 0 : index
    %c0_9 = arith.constant 0 : index
    %15 = vector.load %arg4[%c0_8, %c0_9] : memref<1024x1024xbf16, #tpu.memory_space<vmem>>, vector<1024x1024xbf16>
    %cst_10 = arith.constant dense<0.000000e+00> : vector<16x1024xf32>
    %16 = tpu.matmul %14, %15, %cst_10 {dimension_numbers = #tpu.dot_dimension_numbers<[1], [0], [0], [1], [0, 0, 1, 1], [], []>} : vector<16x1024xbf16>, vector<1024x1024xbf16>, vector<16x1024xf32> -> vector<16x1024xf32>
    %c0_11 = arith.constant 0 : index
    %c0_12 = arith.constant 0 : index
    %17 = vector.load %arg5[%c0_11, %c0_12] : memref<1x1024xf32, #tpu.memory_space<vmem>>, vector<1x1024xf32>
    %18 = vector.broadcast %17 : vector<1x1024xf32> to vector<16x1024xf32>
    %19 = arith.addf %16, %18 : vector<16x1024xf32>
    %20 = arith.truncf %19 : vector<16x1024xf32> to vector<16x1024xbf16>
    %cst_13 = arith.constant 0.000000e+00 : bf16
    %21 = vector.broadcast %cst_13 : bf16 to vector<16x1024xbf16>
    %22 = arith.cmpf ogt, %20, %21 : vector<16x1024xbf16>
    %cst_14 = arith.constant 0.000000e+00 : bf16
    %23 = vector.broadcast %cst_14 : bf16 to vector<16x1024xbf16>
    %24 = arith.minimumf %20, %23 : vector<16x1024xbf16>
    %25 = math.exp %24 : vector<16x1024xbf16>
    %cst_15 = arith.constant 1.000000e+00 : bf16
    %26 = vector.broadcast %cst_15 : bf16 to vector<16x1024xbf16>
    %27 = arith.subf %25, %26 : vector<16x1024xbf16>
    %28 = arith.select %22, %20, %27 : vector<16x1024xi1>, vector<16x1024xbf16>
    %c0_16 = arith.constant 0 : index
    %c0_17 = arith.constant 0 : index
    %29 = vector.load %arg6[%c0_16, %c0_17] : memref<1024x128xbf16, #tpu.memory_space<vmem>>, vector<1024x128xbf16>
    %cst_18 = arith.constant dense<0.000000e+00> : vector<16x128xf32>
    %30 = tpu.matmul %28, %29, %cst_18 {dimension_numbers = #tpu.dot_dimension_numbers<[1], [0], [0], [1], [0, 0, 1, 1], [], []>} : vector<16x1024xbf16>, vector<1024x128xbf16>, vector<16x128xf32> -> vector<16x128xf32>
    %c0_19 = arith.constant 0 : index
    %c0_20 = arith.constant 0 : index
    %31 = vector.load %arg7[%c0_19, %c0_20] : memref<1x128xf32, #tpu.memory_space<vmem>>, vector<1x128xf32>
    %32 = vector.broadcast %31 : vector<1x128xf32> to vector<16x128xf32>
    %33 = arith.addf %30, %32 : vector<16x128xf32>
    %34 = arith.truncf %33 : vector<16x128xf32> to vector<16x128xbf16>
    %c0_21 = arith.constant 0 : index
    %c0_22 = arith.constant 0 : index
    %35 = vector.load %arg9[%c0_21, %c0_22] : memref<16x128xbf16, #tpu.memory_space<vmem>>, vector<16x128xbf16>
    tpu.vector_store %arg9[%c0_21, %c0_22], %34 {strides = array<i32>} : memref<16x128xbf16, #tpu.memory_space<vmem>>, vector<16x128xbf16>,
    %cst_23 = arith.constant dense<0xFF800000> : vector<16xf32>
    %36 = vector.multi_reduction <maximumf>, %33, %cst_23 [1] : vector<16x128xf32> to vector<16xf32>
    %37 = vector.shape_cast %36 : vector<16xf32> to vector<16x1xf32>
    %38 = vector.broadcast %37 : vector<16x1xf32> to vector<16x128xf32>
    %39 = arith.subf %33, %38 : vector<16x128xf32>
    %40 = math.exp %39 : vector<16x128xf32>
    %cst_24 = arith.constant dense<0.000000e+00> : vector<16xf32>
    %41 = vector.multi_reduction <add>, %40, %cst_24 [1] : vector<16x128xf32> to vector<16xf32>
    %42 = vector.shape_cast %41 : vector<16xf32> to vector<16x1xf32>
    %43 = tpu.reciprocal %42 {approx = true} : vector<16x1xf32> -> vector<16x1xf32>
    %44 = vector.broadcast %43 : vector<16x1xf32> to vector<16x128xf32>
    %45 = arith.mulf %40, %44 : vector<16x128xf32>
    %c0_25 = arith.constant 0 : index
    %c0_26 = arith.constant 0 : index
    %46 = vector.load %arg8[%c0_25, %c0_26] : memref<16x128xf32, #tpu.memory_space<vmem>>, vector<16x128xf32>
    tpu.vector_store %arg8[%c0_25, %c0_26], %45 {strides = array<i32>} : memref<16x128xf32, #tpu.memory_space<vmem>>, vector<16x128xf32>,
    return
  }
  func.func @transform_0(%arg0: i32) -> (i32, i32) {
    %c0_i32 = arith.constant 0 : i32
    %c0_i32_0 = arith.constant 0 : i32
    return %arg0, %c0_i32 : i32, i32
  }
  func.func @transform_1(%arg0: i32) -> (i32, i32) {
    %c0_i32 = arith.constant 0 : i32
    %c0_i32_0 = arith.constant 0 : i32
    %c0_i32_1 = arith.constant 0 : i32
    return %c0_i32, %c0_i32_0 : i32, i32
  }
  func.func @transform_2(%arg0: i32) -> (i32, i32) {
    %c0_i32 = arith.constant 0 : i32
    %c0_i32_0 = arith.constant 0 : i32
    %c0_i32_1 = arith.constant 0 : i32
    return %c0_i32, %c0_i32_0 : i32, i32
  }
  func.func @transform_3(%arg0: i32) -> (i32, i32) {
    %c0_i32 = arith.constant 0 : i32
    %c0_i32_0 = arith.constant 0 : i32
    %c0_i32_1 = arith.constant 0 : i32
    return %c0_i32, %c0_i32_0 : i32, i32
  }
  func.func @transform_4(%arg0: i32) -> (i32, i32) {
    %c0_i32 = arith.constant 0 : i32
    %c0_i32_0 = arith.constant 0 : i32
    %c0_i32_1 = arith.constant 0 : i32
    return %c0_i32, %c0_i32_0 : i32, i32
  }
  func.func @transform_5(%arg0: i32) -> (i32, i32) {
    %c0_i32 = arith.constant 0 : i32
    %c0_i32_0 = arith.constant 0 : i32
    %c0_i32_1 = arith.constant 0 : i32
    return %c0_i32, %c0_i32_0 : i32, i32
  }
  func.func @transform_6(%arg0: i32) -> (i32, i32) {
    %c0_i32 = arith.constant 0 : i32
    %c0_i32_0 = arith.constant 0 : i32
    %c0_i32_1 = arith.constant 0 : i32
    return %c0_i32, %c0_i32_0 : i32, i32
  }
  func.func @transform_7(%arg0: i32) -> (i32, i32) {
    %c0_i32 = arith.constant 0 : i32
    %c0_i32_0 = arith.constant 0 : i32
    return %arg0, %c0_i32 : i32, i32
  }
  func.func @transform_8(%arg0: i32) -> (i32, i32) {
    %c0_i32 = arith.constant 0 : i32
    %c0_i32_0 = arith.constant 0 : i32
    return %arg0, %c0_i32 : i32, i32
  }
}

</mosaic_0001>

<bundles_post_ra>
// kernel: simple_fcn2_forward.1
= control target key start
LH: loop header
LB: loop body
LE: loop exit
PB: predicated region body
PF: predicated region fallthrough
CT: control target
= control target key end

     0   :  { %s12950_s1 = inlined_call_operand.vmem [shape: bf16[896,1024], index: 1, kind: input, shape index: {}]   ;;  %s12951_s0 = inlined_call_operand.vmem [shape: bf16[16,896], index: 0, kind: input, shape index: {}]   ;;  %s12952_s2 = inlined_call_operand.vmem [shape: f32[1,1024], index: 2, kind: input, shape index: {}]   ;;  %s12953_s3 = inlined_call_operand.vmem [shape: bf16[1024,1024], index: 3, kind: input, shape index: {}]   ;;  %s12954_s5 = inlined_call_operand.vmem [shape: bf16[1024,128], index: 5, kind: input, shape index: {}]   ;;  %s12955_s4 = inlined_call_operand.vmem [shape: f32[1,1024], index: 4, kind: input, shape index: {}]   ;;  %s12956_s6 = inlined_call_operand.vmem [shape: f32[1,128], index: 6, kind: input, shape index: {}]   ;;  %s12957_s8 = inlined_call_operand.vmem [shape: bf16[16,128], index: 8, kind: output, shape index: {1}]   ;;  %s12958_s7 = inlined_call_operand.vmem [shape: f32[16,128], index: 7, kind: output, shape index: {0}]  }
   0x1   :  { %v94_v0 = vld [vmem:[%s12950_s1 + $0x1c0] sm:$0xff]  ;;  %v9549_v59 = vld [vmem:[%s12951_s0 + $0xc] ss:$28 sps:$4 sm:$0xff]  }
   0x2   :  { %v98_v1 = vld [vmem:[%s12950_s1 + $0x1e0] sm:$0xff]  ;;  %2879 = vmatprep.mubr.bf16.mxu1 %v9549_v59 }
   0x3   :  { %v222_v2 = vld [vmem:[%s12950_s1 + $0x5c0] sm:$0xff]  ;;  %v8207_v3 = vcombine.high %v94_v0, %v98_v1  ;;  %v8206_v5 = vcombine.low %v94_v0, %v98_v1 }
   0x4   :  { %v226_v4 = vld [vmem:[%s12950_s1 + $0x5e0] sm:$0xff] }
   0x5   :  { %v86_v6 = vld [vmem:[%s12950_s1 + $0x180] sm:$0xff]  ;;  %v8335_v8 = vcombine.high %v222_v2, %v226_v4  ;;  %v8334_v9 = vcombine.low %v222_v2, %v226_v4  ;;  %2804 = vmatprep.subr.bf16.mxu0 %v8207_v3 }
   0x6   :  { %v90_v7 = vld [vmem:[%s12950_s1 + $0x1a0] sm:$0xff]  ;;  %2805 = vmatpush1.bf16.msra.mxu0 %v8206_v5 }
   0x7   :  { %v8199_v10 = vcombine.high %v86_v6, %v90_v7  ;;  %v214_v11 = vld [vmem:[%s12950_s1 + $0x580] sm:$0xff]  ;;  %2847 = vmatprep.subr.bf16.mxu1 %v8335_v8  ;;  %v8198_v18 = vcombine.low %v86_v6, %v90_v7 }
   0x8   :  { %v218_v12 = vld [vmem:[%s12950_s1 + $0x5a0] sm:$0xff]  ;;  %2848 = vmatpush1.bf16.msra.mxu1 %v8334_v9 }
   0x9   :  { %v78_v13 = vld [vmem:[%s12950_s1 + $0x140] sm:$0xff]  ;;  %v8327_v14 = vcombine.high %v214_v11, %v218_v12  ;;  %2806 = vmatprep.subr.bf16.mxu0 %v8199_v10  ;;  %v8326_v19 = vcombine.low %v214_v11, %v218_v12 }
   0xa   :  { %v82_v15 = vld [vmem:[%s12950_s1 + $0x160] sm:$0xff]  ;;  %2807 = vmatpush1.bf16.msra.mxu0 %v8198_v18 }
   0xb   :  { %v206_v16 = vld [vmem:[%s12950_s1 + $0x540] sm:$0xff]  ;;  %v8191_v20 = vcombine.high %v78_v13, %v82_v15  ;;  %2849 = vmatprep.subr.bf16.mxu1 %v8327_v14  ;;  %v8190_v26 = vcombine.low %v78_v13, %v82_v15 }
   0xc   :  { %v210_v17 = vld [vmem:[%s12950_s1 + $0x560] sm:$0xff]  ;;  %2850 = vmatpush1.bf16.msra.mxu1 %v8326_v19 }
   0xd   :  { %v8319_v21 = vcombine.high %v206_v16, %v210_v17  ;;  %v70_v22 = vld [vmem:[%s12950_s1 + $0x100] sm:$0xff]  ;;  %2808 = vmatprep.subr.bf16.mxu0 %v8191_v20  ;;  %v8318_v27 = vcombine.low %v206_v16, %v210_v17 }
   0xe   :  { %v74_v23 = vld [vmem:[%s12950_s1 + $0x120] sm:$0xff]  ;;  %2809 = vmatpush1.bf16.msra.mxu0 %v8190_v26 }
   0xf   :  { %v198_v24 = vld [vmem:[%s12950_s1 + $0x500] sm:$0xff]  ;;  %v8183_v28 = vcombine.high %v70_v22, %v74_v23  ;;  %2851 = vmatprep.subr.bf16.mxu1 %v8319_v21  ;;  %v8182_v34 = vcombine.low %v70_v22, %v74_v23 }
  0x10   :  { %v202_v25 = vld [vmem:[%s12950_s1 + $0x520] sm:$0xff]  ;;  %2852 = vmatpush1.bf16.msra.mxu1 %v8318_v27 }
  0x11   :  { %v8311_v29 = vcombine.high %v198_v24, %v202_v25  ;;  %v62_v30 = vld [vmem:[%s12950_s1 + $0xc0] sm:$0xff]  ;;  %2810 = vmatprep.subr.bf16.mxu0 %v8183_v28  ;;  %v8310_v35 = vcombine.low %v198_v24, %v202_v25 }
  0x12   :  { %v66_v31 = vld [vmem:[%s12950_s1 + $0xe0] sm:$0xff]  ;;  %2811 = vmatpush1.bf16.msra.mxu0 %v8182_v34 }
  0x13   :  { %v190_v32 = vld [vmem:[%s12950_s1 + $0x4c0] sm:$0xff]  ;;  %v8175_v36 = vcombine.high %v62_v30, %v66_v31  ;;  %2853 = vmatprep.subr.bf16.mxu1 %v8311_v29  ;;  %v8174_v42 = vcombine.low %v62_v30, %v66_v31 }
  0x14   :  { %v194_v33 = vld [vmem:[%s12950_s1 + $0x4e0] sm:$0xff]  ;;  %2854 = vmatpush1.bf16.msra.mxu1 %v8310_v35 }
  0x15   :  { %v8303_v37 = vcombine.high %v190_v32, %v194_v33  ;;  %v54_v38 = vld [vmem:[%s12950_s1 + $0x80] sm:$0xff]  ;;  %2812 = vmatprep.subr.bf16.mxu0 %v8175_v36  ;;  %v8302_v43 = vcombine.low %v190_v32, %v194_v33 }
  0x16   :  { %v58_v39 = vld [vmem:[%s12950_s1 + $0xa0] sm:$0xff]  ;;  %2813 = vmatpush1.bf16.msra.mxu0 %v8174_v42 }
  0x17   :  { %v182_v40 = vld [vmem:[%s12950_s1 + $0x480] sm:$0xff]  ;;  %v8167_v44 = vcombine.high %v54_v38, %v58_v39  ;;  %2855 = vmatprep.subr.bf16.mxu1 %v8303_v37  ;;  %v8166_v50 = vcombine.low %v54_v38, %v58_v39 }
  0x18   :  { %v186_v41 = vld [vmem:[%s12950_s1 + $0x4a0] sm:$0xff]  ;;  %2856 = vmatpush1.bf16.msra.mxu1 %v8302_v43 }
  0x19   :  { %v8295_v45 = vcombine.high %v182_v40, %v186_v41  ;;  %v46_v46 = vld [vmem:[%s12950_s1 + $0x40] sm:$0xff]  ;;  %2814 = vmatprep.subr.bf16.mxu0 %v8167_v44  ;;  %v8294_v52 = vcombine.low %v182_v40, %v186_v41 }
  0x1a   :  { %v50_v47 = vld [vmem:[%s12950_s1 + $0x60] sm:$0xff]  ;;  %2815 = vmatpush1.bf16.msra.mxu0 %v8166_v50 }
  0x1b   :  { %v174_v48 = vld [vmem:[%s12950_s1 + $0x440] sm:$0xff]  ;;  %v8159_v53 = vcombine.high %v46_v46, %v50_v47  ;;  %2857 = vmatprep.subr.bf16.mxu1 %v8295_v45  ;;  %v8158_v60 = vcombine.low %v46_v46, %v50_v47 }
  0x1c   :  { %v178_v49 = vld [vmem:[%s12950_s1 + $0x460] sm:$0xff]  ;;  %2858 = vmatpush1.bf16.msra.mxu1 %v8294_v52 }
  0x1d   :  { %v38_v51 = vld [vmem:[%s12950_s1] sm:$0xff]  ;;  %v8287_v55 = vcombine.high %v174_v48, %v178_v49  ;;  %2816 = vmatprep.subr.bf16.mxu0 %v8159_v53  ;;  %v8286_v61 = vcombine.low %v174_v48, %v178_v49 }
  0x1e   :  { %v42_v54 = vld [vmem:[%s12950_s1 + $0x20] sm:$0xff]  ;;  %2817 = vmatpush1.bf16.msra.mxu0 %v8158_v60 }
  0x1f   :  { %v9538_v56 = vld [vmem:[%s12951_s0 + $0x4] ss:$28 sps:$4 sm:$0xff]   ;;  %v8151_v62 = vcombine.high %v38_v51, %v42_v54  ;;  %2859 = vmatprep.subr.bf16.mxu1 %v8287_v55  ;;  %v8150_v4 = vcombine.low %v38_v51, %v42_v54 }
  0x20   :  { %v166_v57 = vld [vmem:[%s12950_s1 + $0x400] sm:$0xff]  ;;  %2836 = vmatprep.mubr.bf16.mxu0 %v9538_v56  ;;  %2860 = vmatpush1.bf16.msra.mxu1 %v8286_v61 }
  0x21   :  { %v170_v58 = vld [vmem:[%s12950_s1 + $0x420] sm:$0xff]  ;;  %2818 = vmatprep.subr.bf16.mxu0 %v8151_v62 }
  0x22   :  { %v8279_v63 = vcombine.high %v166_v57, %v170_v58  ;;  %v158_v0 = vld [vmem:[%s12950_s1 + $0x3c0] sm:$0xff]  ;;  %v8278_v5 = vcombine.low %v166_v57, %v170_v58  ;;  %2819 = vmatpush1.bf16.msra.mxu0 %v8150_v4 }
  0x23   :  { %v162_v1 = vld [vmem:[%s12950_s1 + $0x3e0] sm:$0xff] }
  0x24   :  { %v286_v2 = vld [vmem:[%s12950_s1 + $0x7c0] sm:$0xff]  ;;  %v8271_v6 = vcombine.high %v158_v0, %v162_v1  ;;  %2861 = vmatprep.subr.bf16.mxu1 %v8279_v63  ;;  %v8270_v12 = vcombine.low %v158_v0, %v162_v1 }
  0x25   :  { %v290_v3 = vld [vmem:[%s12950_s1 + $0x7e0] sm:$0xff]  ;;  %2862 = vmatpush1.bf16.msra.mxu1 %v8278_v5 }
  0x26   :  { %v8399_v7 = vcombine.high %v286_v2, %v290_v3  ;;  %v150_v8 = vld [vmem:[%s12950_s1 + $0x380] sm:$0xff]  ;;  %2820 = vmatprep.subr.bf16.mxu0 %v8271_v6  ;;  %v8398_v13 = vcombine.low %v286_v2, %v290_v3 }
  0x27   :  { %v154_v9 = vld [vmem:[%s12950_s1 + $0x3a0] sm:$0xff]  ;;  %2821 = vmatpush2.bf16.msra.mxu0 %v8270_v12 }
  0x28   :  { %v278_v10 = vld [vmem:[%s12950_s1 + $0x780] sm:$0xff]  ;;  %v8263_v14 = vcombine.high %v150_v8, %v154_v9  ;;  %2863 = vmatprep.subr.bf16.mxu1 %v8399_v7  ;;  %v8262_v20 = vcombine.low %v150_v8, %v154_v9 }
  0x29   :  { %v282_v11 = vld [vmem:[%s12950_s1 + $0x7a0] sm:$0xff]  ;;  %2864 = vmatpush2.bf16.msra.mxu1 %v8398_v13 }
  0x2a   :  { %v8391_v15 = vcombine.high %v278_v10, %v282_v11  ;;  %v142_v16 = vld [vmem:[%s12950_s1 + $0x340] sm:$0xff]  ;;  %2822 = vmatprep.subr.bf16.mxu0 %v8263_v14  ;;  %v8390_v21 = vcombine.low %v278_v10, %v282_v11 }
  0x2b   :  { %v146_v17 = vld [vmem:[%s12950_s1 + $0x360] sm:$0xff]  ;;  %2823 = vmatpush2.bf16.msra.mxu0 %v8262_v20 }
  0x2c   :  { %v270_v18 = vld [vmem:[%s12950_s1 + $0x740] sm:$0xff]  ;;  %v8255_v22 = vcombine.high %v142_v16, %v146_v17  ;;  %2865 = vmatprep.subr.bf16.mxu1 %v8391_v15  ;;  %v8254_v28 = vcombine.low %v142_v16, %v146_v17 }
  0x2d   :  { %v274_v19 = vld [vmem:[%s12950_s1 + $0x760] sm:$0xff]  ;;  %2866 = vmatpush2.bf16.msra.mxu1 %v8390_v21 }
  0x2e   :  { %v8383_v23 = vcombine.high %v270_v18, %v274_v19  ;;  %v134_v24 = vld [vmem:[%s12950_s1 + $0x300] sm:$0xff]  ;;  %2824 = vmatprep.subr.bf16.mxu0 %v8255_v22  ;;  %v8382_v29 = vcombine.low %v270_v18, %v274_v19 }
  0x2f   :  { %v138_v25 = vld [vmem:[%s12950_s1 + $0x320] sm:$0xff]  ;;  %2825 = vmatpush2.bf16.msra.mxu0 %v8254_v28 }
  0x30   :  { %v262_v26 = vld [vmem:[%s12950_s1 + $0x700] sm:$0xff]  ;;  %v8247_v30 = vcombine.high %v134_v24, %v138_v25  ;;  %2867 = vmatprep.subr.bf16.mxu1 %v8383_v23  ;;  %v8246_v36 = vcombine.low %v134_v24, %v138_v25  ;;  %v9699_v24 = vld [vmem:[%s12951_s0 + $0x14] ss:$28 sps:$4 sm:$0xff]  }
  0x31   :  { %v266_v27 = vld [vmem:[%s12950_s1 + $0x720] sm:$0xff]  ;;  %2868 = vmatpush2.bf16.msra.mxu1 %v8382_v29 }
  0x32   :  { %v8375_v31 = vcombine.high %v262_v26, %v266_v27  ;;  %v126_v32 = vld [vmem:[%s12950_s1 + $0x2c0] sm:$0xff]  ;;  %2826 = vmatprep.subr.bf16.mxu0 %v8247_v30  ;;  %v8374_v37 = vcombine.low %v262_v26, %v266_v27 }
  0x33   :  { %v130_v33 = vld [vmem:[%s12950_s1 + $0x2e0] sm:$0xff]  ;;  %2827 = vmatpush2.bf16.msra.mxu0 %v8246_v36 }
  0x34   :  { %v254_v34 = vld [vmem:[%s12950_s1 + $0x6c0] sm:$0xff]  ;;  %v8239_v38 = vcombine.high %v126_v32, %v130_v33  ;;  %2869 = vmatprep.subr.bf16.mxu1 %v8375_v31  ;;  %v8238_v44 = vcombine.low %v126_v32, %v130_v33  ;;  %v9398_v31 = vmov 0  }
  0x35   :  { %v258_v35 = vld [vmem:[%s12950_s1 + $0x6e0] sm:$0xff]  ;;  %2870 = vmatpush2.bf16.msra.mxu1 %v8374_v37 }
  0x36   :  { %v118_v39 = vld [vmem:[%s12950_s1 + $0x280] sm:$0xff]  ;;  %v8367_v40 = vcombine.high %v254_v34, %v258_v35  ;;  %2828 = vmatprep.subr.bf16.mxu0 %v8239_v38  ;;  %v8366_v45 = vcombine.low %v254_v34, %v258_v35 }
  0x37   :  { %v122_v41 = vld [vmem:[%s12950_s1 + $0x2a0] sm:$0xff]  ;;  %2829 = vmatpush2.bf16.msra.mxu0 %v8238_v44 }
  0x38   :  { %v246_v42 = vld [vmem:[%s12950_s1 + $0x680] sm:$0xff]  ;;  %v8231_v46 = vcombine.high %v118_v39, %v122_v41  ;;  %2871 = vmatprep.subr.bf16.mxu1 %v8367_v40  ;;  %v8230_v52 = vcombine.low %v118_v39, %v122_v41 }
  0x39   :  { %v250_v43 = vld [vmem:[%s12950_s1 + $0x6a0] sm:$0xff]  ;;  %2872 = vmatpush2.bf16.msra.mxu1 %v8366_v45 }
  0x3a   :  { %v8359_v47 = vcombine.high %v246_v42, %v250_v43  ;;  %v110_v48 = vld [vmem:[%s12950_s1 + $0x240] sm:$0xff]  ;;  %2830 = vmatprep.subr.bf16.mxu0 %v8231_v46  ;;  %v8358_v53 = vcombine.low %v246_v42, %v250_v43 }
  0x3b   :  { %v114_v49 = vld [vmem:[%s12950_s1 + $0x260] sm:$0xff]  ;;  %2831 = vmatpush2.bf16.msra.mxu0 %v8230_v52 }
  0x3c   :  { %v238_v50 = vld [vmem:[%s12950_s1 + $0x640] sm:$0xff]  ;;  %v8223_v54 = vcombine.high %v110_v48, %v114_v49  ;;  %2873 = vmatprep.subr.bf16.mxu1 %v8359_v47  ;;  %v8222_v62 = vcombine.low %v110_v48, %v114_v49 }
  0x3d   :  { %v242_v51 = vld [vmem:[%s12950_s1 + $0x660] sm:$0xff]  ;;  %2874 = vmatpush2.bf16.msra.mxu1 %v8358_v53 }
  0x3e   :  { %v8351_v55 = vcombine.high %v238_v50, %v242_v51  ;;  %v102_v57 = vld [vmem:[%s12950_s1 + $0x200] sm:$0xff]  ;;  %2832 = vmatprep.subr.bf16.mxu0 %v8223_v54  ;;  %v8350_v63 = vcombine.low %v238_v50, %v242_v51 }
  0x3f   :  { %v106_v58 = vld [vmem:[%s12950_s1 + $0x220] sm:$0xff]  ;;  %2833 = vmatpush2.bf16.msra.mxu0 %v8222_v62 }
  0x40   :  { %v230_v60 = vld [vmem:[%s12950_s1 + $0x600] sm:$0xff]  ;;  %v8215_v0 = vcombine.high %v102_v57, %v106_v58  ;;  %2875 = vmatprep.subr.bf16.mxu1 %v8351_v55  ;;  %v8214_v6 = vcombine.low %v102_v57, %v106_v58 }
  0x41   :  { %v234_v61 = vld [vmem:[%s12950_s1 + $0x620] sm:$0xff]  ;;  %2876 = vmatpush2.bf16.msra.mxu1 %v8350_v63 }
  0x42   :  { %v8343_v1 = vcombine.high %v230_v60, %v234_v61  ;;  %v350_v2 = vld [vmem:[%s12950_s1 + $0x9c0] sm:$0xff]  ;;  %2834 = vmatprep.subr.bf16.mxu0 %v8215_v0  ;;  %v8342_v7 = vcombine.low %v230_v60, %v234_v61 }
  0x43   :  { %v354_v3 = vld [vmem:[%s12950_s1 + $0x9e0] sm:$0xff]  ;;  %2835 = vmatpush2.bf16.msra.mxu0 %v8214_v6 }
  0x44   :  { %v478_v4 = vld [vmem:[%s12950_s1 + $0xdc0] sm:$0xff]  ;;  %v8463_v8 = vcombine.high %v350_v2, %v354_v3  ;;  %2877 = vmatprep.subr.bf16.mxu1 %v8343_v1  ;;  %v8462_v16 = vcombine.low %v350_v2, %v354_v3 }
  0x45   :  { %v482_v5 = vld [vmem:[%s12950_s1 + $0xde0] sm:$0xff]  ;;  %2878 = vmatpush2.bf16.msra.mxu1 %v8342_v7 }
  0x46   :  { %v8591_v9 = vcombine.high %v478_v4, %v482_v5  ;;  %v342_v10 = vld [vmem:[%s12950_s1 + $0x980] sm:$0xff]  ;;  %2890 = vmatprep.subr.bf16.mxu0 %v8463_v8  ;;  %v8590_v17 = vcombine.low %v478_v4, %v482_v5 }
  0x47   :  { %v346_v11 = vld [vmem:[%s12950_s1 + $0x9a0] sm:$0xff] }
  0x48   :  { %v9670_v12 = vld [vmem:[%s12951_s0] ss:$28 sps:$4 sm:$0xff]   ;;  %v9681_v15 = vld [vmem:[%s12951_s0 + $0x8] ss:$28 sps:$4 sm:$0xff]   ;;  %v8455_v18 = vcombine.high %v342_v10, %v346_v11  ;;  %2933 = vmatprep.subr.bf16.mxu1 %v8591_v9  ;;  %v8454_v25 = vcombine.low %v342_v10, %v346_v11 }
  0x49   :  { %v470_v13 = vld [vmem:[%s12950_s1 + $0xd80] sm:$0xff]  ;;  %2837 = vmatmul.mubr.bf16.vlgmr.msra.gmra.mxu0 %v9670_v12  ;;  %2880 = vmatmul.mubr.bf16.vlgmr.msra.gmra.mxu1 %v9681_v15  ;;  %v95_v10 = vld [vmem:[%s12950_s1 + $0x1c8] sm:$0xff] }
  0x4a   :  { %v474_v14 = vld [vmem:[%s12950_s1 + $0xda0] sm:$0xff]  ;;  %2891 = vmatpush1.bf16.msra.mxu0 %v8462_v16  ;;  %2934 = vmatpush1.bf16.msra.mxu1 %v8590_v17  ;;  %v99_v11 = vld [vmem:[%s12950_s1 + $0x1e8] sm:$0xff] }
  0x4b   :  { %v8583_v19 = vcombine.high %v470_v13, %v474_v14  ;;  %v334_v20 = vld [vmem:[%s12950_s1 + $0x940] sm:$0xff]  ;;  %2892 = vmatprep.subr.bf16.mxu0 %v8455_v18  ;;  %v8582_v26 = vcombine.low %v470_v13, %v474_v14  ;;  %2965 = vmatprep.mubr.bf16.mxu1 %v9398_v31  ;;  %v8209_v17 = vcombine.high %v95_v10, %v99_v11 }
  0x4c   :  { %v338_v21 = vld [vmem:[%s12950_s1 + $0x960] sm:$0xff]  ;;  %2922 = vmatprep.mubr.bf16.mxu0 %v9699_v24 }
  0x4d   :  { %v462_v22 = vld [vmem:[%s12950_s1 + $0xd40] sm:$0xff]  ;;  %v8447_v27 = vcombine.high %v334_v20, %v338_v21  ;;  %2935 = vmatprep.subr.bf16.mxu1 %v8583_v19  ;;  %v8446_v34 = vcombine.low %v334_v20, %v338_v21  ;;  %v87_v20 = vld [vmem:[%s12950_s1 + $0x188] sm:$0xff] }
  0x4e   :  { %v466_v23 = vld [vmem:[%s12950_s1 + $0xd60] sm:$0xff]  ;;  %2893 = vmatpush1.bf16.msra.mxu0 %v8454_v25  ;;  %2936 = vmatpush1.bf16.msra.mxu1 %v8582_v26  ;;  %v91_v21 = vld [vmem:[%s12950_s1 + $0x1a8] sm:$0xff]  ;;  %v8208_v25 = vcombine.low %v95_v10, %v99_v11 }
  0x4f   :  { %v8575_v28 = vcombine.high %v462_v22, %v466_v23  ;;  %v326_v29 = vld [vmem:[%s12950_s1 + $0x900] sm:$0xff]  ;;  %2894 = vmatprep.subr.bf16.mxu0 %v8447_v27  ;;  %v8574_v35 = vcombine.low %v462_v22, %v466_v23  ;;  %v9791_v23 = vld [vmem:[%s12951_s0 + $0x18] ss:$28 sps:$4 sm:$0xff]   ;;  %v8201_v27 = vcombine.high %v87_v20, %v91_v21 }
  0x50   :  { %v330_v30 = vld [vmem:[%s12950_s1 + $0x920] sm:$0xff] }
  0x51   :  { %v454_v32 = vld [vmem:[%s12950_s1 + $0xd00] sm:$0xff]  ;;  %v8439_v36 = vcombine.high %v326_v29, %v330_v30  ;;  %2937 = vmatprep.subr.bf16.mxu1 %v8575_v28  ;;  %v8438_v42 = vcombine.low %v326_v29, %v330_v30  ;;  %v79_v30 = vld [vmem:[%s12950_s1 + $0x148] sm:$0xff] }
  0x52   :  { %v458_v33 = vld [vmem:[%s12950_s1 + $0xd20] sm:$0xff]  ;;  %2895 = vmatpush1.bf16.msra.mxu0 %v8446_v34  ;;  %2938 = vmatpush1.bf16.msra.mxu1 %v8574_v35  ;;  %v8200_v34 = vcombine.low %v87_v20, %v91_v21 }
  0x53   :  { %v8567_v37 = vcombine.high %v454_v32, %v458_v33  ;;  %v318_v38 = vld [vmem:[%s12950_s1 + $0x8c0] sm:$0xff]  ;;  %2896 = vmatprep.subr.bf16.mxu0 %v8439_v36  ;;  %v8566_v43 = vcombine.low %v454_v32, %v458_v33  ;;  %v83_v32 = vld [vmem:[%s12950_s1 + $0x168] sm:$0xff] }
  0x54   :  { %v322_v39 = vld [vmem:[%s12950_s1 + $0x8e0] sm:$0xff]  ;;  %v8193_v36 = vcombine.high %v79_v30, %v83_v32 }
  0x55   :  { %v446_v40 = vld [vmem:[%s12950_s1 + $0xcc0] sm:$0xff]  ;;  %v8431_v44 = vcombine.high %v318_v38, %v322_v39  ;;  %2939 = vmatprep.subr.bf16.mxu1 %v8567_v37  ;;  %v8430_v50 = vcombine.low %v318_v38, %v322_v39  ;;  %v71_v39 = vld [vmem:[%s12950_s1 + $0x108] sm:$0xff] }
  0x56   :  { %v450_v41 = vld [vmem:[%s12950_s1 + $0xce0] sm:$0xff]  ;;  %2897 = vmatpush1.bf16.msra.mxu0 %v8438_v42  ;;  %2940 = vmatpush1.bf16.msra.mxu1 %v8566_v43  ;;  %v8192_v42 = vcombine.low %v79_v30, %v83_v32  ;;  %v155_v30 = vld [vmem:[%s12950_s1 + $0x3a8] sm:$0xff] }
  0x57   :  { %v8559_v45 = vcombine.high %v446_v40, %v450_v41  ;;  %v310_v46 = vld [vmem:[%s12950_s1 + $0x880] sm:$0xff]  ;;  %2898 = vmatprep.subr.bf16.mxu0 %v8431_v44  ;;  %v8558_v51 = vcombine.low %v446_v40, %v450_v41  ;;  %v75_v40 = vld [vmem:[%s12950_s1 + $0x128] sm:$0xff] }
  0x58   :  { %v314_v47 = vld [vmem:[%s12950_s1 + $0x8a0] sm:$0xff]  ;;  %v8185_v44 = vcombine.high %v71_v39, %v75_v40 }
  0x59   :  { %v438_v48 = vld [vmem:[%s12950_s1 + $0xc80] sm:$0xff]  ;;  %v8423_v52 = vcombine.high %v310_v46, %v314_v47  ;;  %2941 = vmatprep.subr.bf16.mxu1 %v8559_v45  ;;  %v8422_v60 = vcombine.low %v310_v46, %v314_v47  ;;  %v63_v46 = vld [vmem:[%s12950_s1 + $0xc8] sm:$0xff] }
  0x5a   :  { %v442_v49 = vld [vmem:[%s12950_s1 + $0xca0] sm:$0xff]  ;;  %2899 = vmatpush1.bf16.msra.mxu0 %v8430_v50  ;;  %2942 = vmatpush1.bf16.msra.mxu1 %v8558_v51  ;;  %v67_v47 = vld [vmem:[%s12950_s1 + $0xe8] sm:$0xff] }
  0x5b   :  { %v8551_v53 = vcombine.high %v438_v48, %v442_v49  ;;  %v302_v54 = vld [vmem:[%s12950_s1 + $0x840] sm:$0xff]  ;;  %2900 = vmatprep.subr.bf16.mxu0 %v8423_v52  ;;  %v8550_v61 = vcombine.low %v438_v48, %v442_v49  ;;  %v8184_v49 = vcombine.low %v71_v39, %v75_v40  ;;  %v8177_v51 = vcombine.high %v63_v46, %v67_v47  ;;  %v147_v39 = vld [vmem:[%s12950_s1 + $0x368] sm:$0xff] }
  0x5c   :  { %v306_v55 = vld [vmem:[%s12950_s1 + $0x860] sm:$0xff] }
  0x5d   :  { %v430_v57 = vld [vmem:[%s12950_s1 + $0xc40] sm:$0xff]  ;;  %v8415_v62 = vcombine.high %v302_v54, %v306_v55  ;;  %2943 = vmatprep.subr.bf16.mxu1 %v8551_v53  ;;  %v8414_v4 = vcombine.low %v302_v54, %v306_v55  ;;  %v55_v54 = vld [vmem:[%s12950_s1 + $0x88] sm:$0xff] }
  0x5e   :  { %v434_v58 = vld [vmem:[%s12950_s1 + $0xc60] sm:$0xff]  ;;  %2901 = vmatpush1.bf16.msra.mxu0 %v8422_v60  ;;  %2944 = vmatpush1.bf16.msra.mxu1 %v8550_v61  ;;  %v59_v55 = vld [vmem:[%s12950_s1 + $0xa8] sm:$0xff] }
  0x5f   :  { %v8543_v63 = vcombine.high %v430_v57, %v434_v58  ;;  %v294_v0 = vld [vmem:[%s12950_s1 + $0x800] sm:$0xff]  ;;  %2902 = vmatprep.subr.bf16.mxu0 %v8415_v62  ;;  %v8542_v5 = vcombine.low %v430_v57, %v434_v58  ;;  %v8176_v58 = vcombine.low %v63_v46, %v67_v47  ;;  %v8169_v61 = vcombine.high %v55_v54, %v59_v55 }
  0x60   :  { %v298_v1 = vld [vmem:[%s12950_s1 + $0x820] sm:$0xff] }
  0x61   :  { %v422_v2 = vld [vmem:[%s12950_s1 + $0xc00] sm:$0xff]  ;;  %v8407_v6 = vcombine.high %v294_v0, %v298_v1  ;;  %2945 = vmatprep.subr.bf16.mxu1 %v8543_v63  ;;  %v8406_v13 = vcombine.low %v294_v0, %v298_v1  ;;  %v47_v0 = vld [vmem:[%s12950_s1 + $0x48] sm:$0xff] }
  0x62   :  { %v426_v3 = vld [vmem:[%s12950_s1 + $0xc20] sm:$0xff]  ;;  %2903 = vmatpush1.bf16.msra.mxu0 %v8414_v4  ;;  %2946 = vmatpush1.bf16.msra.mxu1 %v8542_v5  ;;  %v51_v1 = vld [vmem:[%s12950_s1 + $0x68] sm:$0xff] }
  0x63   :  { %v8535_v7 = vcombine.high %v422_v2, %v426_v3  ;;  %v414_v8 = vld [vmem:[%s12950_s1 + $0xbc0] sm:$0xff]  ;;  %2904 = vmatprep.subr.bf16.mxu0 %v8407_v6  ;;  %v8534_v14 = vcombine.low %v422_v2, %v426_v3  ;;  %v8168_v3 = vcombine.low %v55_v54, %v59_v55  ;;  %v8161_v5 = vcombine.high %v47_v0, %v51_v1 }
  0x64   :  { %v418_v9 = vld [vmem:[%s12950_s1 + $0xbe0] sm:$0xff]  ;;  %v8160_v11 = vcombine.low %v47_v0, %v51_v1 }
  0x65   :  { %v8527_v16 = vcombine.high %v414_v8, %v418_v9  ;;  %2947 = vmatprep.subr.bf16.mxu1 %v8535_v7  ;;  %v406_v18 = vld [vmem:[%s12950_s1 + $0xb80] sm:$0xff]  ;;  %v8526_v22 = vcombine.low %v414_v8, %v418_v9  ;;  %v39_v8 = vld [vmem:[%s12950_s1 + $0x8] sm:$0xff] }
  0x66   :  { %v410_v19 = vld [vmem:[%s12950_s1 + $0xba0] sm:$0xff]  ;;  %2905 = vmatpush1.bf16.msra.mxu0 %v8406_v13  ;;  %2948 = vmatpush1.bf16.msra.mxu1 %v8534_v14  ;;  %v43_v9 = vld [vmem:[%s12950_s1 + $0x28] sm:$0xff] }
  0x67   :  { %2906 = vmatprep.subr.bf16.mxu0 %v8527_v16  ;;  %v8519_v26 = vcombine.high %v406_v18, %v410_v19  ;;  %2976 = vmatprep.subr.bf16.mxu1 %v8209_v17  ;;  %v398_v28 = vld [vmem:[%s12950_s1 + $0xb40] sm:$0xff]  ;;  %v8518_v33 = vcombine.low %v406_v18, %v410_v19  ;;  %v8153_v14 = vcombine.high %v39_v8, %v43_v9  ;;  %v223_v16 = vld [vmem:[%s12950_s1 + $0x5c8] sm:$0xff] }
  0x68   :  { %v402_v29 = vld [vmem:[%s12950_s1 + $0xb60] sm:$0xff]  ;;  %v227_v17 = vld [vmem:[%s12950_s1 + $0x5e8] sm:$0xff]  ;;  %v8152_v21 = vcombine.low %v39_v8, %v43_v9 }
  0x69   :  { %2966 = vmatmul.mubr.bf16.vlgmr.msra.gmra.mxu1 %v9791_v23  ;;  %v8511_v35 = vcombine.high %v398_v28, %v402_v29  ;;  %v390_v37 = vld [vmem:[%s12950_s1 + $0xb00] sm:$0xff]  ;;  %v8510_v41 = vcombine.low %v398_v28, %v402_v29  ;;  %v159_v18 = vld [vmem:[%s12950_s1 + $0x3c8] sm:$0xff]  ;;  %v8336_v32 = vcombine.low %v223_v16, %v227_v17 }
  0x6a   :  { %2907 = vmatpush2.bf16.msra.mxu0 %v8526_v22  ;;  %2977 = vmatpush1.bf16.msra.mxu1 %v8208_v25  ;;  %v394_v38 = vld [vmem:[%s12950_s1 + $0xb20] sm:$0xff]  ;;  %v163_v19 = vld [vmem:[%s12950_s1 + $0x3e8] sm:$0xff]  ;;  %v8337_v22 = vcombine.high %v223_v16, %v227_v17 }
  0x6b   :  { %2908 = vmatprep.subr.bf16.mxu0 %v8519_v26  ;;  %2978 = vmatprep.subr.bf16.mxu1 %v8201_v27  ;;  %v8503_v43 = vcombine.high %v390_v37, %v394_v38  ;;  %v386_v45 = vld [vmem:[%s12950_s1 + $0xae0] sm:$0xff]  ;;  %v8502_v48 = vcombine.low %v390_v37, %v394_v38  ;;  %v8273_v25 = vcombine.high %v159_v18, %v163_v19  ;;  %v215_v26 = vld [vmem:[%s12950_s1 + $0x588] sm:$0xff] }
  0x6c   :  { %3008 = vmatprep.mubr.bf16.mxu1 %v9538_v56  ;;  %v382_v56 = vld [vmem:[%s12950_s1 + $0xac0] sm:$0xff]  ;;  %v219_v27 = vld [vmem:[%s12950_s1 + $0x5a8] sm:$0xff] }
  0x6d   :  { %v8495_v50 = vcombine.high %v382_v56, %v386_v45  ;;  %v374_v52 = vld [vmem:[%s12950_s1 + $0xa80] sm:$0xff]  ;;  %v8494_v57 = vcombine.low %v382_v56, %v386_v45  ;;  %v9888_v28 = vld [vmem:[%s12951_s0 + $0x10] ss:$28 sps:$4 sm:$0xff]   ;;  %v8328_v40 = vcombine.low %v215_v26, %v219_v27 }
  0x6e   :  { %2909 = vmatpush2.bf16.msra.mxu0 %v8518_v33  ;;  %2979 = vmatpush1.bf16.msra.mxu1 %v8200_v34  ;;  %v378_v53 = vld [vmem:[%s12950_s1 + $0xaa0] sm:$0xff]  ;;  %v151_v29 = vld [vmem:[%s12950_s1 + $0x388] sm:$0xff]  ;;  %v8272_v33 = vcombine.low %v159_v18, %v163_v19  ;;  %v8329_v34 = vcombine.high %v215_v26, %v219_v27 }
  0x6f   :  { %2910 = vmatprep.subr.bf16.mxu0 %v8511_v35  ;;  %2980 = vmatprep.subr.bf16.mxu1 %v8193_v36  ;;  %v8487_v60 = vcombine.high %v374_v52, %v378_v53  ;;  %v366_v62 = vld [vmem:[%s12950_s1 + $0xa40] sm:$0xff]  ;;  %v8486_v2 = vcombine.low %v374_v52, %v378_v53  ;;  %v8265_v35 = vcombine.high %v151_v29, %v155_v30  ;;  %v207_v36 = vld [vmem:[%s12950_s1 + $0x548] sm:$0xff] }
  0x70   :  { %v370_v63 = vld [vmem:[%s12950_s1 + $0xa60] sm:$0xff]  ;;  %v211_v37 = vld [vmem:[%s12950_s1 + $0x568] sm:$0xff] }
  0x71   :  { %v8479_v4 = vcombine.high %v366_v62, %v370_v63  ;;  %v358_v6 = vld [vmem:[%s12950_s1 + $0xa00] sm:$0xff]  ;;  %v8478_v10 = vcombine.low %v366_v62, %v370_v63  ;;  %v143_v38 = vld [vmem:[%s12950_s1 + $0x348] sm:$0xff]  ;;  %v8320_v46 = vcombine.low %v207_v36, %v211_v37 }
  0x72   :  { %2911 = vmatpush2.bf16.msra.mxu0 %v8510_v41  ;;  %2981 = vmatpush1.bf16.msra.mxu1 %v8192_v42  ;;  %v362_v7 = vld [vmem:[%s12950_s1 + $0xa20] sm:$0xff]  ;;  %v8264_v41 = vcombine.low %v151_v29, %v155_v30  ;;  %v8321_v42 = vcombine.high %v207_v36, %v211_v37  ;;  %v203_v56 = vld [vmem:[%s12950_s1 + $0x528] sm:$0xff]  ;;  %v8256_v47 = vcombine.low %v143_v38, %v147_v39 }
  0x73   :  { %2912 = vmatprep.subr.bf16.mxu0 %v8503_v43  ;;  %2982 = vmatprep.subr.bf16.mxu1 %v8185_v44  ;;  %v8471_v13 = vcombine.high %v358_v6, %v362_v7  ;;  %v8470_v20 = vcombine.low %v358_v6, %v362_v7  ;;  %v8257_v43 = vcombine.high %v143_v38, %v147_v39  ;;  %v199_v44 = vld [vmem:[%s12950_s1 + $0x508] sm:$0xff] }
  0x74   :  { %v135_v45 = vld [vmem:[%s12950_s1 + $0x308] sm:$0xff]  ;;  %v8312_v54 = vcombine.low %v199_v44, %v203_v56 }
  0x75   :  { %v127_v52 = vld [vmem:[%s12950_s1 + $0x2c8] sm:$0xff] }
  0x76   :  { %2913 = vmatpush2.bf16.msra.mxu0 %v8502_v48  ;;  %2983 = vmatpush1.bf16.msra.mxu1 %v8184_v49  ;;  %v8313_v48 = vcombine.high %v199_v44, %v203_v56  ;;  %v131_v53 = vld [vmem:[%s12950_s1 + $0x2e8] sm:$0xff] }
  0x77   :  { %2914 = vmatprep.subr.bf16.mxu0 %v8495_v50  ;;  %2984 = vmatprep.subr.bf16.mxu1 %v8177_v51  ;;  %v191_v50 = vld [vmem:[%s12950_s1 + $0x4c8] sm:$0xff]  ;;  %v8240_v1 = vcombine.low %v127_v52, %v131_v53 }
  0x78   :  { %v195_v51 = vld [vmem:[%s12950_s1 + $0x4e8] sm:$0xff] }
  0x79   :  { %v119_v62 = vld [vmem:[%s12950_s1 + $0x288] sm:$0xff]  ;;  %v8304_v0 = vcombine.low %v191_v50, %v195_v51 }
  0x7a   :  { %2915 = vmatpush2.bf16.msra.mxu0 %v8494_v57  ;;  %2985 = vmatpush1.bf16.msra.mxu1 %v8176_v58  ;;  %v8305_v57 = vcombine.high %v191_v50, %v195_v51  ;;  %v8241_v58 = vcombine.high %v127_v52, %v131_v53  ;;  %v123_v63 = vld [vmem:[%s12950_s1 + $0x2a8] sm:$0xff] }
  0x7b   :  { %2916 = vmatprep.subr.bf16.mxu0 %v8487_v60  ;;  %2986 = vmatprep.subr.bf16.mxu1 %v8169_v61  ;;  %v183_v60 = vld [vmem:[%s12950_s1 + $0x488] sm:$0xff]  ;;  %v8232_v9 = vcombine.low %v119_v62, %v123_v63 }
  0x7c   :  { %v187_v61 = vld [vmem:[%s12950_s1 + $0x4a8] sm:$0xff] }
  0x7d   :  { %v111_v6 = vld [vmem:[%s12950_s1 + $0x248] sm:$0xff]  ;;  %v8296_v8 = vcombine.low %v183_v60, %v187_v61 }
  0x7e   :  { %2917 = vmatpush2.bf16.msra.mxu0 %v8486_v2  ;;  %2987 = vmatpush1.bf16.msra.mxu1 %v8168_v3  ;;  %v8297_v2 = vcombine.high %v183_v60, %v187_v61  ;;  %v8233_v3 = vcombine.high %v119_v62, %v123_v63  ;;  %v115_v7 = vld [vmem:[%s12950_s1 + $0x268] sm:$0xff] }
  0x7f   :  { %2918 = vmatprep.subr.bf16.mxu0 %v8479_v4  ;;  %2988 = vmatprep.subr.bf16.mxu1 %v8161_v5  ;;  %v175_v4 = vld [vmem:[%s12950_s1 + $0x448] sm:$0xff]  ;;  %v8224_v19 = vcombine.low %v111_v6, %v115_v7 }
  0x80   :  { %v179_v5 = vld [vmem:[%s12950_s1 + $0x468] sm:$0xff] }
  0x81   :  { %v103_v16 = vld [vmem:[%s12950_s1 + $0x208] sm:$0xff]  ;;  %v8288_v18 = vcombine.low %v175_v4, %v179_v5 }
  0x82   :  { %2919 = vmatpush2.bf16.msra.mxu0 %v8478_v10  ;;  %2989 = vmatpush1.bf16.msra.mxu1 %v8160_v11  ;;  %v8289_v10 = vcombine.high %v175_v4, %v179_v5  ;;  %v8225_v11 = vcombine.high %v111_v6, %v115_v7  ;;  %v107_v17 = vld [vmem:[%s12950_s1 + $0x228] sm:$0xff] }
  0x83   :  { %2920 = vmatprep.subr.bf16.mxu0 %v8471_v13  ;;  %2990 = vmatprep.subr.bf16.mxu1 %v8153_v14  ;;  %v167_v13 = vld [vmem:[%s12950_s1 + $0x408] sm:$0xff]  ;;  %v8216_v30 = vcombine.low %v103_v16, %v107_v17 }
  0x84   :  { %v171_v14 = vld [vmem:[%s12950_s1 + $0x428] sm:$0xff] }
  0x85   :  { %v351_v26 = vld [vmem:[%s12950_s1 + $0x9c8] sm:$0xff]  ;;  %v8280_v29 = vcombine.low %v167_v13, %v171_v14 }
  0x86   :  { %2921 = vmatpush2.bf16.msra.mxu0 %v8470_v20  ;;  %2991 = vmatpush1.bf16.msra.mxu1 %v8152_v21  ;;  %v8281_v20 = vcombine.high %v167_v13, %v171_v14  ;;  %v8217_v21 = vcombine.high %v103_v16, %v107_v17  ;;  %v355_v27 = vld [vmem:[%s12950_s1 + $0x9e8] sm:$0xff] }
  0x87   :  { %3019 = vmatprep.subr.bf16.mxu0 %v8337_v22  ;;  %2992 = vmatprep.subr.bf16.mxu1 %v8273_v25  ;;  %v287_v22 = vld [vmem:[%s12950_s1 + $0x7c8] sm:$0xff]  ;;  %v8464_v39 = vcombine.low %v351_v26, %v355_v27 }
  0x88   :  { %v291_v25 = vld [vmem:[%s12950_s1 + $0x7e8] sm:$0xff] }
  0x89   :  { %2923 = vmatmul.mubr.bf16.vlgmr.msra.gmra.mxu0 %v9888_v28  ;;  %v343_v36 = vld [vmem:[%s12950_s1 + $0x988] sm:$0xff]  ;;  %v8400_v38 = vcombine.low %v287_v22, %v291_v25 }
  0x8a   :  { %3020 = vmatpush1.bf16.msra.mxu0 %v8336_v32  ;;  %3051 = vmatprep.mubr.bf16.mxu0 %v9549_v59  ;;  %v139_v59 = vld [vmem:[%s12950_s1 + $0x328] sm:$0xff]  ;;  %v8401_v32 = vcombine.high %v287_v22, %v291_v25 }
  0x8b   :  { %2993 = vmatpush2.bf16.msra.mxu1 %v8272_v33  ;;  %3021 = vmatprep.subr.bf16.mxu0 %v8329_v34  ;;  %v8249_v49 = vcombine.high %v135_v45, %v139_v59  ;;  %v8248_v55 = vcombine.low %v135_v45, %v139_v59  ;;  %v8465_v33 = vcombine.high %v351_v26, %v355_v27  ;;  %v279_v34 = vld [vmem:[%s12950_s1 + $0x788] sm:$0xff] }
  0x8c   :  { %2994 = vmatprep.subr.bf16.mxu1 %v8265_v35  ;;  %v283_v35 = vld [vmem:[%s12950_s1 + $0x7a8] sm:$0xff] }
  0x8d   :  { %v347_v37 = vld [vmem:[%s12950_s1 + $0x9a8] sm:$0xff]  ;;  %v8392_v45 = vcombine.low %v279_v34, %v283_v35 }
  0x8e   :  { %3022 = vmatpush1.bf16.msra.mxu0 %v8328_v40  ;;  %v8393_v40 = vcombine.high %v279_v34, %v283_v35  ;;  %v335_v44 = vld [vmem:[%s12950_s1 + $0x948] sm:$0xff]  ;;  %v8456_v59 = vcombine.low %v343_v36, %v347_v37 }
  0x8f   :  { %2995 = vmatpush2.bf16.msra.mxu1 %v8264_v41  ;;  %3023 = vmatprep.subr.bf16.mxu0 %v8321_v42  ;;  %v8457_v41 = vcombine.high %v343_v36, %v347_v37  ;;  %v271_v42 = vld [vmem:[%s12950_s1 + $0x748] sm:$0xff] }
  0x90   :  { %2996 = vmatprep.subr.bf16.mxu1 %v8257_v43  ;;  %v275_v43 = vld [vmem:[%s12950_s1 + $0x768] sm:$0xff] }
  0x91   :  { %v339_v56 = vld [vmem:[%s12950_s1 + $0x968] sm:$0xff]  ;;  %v8384_v51 = vcombine.low %v271_v42, %v275_v43 }
  0x92   :  { %3024 = vmatpush1.bf16.msra.mxu0 %v8320_v46  ;;  %v8385_v46 = vcombine.high %v271_v42, %v275_v43  ;;  %v331_v50 = vld [vmem:[%s12950_s1 + $0x928] sm:$0xff]  ;;  %v8448_v52 = vcombine.low %v335_v44, %v339_v56 }
  0x93   :  { %2997 = vmatpush2.bf16.msra.mxu1 %v8256_v47  ;;  %3025 = vmatprep.subr.bf16.mxu0 %v8313_v48  ;;  %v8449_v47 = vcombine.high %v335_v44, %v339_v56  ;;  %v263_v48 = vld [vmem:[%s12950_s1 + $0x708] sm:$0xff] }
  0x94   :  { %2998 = vmatprep.subr.bf16.mxu1 %v8249_v49  ;;  %v267_v49 = vld [vmem:[%s12950_s1 + $0x728] sm:$0xff] }
  0x95   :  { %v8377_v53 = vcombine.high %v263_v48, %v267_v49  ;;  %v8376_v60 = vcombine.low %v263_v48, %v267_v49 }
  0x96   :  { %3026 = vmatpush1.bf16.msra.mxu0 %v8312_v54 }
  0x97   :  { %2999 = vmatpush2.bf16.msra.mxu1 %v8248_v55  ;;  %3027 = vmatprep.subr.bf16.mxu0 %v8305_v57  ;;  %v259_v55 = vld [vmem:[%s12950_s1 + $0x6e8] sm:$0xff] }
  0x98   :  { %3000 = vmatprep.subr.bf16.mxu1 %v8241_v58  ;;  %v319_v57 = vld [vmem:[%s12950_s1 + $0x8c8] sm:$0xff] }
  0x99   :  { %v323_v58 = vld [vmem:[%s12950_s1 + $0x8e8] sm:$0xff] }
  0x9a   :  { %3028 = vmatpush1.bf16.msra.mxu0 %v8304_v0  ;;  %v8433_v63 = vcombine.high %v319_v57, %v323_v58  ;;  %v247_v0 = vld [vmem:[%s12950_s1 + $0x688] sm:$0xff]  ;;  %v8432_v5 = vcombine.low %v319_v57, %v323_v58 }
  0x9b   :  { %3001 = vmatpush2.bf16.msra.mxu1 %v8240_v1  ;;  %3029 = vmatprep.subr.bf16.mxu0 %v8297_v2  ;;  %v251_v1 = vld [vmem:[%s12950_s1 + $0x6a8] sm:$0xff] }
  0x9c   :  { %3002 = vmatprep.subr.bf16.mxu1 %v8233_v3  ;;  %v311_v2 = vld [vmem:[%s12950_s1 + $0x888] sm:$0xff]  ;;  %v8361_v6 = vcombine.high %v247_v0, %v251_v1  ;;  %v8360_v13 = vcombine.low %v247_v0, %v251_v1 }
  0x9d   :  { %v315_v3 = vld [vmem:[%s12950_s1 + $0x8a8] sm:$0xff] }
  0x9e   :  { %3030 = vmatpush1.bf16.msra.mxu0 %v8296_v8  ;;  %v8425_v7 = vcombine.high %v311_v2, %v315_v3  ;;  %v239_v8 = vld [vmem:[%s12950_s1 + $0x648] sm:$0xff]  ;;  %v8424_v14 = vcombine.low %v311_v2, %v315_v3 }
  0x9f   :  { %3003 = vmatpush2.bf16.msra.mxu1 %v8232_v9  ;;  %3031 = vmatprep.subr.bf16.mxu0 %v8289_v10  ;;  %v243_v9 = vld [vmem:[%s12950_s1 + $0x668] sm:$0xff] }
  0xa0   :  { %3004 = vmatprep.subr.bf16.mxu1 %v8225_v11  ;;  %v303_v10 = vld [vmem:[%s12950_s1 + $0x848] sm:$0xff]  ;;  %v8353_v16 = vcombine.high %v239_v8, %v243_v9  ;;  %v8352_v22 = vcombine.low %v239_v8, %v243_v9 }
  0xa1   :  { %v307_v11 = vld [vmem:[%s12950_s1 + $0x868] sm:$0xff] }
  0xa2   :  { %3032 = vmatpush1.bf16.msra.mxu0 %v8288_v18  ;;  %v8417_v17 = vcombine.high %v303_v10, %v307_v11  ;;  %v231_v18 = vld [vmem:[%s12950_s1 + $0x608] sm:$0xff]  ;;  %v8416_v25 = vcombine.low %v303_v10, %v307_v11 }
  0xa3   :  { %3005 = vmatpush2.bf16.msra.mxu1 %v8224_v19  ;;  %3033 = vmatprep.subr.bf16.mxu0 %v8281_v20  ;;  %v235_v19 = vld [vmem:[%s12950_s1 + $0x628] sm:$0xff] }
  0xa4   :  { %3006 = vmatprep.subr.bf16.mxu1 %v8217_v21  ;;  %v295_v20 = vld [vmem:[%s12950_s1 + $0x808] sm:$0xff]  ;;  %v8345_v26 = vcombine.high %v231_v18, %v235_v19  ;;  %v8344_v34 = vcombine.low %v231_v18, %v235_v19 }
  0xa5   :  { %v299_v21 = vld [vmem:[%s12950_s1 + $0x828] sm:$0xff] }
  0xa6   :  { %3034 = vmatpush1.bf16.msra.mxu0 %v8280_v29  ;;  %v8409_v27 = vcombine.high %v295_v20, %v299_v21  ;;  %v479_v29 = vld [vmem:[%s12950_s1 + $0xdc8] sm:$0xff]  ;;  %v8408_v35 = vcombine.low %v295_v20, %v299_v21 }
  0xa7   :  { %3007 = vmatpush2.bf16.msra.mxu1 %v8216_v30  ;;  %3035 = vmatprep.subr.bf16.mxu0 %v8401_v32  ;;  %v483_v30 = vld [vmem:[%s12950_s1 + $0xde8] sm:$0xff] }
  0xa8   :  { %3062 = vmatprep.subr.bf16.mxu1 %v8465_v33  ;;  %v415_v32 = vld [vmem:[%s12950_s1 + $0xbc8] sm:$0xff]  ;;  %v8593_v36 = vcombine.high %v479_v29, %v483_v30  ;;  %v8592_v42 = vcombine.low %v479_v29, %v483_v30 }
  0xa9   :  { %v419_v33 = vld [vmem:[%s12950_s1 + $0xbe8] sm:$0xff] }
  0xaa   :  { %3009 = vmatmul.mubr.bf16.vlgmr.msra.gmra.mxu1 %v9670_v12  ;;  %3036 = vmatpush2.bf16.msra.mxu0 %v8400_v38  ;;  %v327_v12 = vld [vmem:[%s12950_s1 + $0x908] sm:$0xff]  ;;  %v8529_v37 = vcombine.high %v415_v32, %v419_v33  ;;  %v8528_v43 = vcombine.low %v415_v32, %v419_v33  ;;  %v96_v33 = vld [vmem:[%s12950_s1 + $0x1d0] sm:$0xff] }
  0xab   :  { %3063 = vmatpush1.bf16.msra.mxu1 %v8464_v39  ;;  %3037 = vmatprep.subr.bf16.mxu0 %v8393_v40  ;;  %v8441_v54 = vcombine.high %v327_v12, %v331_v50  ;;  %v8440_v61 = vcombine.low %v327_v12, %v331_v50  ;;  %v471_v38 = vld [vmem:[%s12950_s1 + $0xd88] sm:$0xff] }
  0xac   :  { %3064 = vmatprep.subr.bf16.mxu1 %v8457_v41  ;;  %3094 = vmatprep.mubr.bf16.mxu1 %v9699_v24  ;;  %v255_v24 = vld [vmem:[%s12950_s1 + $0x6c8] sm:$0xff] }
  0xad   :  { %v8369_v62 = vcombine.high %v255_v24, %v259_v55  ;;  %v8368_v4 = vcombine.low %v255_v24, %v259_v55  ;;  %v475_v39 = vld [vmem:[%s12950_s1 + $0xda8] sm:$0xff] }
  0xae   :  { %3038 = vmatpush2.bf16.msra.mxu0 %v8392_v45  ;;  %v407_v40 = vld [vmem:[%s12950_s1 + $0xb88] sm:$0xff]  ;;  %v8585_v44 = vcombine.high %v471_v38, %v475_v39  ;;  %v8584_v48 = vcombine.low %v471_v38, %v475_v39 }
  0xaf   :  { %3065 = vmatpush1.bf16.msra.mxu1 %v8456_v59  ;;  %3039 = vmatprep.subr.bf16.mxu0 %v8385_v46  ;;  %v411_v41 = vld [vmem:[%s12950_s1 + $0xba8] sm:$0xff] }
  0xb0   :  { %3066 = vmatprep.subr.bf16.mxu1 %v8449_v47  ;;  %v8521_v56 = vcombine.high %v407_v40, %v411_v41  ;;  %v463_v45 = vld [vmem:[%s12950_s1 + $0xd48] sm:$0xff]  ;;  %v8520_v49 = vcombine.low %v407_v40, %v411_v41  ;;  %v88_v41 = vld [vmem:[%s12950_s1 + $0x190] sm:$0xff] }
  0xb1   :  { %v467_v59 = vld [vmem:[%s12950_s1 + $0xd68] sm:$0xff] }
  0xb2   :  { %3040 = vmatpush2.bf16.msra.mxu0 %v8384_v51  ;;  %v399_v46 = vld [vmem:[%s12950_s1 + $0xb48] sm:$0xff]  ;;  %v8577_v12 = vcombine.high %v463_v45, %v467_v59 }
  0xb3   :  { %3067 = vmatpush1.bf16.msra.mxu1 %v8448_v52  ;;  %3041 = vmatprep.subr.bf16.mxu0 %v8377_v53  ;;  %v403_v47 = vld [vmem:[%s12950_s1 + $0xb68] sm:$0xff] }
  0xb4   :  { %3068 = vmatprep.subr.bf16.mxu1 %v8441_v54  ;;  %v8513_v50 = vcombine.high %v399_v46, %v403_v47  ;;  %v459_v51 = vld [vmem:[%s12950_s1 + $0xd28] sm:$0xff]  ;;  %v8576_v54 = vcombine.low %v463_v45, %v467_v59  ;;  %v8512_v24 = vcombine.low %v399_v46, %v403_v47  ;;  %v80_v47 = vld [vmem:[%s12950_s1 + $0x150] sm:$0xff] }
  0xb5   :  { %v391_v52 = vld [vmem:[%s12950_s1 + $0xb08] sm:$0xff] }
  0xb6   :  { %3042 = vmatpush2.bf16.msra.mxu0 %v8376_v60  ;;  %v395_v53 = vld [vmem:[%s12950_s1 + $0xb28] sm:$0xff] }
  0xb7   :  { %3069 = vmatpush1.bf16.msra.mxu1 %v8440_v61  ;;  %3043 = vmatprep.subr.bf16.mxu0 %v8369_v62  ;;  %v8505_v57 = vcombine.high %v391_v52, %v395_v53  ;;  %v447_v58 = vld [vmem:[%s12950_s1 + $0xcc8] sm:$0xff]  ;;  %v8504_v0 = vcombine.low %v391_v52, %v395_v53  ;;  %v76_v53 = vld [vmem:[%s12950_s1 + $0x130] sm:$0xff] }
  0xb8   :  { %3070 = vmatprep.subr.bf16.mxu1 %v8433_v63  ;;  %v451_v60 = vld [vmem:[%s12950_s1 + $0xce8] sm:$0xff] }
  0xb9   :  { %v383_v61 = vld [vmem:[%s12950_s1 + $0xac8] sm:$0xff]  ;;  %v8561_v1 = vcombine.high %v447_v58, %v451_v60 }
  0xba   :  { %3044 = vmatpush2.bf16.msra.mxu0 %v8368_v4  ;;  %v387_v62 = vld [vmem:[%s12950_s1 + $0xae8] sm:$0xff] }
  0xbb   :  { %3071 = vmatpush1.bf16.msra.mxu1 %v8432_v5  ;;  %3045 = vmatprep.subr.bf16.mxu0 %v8361_v6  ;;  %v8497_v2 = vcombine.high %v383_v61, %v387_v62  ;;  %v439_v3 = vld [vmem:[%s12950_s1 + $0xc88] sm:$0xff]  ;;  %v8496_v8 = vcombine.low %v383_v61, %v387_v62  ;;  %v64_v62 = vld [vmem:[%s12950_s1 + $0xd0] sm:$0xff] }
  0xbc   :  { %3072 = vmatprep.subr.bf16.mxu1 %v8425_v7  ;;  %v443_v4 = vld [vmem:[%s12950_s1 + $0xca8] sm:$0xff]  ;;  %v8560_v7 = vcombine.low %v447_v58, %v451_v60 }
  0xbd   :  { %v375_v5 = vld [vmem:[%s12950_s1 + $0xa88] sm:$0xff]  ;;  %v8553_v9 = vcombine.high %v439_v3, %v443_v4 }
  0xbe   :  { %3046 = vmatpush2.bf16.msra.mxu0 %v8360_v13  ;;  %v379_v6 = vld [vmem:[%s12950_s1 + $0xaa8] sm:$0xff] }
  0xbf   :  { %3073 = vmatpush1.bf16.msra.mxu1 %v8424_v14  ;;  %3047 = vmatprep.subr.bf16.mxu0 %v8353_v16  ;;  %v8489_v10 = vcombine.high %v375_v5, %v379_v6  ;;  %v431_v11 = vld [vmem:[%s12950_s1 + $0xc48] sm:$0xff]  ;;  %v8488_v18 = vcombine.low %v375_v5, %v379_v6  ;;  %v56_v6 = vld [vmem:[%s12950_s1 + $0x90] sm:$0xff] }
  0xc0   :  { %3074 = vmatprep.subr.bf16.mxu1 %v8417_v17  ;;  %v435_v13 = vld [vmem:[%s12950_s1 + $0xc68] sm:$0xff]  ;;  %v8552_v17 = vcombine.low %v439_v3, %v443_v4 }
  0xc1   :  { %v367_v14 = vld [vmem:[%s12950_s1 + $0xa48] sm:$0xff]  ;;  %v8545_v19 = vcombine.high %v431_v11, %v435_v13 }
  0xc2   :  { %3048 = vmatpush2.bf16.msra.mxu0 %v8352_v22  ;;  %v371_v16 = vld [vmem:[%s12950_s1 + $0xa68] sm:$0xff] }
  0xc3   :  { %3075 = vmatpush1.bf16.msra.mxu1 %v8416_v25  ;;  %3049 = vmatprep.subr.bf16.mxu0 %v8345_v26  ;;  %v8481_v20 = vcombine.high %v367_v14, %v371_v16  ;;  %v423_v21 = vld [vmem:[%s12950_s1 + $0xc08] sm:$0xff]  ;;  %v8480_v29 = vcombine.low %v367_v14, %v371_v16  ;;  %v48_v16 = vld [vmem:[%s12950_s1 + $0x50] sm:$0xff] }
  0xc4   :  { %3076 = vmatprep.subr.bf16.mxu1 %v8409_v27  ;;  %v427_v22 = vld [vmem:[%s12950_s1 + $0xc28] sm:$0xff]  ;;  %v8544_v27 = vcombine.low %v431_v11, %v435_v13 }
  0xc5   :  { %v359_v25 = vld [vmem:[%s12950_s1 + $0xa08] sm:$0xff]  ;;  %v8537_v30 = vcombine.high %v423_v21, %v427_v22 }
  0xc6   :  { %3050 = vmatpush2.bf16.msra.mxu0 %v8344_v34  ;;  %v363_v26 = vld [vmem:[%s12950_s1 + $0xa28] sm:$0xff]  ;;  %v100_v34 = vld [vmem:[%s12950_s1 + $0x1f0] sm:$0xff] }
  0xc7   :  { %3077 = vmatpush1.bf16.msra.mxu1 %v8408_v35  ;;  %3105 = vmatprep.subr.bf16.mxu0 %v8593_v36  ;;  %v8473_v32 = vcombine.high %v359_v25, %v363_v26  ;;  %v224_v35 = vld [vmem:[%s12950_s1 + $0x5d0] sm:$0xff]  ;;  %v8472_v38 = vcombine.low %v359_v25, %v363_v26  ;;  %v8211_v39 = vcombine.high %v96_v33, %v100_v34 }
  0xc8   :  { %3078 = vmatprep.subr.bf16.mxu1 %v8529_v37  ;;  %v228_v36 = vld [vmem:[%s12950_s1 + $0x5f0] sm:$0xff]  ;;  %v8536_v37 = vcombine.low %v423_v21, %v427_v22  ;;  %v488_v21 = vlaneseq }
  0xc9   :  { %3052 = vmatmul.mubr.bf16.vlgmr.msra.gmra.mxu0 %v9681_v15  ;;  %v455_v15 = vld [vmem:[%s12950_s1 + $0xd08] sm:$0xff]  ;;  %v8339_v40 = vcombine.high %v224_v35, %v228_v36  ;;  %v8338_v45 = vcombine.low %v224_v35, %v228_v36 }
  0xca   :  { %3106 = vmatpush1.bf16.msra.mxu0 %v8592_v42  ;;  %3137 = vmatprep.mubr.bf16.mxu0 %v9398_v31  ;;  %v8569_v55 = vcombine.high %v455_v15, %v459_v51  ;;  %v8568_v63 = vcombine.low %v455_v15, %v459_v51  ;;  %v92_v42 = vld [vmem:[%s12950_s1 + $0x1b0] sm:$0xff] }
  0xcb   :  { %3079 = vmatpush2.bf16.msra.mxu1 %v8528_v43  ;;  %3107 = vmatprep.subr.bf16.mxu0 %v8585_v44  ;;  %v216_v43 = vld [vmem:[%s12950_s1 + $0x590] sm:$0xff]  ;;  %v8203_v59 = vcombine.high %v88_v41, %v92_v42 }
  0xcc   :  { %3080 = vmatprep.subr.bf16.mxu1 %v8521_v56  ;;  %v220_v44 = vld [vmem:[%s12950_s1 + $0x5b0] sm:$0xff]  ;;  %v8210_v56 = vcombine.low %v96_v33, %v100_v34  ;;  %v10276_v34 = vshrl.u32 %v488_v21, 7 }
  0xcd   :  { %v8331_v46 = vcombine.high %v216_v43, %v220_v44  ;;  %v8330_v15 = vcombine.low %v216_v43, %v220_v44  ;;  %v260_v21 = vld [vmem:[%s12950_s1 + $0x6f0] sm:$0xff] }
  0xce   :  { %3108 = vmatpush1.bf16.msra.mxu0 %v8584_v48  ;;  %v84_v48 = vld [vmem:[%s12950_s1 + $0x170] sm:$0xff]  ;;  %v490_v43 = vsub.s32 0, %v10276_v34 }
  0xcf   :  { %3081 = vmatpush2.bf16.msra.mxu1 %v8520_v49  ;;  %3109 = vmatprep.subr.bf16.mxu0 %v8577_v12  ;;  %v208_v49 = vld [vmem:[%s12950_s1 + $0x550] sm:$0xff]  ;;  %v8195_v51 = vcombine.high %v80_v47, %v84_v48 }
  0xd0   :  { %3082 = vmatprep.subr.bf16.mxu1 %v8513_v50  ;;  %v212_v12 = vld [vmem:[%s12950_s1 + $0x570] sm:$0xff]  ;;  %v8202_v50 = vcombine.low %v88_v41, %v92_v42 }
  0xd1   :  { %v8323_v52 = vcombine.high %v208_v49, %v212_v12  ;;  %v8322_v58 = vcombine.low %v208_v49, %v212_v12  ;;  %v292_v41 = vld [vmem:[%s12950_s1 + $0x7f0] sm:$0xff] }
  0xd2   :  { %3110 = vmatpush1.bf16.msra.mxu0 %v8576_v54  ;;  %v200_v54 = vld [vmem:[%s12950_s1 + $0x510] sm:$0xff] }
  0xd3   :  { %3083 = vmatpush2.bf16.msra.mxu1 %v8512_v24  ;;  %3111 = vmatprep.subr.bf16.mxu0 %v8569_v55  ;;  %v204_v24 = vld [vmem:[%s12950_s1 + $0x530] sm:$0xff]  ;;  %v10225_v55 = vld [vmem:[%s12951_s0 + $0xc] ss:$28 sps:$4 sm:$0xff]  }
  0xd4   :  { %3084 = vmatprep.subr.bf16.mxu1 %v8505_v57  ;;  %v8194_v57 = vcombine.low %v80_v47, %v84_v48  ;;  %v8315_v61 = vcombine.high %v200_v54, %v204_v24  ;;  %v8314_v3 = vcombine.low %v200_v54, %v204_v24  ;;  %v156_v47 = vld [vmem:[%s12950_s1 + $0x3b0] sm:$0xff] }
  0xd5   :  { %v280_v48 = vld [vmem:[%s12950_s1 + $0x790] sm:$0xff] }
  0xd6   :  { %3112 = vmatpush1.bf16.msra.mxu0 %v8568_v63  ;;  %v68_v63 = vld [vmem:[%s12950_s1 + $0xf0] sm:$0xff] }
  0xd7   :  { %3085 = vmatpush2.bf16.msra.mxu1 %v8504_v0  ;;  %3113 = vmatprep.subr.bf16.mxu0 %v8561_v1  ;;  %v192_v0 = vld [vmem:[%s12950_s1 + $0x4d0] sm:$0xff]  ;;  %v8179_v4 = vcombine.high %v64_v62, %v68_v63 }
  0xd8   :  { %3086 = vmatprep.subr.bf16.mxu1 %v8497_v2  ;;  %v196_v1 = vld [vmem:[%s12950_s1 + $0x4f0] sm:$0xff] }
  0xd9   :  { %v8307_v5 = vcombine.high %v192_v0, %v196_v1  ;;  %v8306_v11 = vcombine.low %v192_v0, %v196_v1  ;;  %v284_v49 = vld [vmem:[%s12950_s1 + $0x7b0] sm:$0xff] }
  0xda   :  { %3114 = vmatpush1.bf16.msra.mxu0 %v8560_v7  ;;  %v60_v7 = vld [vmem:[%s12950_s1 + $0xb0] sm:$0xff] }
  0xdb   :  { %3087 = vmatpush2.bf16.msra.mxu1 %v8496_v8  ;;  %3115 = vmatprep.subr.bf16.mxu0 %v8553_v9  ;;  %v184_v8 = vld [vmem:[%s12950_s1 + $0x490] sm:$0xff]  ;;  %v8171_v13 = vcombine.high %v56_v6, %v60_v7 }
  0xdc   :  { %3088 = vmatprep.subr.bf16.mxu1 %v8489_v10  ;;  %v188_v9 = vld [vmem:[%s12950_s1 + $0x4b0] sm:$0xff]  ;;  %v8178_v10 = vcombine.low %v64_v62, %v68_v63  ;;  %v8394_v63 = vcombine.low %v280_v48, %v284_v49 }
  0xdd   :  { %v8299_v14 = vcombine.high %v184_v8, %v188_v9  ;;  %v8298_v22 = vcombine.low %v184_v8, %v188_v9  ;;  %v272_v24 = vld [vmem:[%s12950_s1 + $0x750] sm:$0xff] }
  0xde   :  { %3116 = vmatpush1.bf16.msra.mxu0 %v8552_v17  ;;  %v52_v17 = vld [vmem:[%s12950_s1 + $0x70] sm:$0xff] }
  0xdf   :  { %3089 = vmatpush2.bf16.msra.mxu1 %v8488_v18  ;;  %3117 = vmatprep.subr.bf16.mxu0 %v8545_v19  ;;  %v176_v18 = vld [vmem:[%s12950_s1 + $0x450] sm:$0xff]  ;;  %v8163_v25 = vcombine.high %v48_v16, %v52_v17  ;;  %v8162_v33 = vcombine.low %v48_v16, %v52_v17 }
  0xe0   :  { %3090 = vmatprep.subr.bf16.mxu1 %v8481_v20  ;;  %v180_v19 = vld [vmem:[%s12950_s1 + $0x470] sm:$0xff]  ;;  %v8170_v20 = vcombine.low %v56_v6, %v60_v7 }
  0xe1   :  { %v8291_v26 = vcombine.high %v176_v18, %v180_v19  ;;  %v8290_v35 = vcombine.low %v176_v18, %v180_v19  ;;  %v264_v7 = vld [vmem:[%s12950_s1 + $0x710] sm:$0xff] }
  0xe2   :  { %3118 = vmatpush1.bf16.msra.mxu0 %v8544_v27  ;;  %v40_v27 = vld [vmem:[%s12950_s1 + $0x10] sm:$0xff] }
  0xe3   :  { %3091 = vmatpush2.bf16.msra.mxu1 %v8480_v29  ;;  %3119 = vmatprep.subr.bf16.mxu0 %v8537_v30  ;;  %v44_v29 = vld [vmem:[%s12950_s1 + $0x30] sm:$0xff] }
  0xe4   :  { %3092 = vmatprep.subr.bf16.mxu1 %v8473_v32  ;;  %v168_v30 = vld [vmem:[%s12950_s1 + $0x410] sm:$0xff]  ;;  %v8155_v36 = vcombine.high %v40_v27, %v44_v29  ;;  %v8154_v42 = vcombine.low %v40_v27, %v44_v29 }
  0xe5   :  { %v172_v32 = vld [vmem:[%s12950_s1 + $0x430] sm:$0xff] }
  0xe6   :  { %3120 = vmatpush1.bf16.msra.mxu0 %v8536_v37  ;;  %v8283_v37 = vcombine.high %v168_v30, %v172_v32  ;;  %v8282_v44 = vcombine.low %v168_v30, %v172_v32  ;;  %v268_v8 = vld [vmem:[%s12950_s1 + $0x730] sm:$0xff] }
  0xe7   :  { %3093 = vmatpush2.bf16.msra.mxu1 %v8472_v38  ;;  %3148 = vmatprep.subr.bf16.mxu0 %v8211_v39  ;;  %v160_v38 = vld [vmem:[%s12950_s1 + $0x3d0] sm:$0xff]  ;;  %v8379_v17 = vcombine.high %v264_v7, %v268_v8 }
  0xe8   :  { %3191 = vmatprep.subr.bf16.mxu1 %v8339_v40  ;;  %v164_v39 = vld [vmem:[%s12950_s1 + $0x3f0] sm:$0xff] }
  0xe9   :  { %3138 = vmatmul.mubr.bf16.vlgmr.msra.gmra.mxu0 %v9791_v23  ;;  %v72_v23 = vld [vmem:[%s12950_s1 + $0x110] sm:$0xff] }
  0xea   :  { %3095 = vmatmul.mubr.bf16.vlgmr.msra.gmra.mxu1 %v9888_v28  ;;  %3149 = vmatpush1.bf16.msra.mxu0 %v8210_v56  ;;  %v10213_v28 = vld [vmem:[%s12951_s0 + $0x4] ss:$28 sps:$4 sm:$0xff]   ;;  %v8187_v60 = vcombine.high %v72_v23, %v76_v53  ;;  %v8186_v2 = vcombine.low %v72_v23, %v76_v53  ;;  %v288_v40 = vld [vmem:[%s12950_s1 + $0x7d0] sm:$0xff] }
  0xeb   :  { %3192 = vmatpush1.bf16.msra.mxu1 %v8338_v45  ;;  %3150 = vmatprep.subr.bf16.mxu0 %v8203_v59  ;;  %v10294_v56 = vld [vmem:[%s12952_s2] sm:$0xff]  ;;  %v8275_v45 = vcombine.high %v160_v38, %v164_v39  ;;  %v8403_v59 = vcombine.high %v288_v40, %v292_v41  ;;  %v144_v23 = vld [vmem:[%s12950_s1 + $0x350] sm:$0xff] }
  0xec   :  { %3193 = vmatprep.subr.bf16.mxu1 %v8331_v46  ;;  %3180 = vmatprep.mubr.bf16.mxu0 %v10213_v28  ;;  %v152_v46 = vld [vmem:[%s12950_s1 + $0x390] sm:$0xff]  ;;  %v491_v12 = vrot.slane %v10294_v56, %v490_v43 }
  0xed   :  { %3223 = vmatprep.mubr.bf16.mxu1 %v10225_v55  ;;  %v148_v53 = vld [vmem:[%s12950_s1 + $0x370] sm:$0xff] }
  0xee   :  { %3151 = vmatpush1.bf16.msra.mxu0 %v8202_v50  ;;  %v8274_v50 = vcombine.low %v160_v38, %v164_v39  ;;  %v8259_v0 = vcombine.high %v144_v23, %v148_v53  ;;  %v128_v18 = vld [vmem:[%s12950_s1 + $0x2d0] sm:$0xff] }
  0xef   :  { %3194 = vmatpush1.bf16.msra.mxu1 %v8330_v15  ;;  %3152 = vmatprep.subr.bf16.mxu0 %v8195_v51  ;;  %v8402_v15 = vcombine.low %v288_v40, %v292_v41  ;;  %v8267_v51 = vcombine.high %v152_v46, %v156_v47  ;;  %v132_v19 = vld [vmem:[%s12950_s1 + $0x2f0] sm:$0xff] }
  0xf0   :  { %3195 = vmatprep.subr.bf16.mxu1 %v8323_v52  ;;  %v8395_v52 = vcombine.high %v280_v48, %v284_v49  ;;  %v120_v29 = vld [vmem:[%s12950_s1 + $0x290] sm:$0xff] }
  0xf1   :  { %v124_v30 = vld [vmem:[%s12950_s1 + $0x2b0] sm:$0xff] }
  0xf2   :  { %3153 = vmatpush1.bf16.msra.mxu0 %v8194_v57  ;;  %v276_v57 = vld [vmem:[%s12950_s1 + $0x770] sm:$0xff] }
  0xf3   :  { %3196 = vmatpush1.bf16.msra.mxu1 %v8322_v58  ;;  %3154 = vmatprep.subr.bf16.mxu0 %v8187_v60  ;;  %v248_v32 = vld [vmem:[%s12950_s1 + $0x690] sm:$0xff] }
  0xf4   :  { %3197 = vmatprep.subr.bf16.mxu1 %v8315_v61  ;;  %v8266_v61 = vcombine.low %v152_v46, %v156_v47  ;;  %v112_v39 = vld [vmem:[%s12950_s1 + $0x250] sm:$0xff] }
  0xf5   :  { %v116_v40 = vld [vmem:[%s12950_s1 + $0x270] sm:$0xff] }
  0xf6   :  { %3155 = vmatpush1.bf16.msra.mxu0 %v8186_v2  ;;  %v240_v41 = vld [vmem:[%s12950_s1 + $0x650] sm:$0xff] }
  0xf7   :  { %3198 = vmatpush1.bf16.msra.mxu1 %v8314_v3  ;;  %3156 = vmatprep.subr.bf16.mxu0 %v8179_v4  ;;  %v8387_v3 = vcombine.high %v272_v24, %v276_v57  ;;  %v136_v4 = vld [vmem:[%s12950_s1 + $0x310] sm:$0xff] }
  0xf8   :  { %3199 = vmatprep.subr.bf16.mxu1 %v8307_v5  ;;  %v140_v5 = vld [vmem:[%s12950_s1 + $0x330] sm:$0xff] }
  0xf9   :  { %v104_v47 = vld [vmem:[%s12950_s1 + $0x210] sm:$0xff] }
  0xfa   :  { %3157 = vmatpush1.bf16.msra.mxu0 %v8178_v10  ;;  %v8258_v10 = vcombine.low %v144_v23, %v148_v53  ;;  %v108_v48 = vld [vmem:[%s12950_s1 + $0x230] sm:$0xff] }
  0xfb   :  { %3200 = vmatpush1.bf16.msra.mxu1 %v8306_v11  ;;  %3158 = vmatprep.subr.bf16.mxu0 %v8171_v13  ;;  %v8386_v13 = vcombine.low %v272_v24, %v276_v57  ;;  %v232_v49 = vld [vmem:[%s12950_s1 + $0x610] sm:$0xff]  ;;  %v8218_v57 = vcombine.low %v104_v47, %v108_v48 }
  0xfc   :  { %3201 = vmatprep.subr.bf16.mxu1 %v8299_v14  ;;  %v8251_v14 = vcombine.high %v136_v4, %v140_v5  ;;  %v352_v23 = vld [vmem:[%s12950_s1 + $0x9d0] sm:$0xff] }
  0xfd   :  { %v356_v53 = vld [vmem:[%s12950_s1 + $0x9f0] sm:$0xff] }
  0xfe   :  { %3159 = vmatpush1.bf16.msra.mxu0 %v8170_v20  ;;  %v256_v20 = vld [vmem:[%s12950_s1 + $0x6d0] sm:$0xff] }
  0xff   :  { %3202 = vmatpush1.bf16.msra.mxu1 %v8298_v22  ;;  %3160 = vmatprep.subr.bf16.mxu0 %v8163_v25  ;;  %v8250_v22 = vcombine.low %v136_v4, %v140_v5  ;;  %v8378_v25 = vcombine.low %v264_v7, %v268_v8  ;;  %v8371_v27 = vcombine.high %v256_v20, %v260_v21  ;;  %v484_v24 = vld [vmem:[%s12950_s1 + $0xdf0] sm:$0xff] }
 0x100   :  { %3203 = vmatprep.subr.bf16.mxu1 %v8291_v26  ;;  %v8243_v26 = vcombine.high %v128_v18, %v132_v19  ;;  %v476_v4 = vld [vmem:[%s12950_s1 + $0xdb0] sm:$0xff]  ;;  %v8466_v5 = vcombine.low %v352_v23, %v356_v53 }
 0x102   :  { %3161 = vmatpush1.bf16.msra.mxu0 %v8162_v33  ;;  %v252_v33 = vld [vmem:[%s12950_s1 + $0x6b0] sm:$0xff] }
 0x103   :  { %3204 = vmatpush1.bf16.msra.mxu1 %v8290_v35  ;;  %3162 = vmatprep.subr.bf16.mxu0 %v8155_v36  ;;  %v8242_v35 = vcombine.low %v128_v18, %v132_v19  ;;  %v8370_v36 = vcombine.low %v256_v20, %v260_v21  ;;  %v8363_v38 = vcombine.high %v248_v32, %v252_v33 }
 0x104   :  { %3205 = vmatprep.subr.bf16.mxu1 %v8283_v37  ;;  %v8235_v37 = vcombine.high %v120_v29, %v124_v30 }
 0x106   :  { %3163 = vmatpush1.bf16.msra.mxu0 %v8154_v42  ;;  %v244_v42 = vld [vmem:[%s12950_s1 + $0x670] sm:$0xff] }
 0x107   :  { %3206 = vmatpush1.bf16.msra.mxu1 %v8282_v44  ;;  %3164 = vmatprep.subr.bf16.mxu0 %v8275_v45  ;;  %v8234_v44 = vcombine.low %v120_v29, %v124_v30  ;;  %v8362_v45 = vcombine.low %v248_v32, %v252_v33  ;;  %v8355_v46 = vcombine.high %v240_v41, %v244_v42  ;;  %v10455_v29 = vld [vmem:[%s12951_s0 + $0x14] ss:$28 sps:$4 sm:$0xff]  }
 0x108   :  { %3207 = vmatprep.subr.bf16.mxu1 %v8403_v59  ;;  %v8227_v59 = vcombine.high %v112_v39, %v116_v40 }
 0x109   :  { %v2838_v54 = vpop.f32.mrf.mxu0  ;;  %v2881_v60 = vpop.f32.mrf.mxu1 }
 0x10a   :  { %v2839_v58 = vadd.f32 %v2838_v54, %v491_v12  ;;  %3165 = vmatpush2.bf16.msra.mxu0 %v8274_v50  ;;  %v8226_v50 = vcombine.low %v112_v39, %v116_v40  ;;  %v480_v54 = vld [vmem:[%s12950_s1 + $0xdd0] sm:$0xff] }
 0x10b   :  { %3208 = vmatpush2.bf16.msra.mxu1 %v8402_v15  ;;  %v10323_v62 = vpop.f32.mrf.mxu0  ;;  %3166 = vmatprep.subr.bf16.mxu0 %v8267_v51  ;;  %v10327_v2 = vpop.f32.mrf.mxu1  ;;  %v8354_v15 = vcombine.low %v240_v41, %v244_v42  ;;  %v8219_v51 = vcombine.high %v104_v47, %v108_v48  ;;  %v452_v39 = vld [vmem:[%s12950_s1 + $0xcf0] sm:$0xff] }
 0x10c   :  { %v10325_v1 = vadd.f32 %v2881_v60, %v2839_v58  ;;  %3209 = vmatprep.subr.bf16.mxu1 %v8395_v52  ;;  %v8467_v60 = vcombine.high %v352_v23, %v356_v53  ;;  %v444_v47 = vld [vmem:[%s12950_s1 + $0xcb0] sm:$0xff] }
 0x10d   :  { %v2842_v6 = vpop.f32.mrf.mxu0  ;;  %v2885_v11 = vpop.f32.mrf.mxu1  ;;  %v436_v23 = vld [vmem:[%s12950_s1 + $0xc70] sm:$0xff] }
 0x10e   :  { %v2843_v9 = vadd.f32 %v2842_v6, %v491_v12  ;;  %3167 = vmatpush2.bf16.msra.mxu0 %v8266_v61  ;;  %v236_v12 = vld [vmem:[%s12950_s1 + $0x630] sm:$0xff]  ;;  %v8595_v61 = vcombine.high %v480_v54, %v484_v24  ;;  %v8594_v6 = vcombine.low %v480_v54, %v484_v24 }
 0x10f   :  { %3210 = vmatpush2.bf16.msra.mxu1 %v8394_v63  ;;  %3168 = vmatprep.subr.bf16.mxu0 %v8259_v0  ;;  %v8347_v52 = vcombine.high %v232_v49, %v236_v12  ;;  %v8346_v58 = vcombine.low %v232_v49, %v236_v12  ;;  %v344_v63 = vld [vmem:[%s12950_s1 + $0x990] sm:$0xff] }
 0x110   :  { %v10341_v16 = vadd.f32 %v2885_v11, %v2843_v9  ;;  %3211 = vmatprep.subr.bf16.mxu1 %v8387_v3  ;;  %v348_v0 = vld [vmem:[%s12950_s1 + $0x9b0] sm:$0xff]  ;;  %v10424_v11 = vld [vmem:[%s12951_s0] ss:$28 sps:$4 sm:$0xff]  }
 0x111   :  { %v472_v3 = vld [vmem:[%s12950_s1 + $0xd90] sm:$0xff]  ;;  %v8459_v7 = vcombine.high %v344_v63, %v348_v0  ;;  %v8458_v18 = vcombine.low %v344_v63, %v348_v0 }
 0x112   :  { %3169 = vmatpush2.bf16.msra.mxu0 %v8258_v10  ;;  %v8587_v8 = vcombine.high %v472_v3, %v476_v4  ;;  %v336_v9 = vld [vmem:[%s12950_s1 + $0x950] sm:$0xff]  ;;  %v8586_v19 = vcombine.low %v472_v3, %v476_v4 }
 0x113   :  { %3212 = vmatpush2.bf16.msra.mxu1 %v8386_v13  ;;  %3170 = vmatprep.subr.bf16.mxu0 %v8251_v14  ;;  %v340_v10 = vld [vmem:[%s12950_s1 + $0x970] sm:$0xff] }
 0x114   :  { %3213 = vmatprep.subr.bf16.mxu1 %v8379_v17  ;;  %v464_v13 = vld [vmem:[%s12950_s1 + $0xd50] sm:$0xff]  ;;  %v10436_v17 = vld [vmem:[%s12951_s0 + $0x8] ss:$28 sps:$4 sm:$0xff]   ;;  %v8451_v20 = vcombine.high %v336_v9, %v340_v10  ;;  %v8450_v30 = vcombine.low %v336_v9, %v340_v10  ;;  %v101_v9 = vld [vmem:[%s12950_s1 + $0x1f8] sm:$0xff] }
 0x115   :  { %v468_v14 = vld [vmem:[%s12950_s1 + $0xd70] sm:$0xff] }
 0x116   :  { %3171 = vmatpush2.bf16.msra.mxu0 %v8250_v22  ;;  %v8579_v21 = vcombine.high %v464_v13, %v468_v14  ;;  %v328_v22 = vld [vmem:[%s12950_s1 + $0x910] sm:$0xff]  ;;  %v8578_v32 = vcombine.low %v464_v13, %v468_v14 }
 0x117   :  { %3214 = vmatpush2.bf16.msra.mxu1 %v8378_v25  ;;  %3172 = vmatprep.subr.bf16.mxu0 %v8243_v26  ;;  %v332_v25 = vld [vmem:[%s12950_s1 + $0x930] sm:$0xff] }
 0x118   :  { %3215 = vmatprep.subr.bf16.mxu1 %v8371_v27  ;;  %v456_v26 = vld [vmem:[%s12950_s1 + $0xd10] sm:$0xff]  ;;  %v8443_v33 = vcombine.high %v328_v22, %v332_v25  ;;  %v8442_v40 = vcombine.low %v328_v22, %v332_v25  ;;  %v89_v22 = vld [vmem:[%s12950_s1 + $0x198] sm:$0xff] }
 0x119   :  { %v460_v27 = vld [vmem:[%s12950_s1 + $0xd30] sm:$0xff]  ;;  %v93_v25 = vld [vmem:[%s12950_s1 + $0x1b8] sm:$0xff] }
 0x11a   :  { %3173 = vmatpush2.bf16.msra.mxu0 %v8242_v35  ;;  %v8571_v35 = vcombine.high %v456_v26, %v460_v27  ;;  %v8570_v41 = vcombine.low %v456_v26, %v460_v27  ;;  %v428_v63 = vld [vmem:[%s12950_s1 + $0xc30] sm:$0xff]  ;;  %v10532_v27 = vpop.f32.mrf.mxu0 }
 0x11b   :  { %3216 = vmatpush2.bf16.msra.mxu1 %v8370_v36  ;;  %3174 = vmatprep.subr.bf16.mxu0 %v8235_v37  ;;  %v320_v36 = vld [vmem:[%s12950_s1 + $0x8d0] sm:$0xff] }
 0x11c   :  { %3217 = vmatprep.subr.bf16.mxu1 %v8363_v38  ;;  %v324_v37 = vld [vmem:[%s12950_s1 + $0x8f0] sm:$0xff] }
 0x11d   :  { %v448_v38 = vld [vmem:[%s12950_s1 + $0xcd0] sm:$0xff]  ;;  %v8435_v42 = vcombine.high %v320_v36, %v324_v37  ;;  %v8434_v48 = vcombine.low %v320_v36, %v324_v37 }
 0x11e   :  { %3175 = vmatpush2.bf16.msra.mxu0 %v8234_v44  ;;  %v8563_v44 = vcombine.high %v448_v38, %v452_v39  ;;  %v8562_v49 = vcombine.low %v448_v38, %v452_v39  ;;  %v400_v36 = vld [vmem:[%s12950_s1 + $0xb50] sm:$0xff]  ;;  %v81_v39 = vld [vmem:[%s12950_s1 + $0x158] sm:$0xff] }
 0x11f   :  { %3218 = vmatpush2.bf16.msra.mxu1 %v8362_v45  ;;  %3176 = vmatprep.subr.bf16.mxu0 %v8227_v59  ;;  %v312_v45 = vld [vmem:[%s12950_s1 + $0x890] sm:$0xff] }
 0x120   :  { %3219 = vmatprep.subr.bf16.mxu1 %v8355_v46  ;;  %v316_v59 = vld [vmem:[%s12950_s1 + $0x8b0] sm:$0xff] }
 0x121   :  { %v440_v46 = vld [vmem:[%s12950_s1 + $0xc90] sm:$0xff]  ;;  %v8427_v12 = vcombine.high %v312_v45, %v316_v59  ;;  %v8426_v53 = vcombine.low %v312_v45, %v316_v59 }
 0x122   :  { %3177 = vmatpush2.bf16.msra.mxu0 %v8226_v50  ;;  %v8555_v50 = vcombine.high %v440_v46, %v444_v47  ;;  %v8554_v54 = vcombine.low %v440_v46, %v444_v47  ;;  %v404_v37 = vld [vmem:[%s12950_s1 + $0xb70] sm:$0xff]  ;;  %v8204_v46 = vcombine.low %v89_v22, %v93_v25 }
 0x123   :  { %3220 = vmatpush2.bf16.msra.mxu1 %v8354_v15  ;;  %3178 = vmatprep.subr.bf16.mxu0 %v8219_v51  ;;  %v304_v15 = vld [vmem:[%s12950_s1 + $0x850] sm:$0xff]  ;;  %v8515_v47 = vcombine.high %v400_v36, %v404_v37 }
 0x124   :  { %3221 = vmatprep.subr.bf16.mxu1 %v8347_v52  ;;  %v308_v51 = vld [vmem:[%s12950_s1 + $0x870] sm:$0xff] }
 0x125   :  { %v432_v52 = vld [vmem:[%s12950_s1 + $0xc50] sm:$0xff]  ;;  %v8419_v24 = vcombine.high %v304_v15, %v308_v51  ;;  %v8418_v0 = vcombine.low %v304_v15, %v308_v51  ;;  %v73_v15 = vld [vmem:[%s12950_s1 + $0x118] sm:$0xff] }
 0x126   :  { %3179 = vmatpush2.bf16.msra.mxu0 %v8218_v57  ;;  %v8547_v57 = vcombine.high %v432_v52, %v436_v23  ;;  %v8546_v3 = vcombine.low %v432_v52, %v436_v23  ;;  %v77_v51 = vld [vmem:[%s12950_s1 + $0x138] sm:$0xff]  ;;  %v8514_v23 = vcombine.low %v400_v36, %v404_v37  ;;  %v364_v36 = vld [vmem:[%s12950_s1 + $0xa30] sm:$0xff] }
 0x127   :  { %3222 = vmatpush2.bf16.msra.mxu1 %v8346_v58  ;;  %3234 = vmatprep.subr.bf16.mxu0 %v8467_v60  ;;  %v296_v58 = vld [vmem:[%s12950_s1 + $0x810] sm:$0xff]  ;;  %v41_v37 = vld [vmem:[%s12950_s1 + $0x18] sm:$0xff] }
 0x128   :  { %3277 = vmatprep.subr.bf16.mxu1 %v8595_v61  ;;  %v300_v60 = vld [vmem:[%s12950_s1 + $0x830] sm:$0xff] }
 0x129   :  { %3181 = vmatmul.mubr.bf16.vlgmr.msra.gmra.mxu0 %v10424_v11  ;;  %v424_v61 = vld [vmem:[%s12950_s1 + $0xc10] sm:$0xff]  ;;  %v8411_v4 = vcombine.high %v296_v58, %v300_v60  ;;  %v8410_v10 = vcombine.low %v296_v58, %v300_v60 }
 0x12a   :  { %3224 = vmatmul.mubr.bf16.vlgmr.msra.gmra.mxu1 %v10436_v17  ;;  %3235 = vmatpush1.bf16.msra.mxu0 %v8466_v5  ;;  %v8539_v5 = vcombine.high %v424_v61, %v428_v63  ;;  %v8538_v13 = vcombine.low %v424_v61, %v428_v63  ;;  %v384_v58 = vld [vmem:[%s12950_s1 + $0xad0] sm:$0xff]  ;;  %v69_v61 = vld [vmem:[%s12950_s1 + $0xf8] sm:$0xff] }
 0x12b   :  { %3278 = vmatpush1.bf16.msra.mxu1 %v8594_v6  ;;  %3236 = vmatprep.subr.bf16.mxu0 %v8459_v7  ;;  %v416_v6 = vld [vmem:[%s12950_s1 + $0xbd0] sm:$0xff] }
 0x12c   :  { %3279 = vmatprep.subr.bf16.mxu1 %v8587_v8  ;;  %3309 = vmatprep.mubr.bf16.mxu1 %v9398_v31  ;;  %v420_v7 = vld [vmem:[%s12950_s1 + $0xbf0] sm:$0xff]  ;;  %v97_v8 = vld [vmem:[%s12950_s1 + $0x1d8] sm:$0xff] }
 0x12d   :  { %3266 = vmatprep.mubr.bf16.mxu0 %v10455_v29  ;;  %v8531_v14 = vcombine.high %v416_v6, %v420_v7  ;;  %v8530_v26 = vcombine.low %v416_v6, %v420_v7  ;;  %v388_v60 = vld [vmem:[%s12950_s1 + $0xaf0] sm:$0xff] }
 0x12e   :  { %3237 = vmatpush1.bf16.msra.mxu0 %v8458_v18  ;;  %v8213_v18 = vcombine.high %v97_v8, %v101_v9  ;;  %v376_v6 = vld [vmem:[%s12950_s1 + $0xa90] sm:$0xff] }
 0x12f   :  { %3280 = vmatpush1.bf16.msra.mxu1 %v8586_v19  ;;  %3238 = vmatprep.subr.bf16.mxu0 %v8451_v20  ;;  %v408_v19 = vld [vmem:[%s12950_s1 + $0xb90] sm:$0xff] }
 0x130   :  { %3281 = vmatprep.subr.bf16.mxu1 %v8579_v21  ;;  %v412_v20 = vld [vmem:[%s12950_s1 + $0xbb0] sm:$0xff]  ;;  %v10524_v21 = vpop.f32.mrf.mxu1 }
 0x131   :  { %v380_v7 = vld [vmem:[%s12950_s1 + $0xab0] sm:$0xff] }
 0x132   :  { %3239 = vmatpush1.bf16.msra.mxu0 %v8450_v30  ;;  %v2967_v30 = vpop.f32.mrf.mxu1 }
 0x133   :  { %3282 = vmatpush1.bf16.msra.mxu1 %v8578_v32  ;;  %3240 = vmatprep.subr.bf16.mxu0 %v8443_v33  ;;  %v8212_v32 = vcombine.low %v97_v8, %v101_v9  ;;  %v8523_v33 = vcombine.high %v408_v19, %v412_v20  ;;  %v57_v8 = vld [vmem:[%s12950_s1 + $0x98] sm:$0xff] }
 0x134   :  { %3283 = vmatprep.subr.bf16.mxu1 %v8571_v35  ;;  %v8205_v35 = vcombine.high %v89_v22, %v93_v25  ;;  %v10553_v45 = vpop.f32.mrf.mxu1  ;;  %v61_v9 = vld [vmem:[%s12950_s1 + $0xb8] sm:$0xff] }
 0x135   :  { %v49_v22 = vld [vmem:[%s12950_s1 + $0x58] sm:$0xff] }
 0x136   :  { %3241 = vmatpush1.bf16.msra.mxu0 %v8442_v40  ;;  %v85_v40 = vld [vmem:[%s12950_s1 + $0x178] sm:$0xff] }
 0x137   :  { %3284 = vmatpush1.bf16.msra.mxu1 %v8570_v41  ;;  %3242 = vmatprep.subr.bf16.mxu0 %v8435_v42  ;;  %v10550_v42 = vld [vmem:[%s12951_s0 + $0x18] ss:$28 sps:$4 sm:$0xff]  }
 0x138   :  { %3285 = vmatprep.subr.bf16.mxu1 %v8563_v44  ;;  %v8522_v44 = vcombine.low %v408_v19, %v412_v20  ;;  %v368_v19 = vld [vmem:[%s12950_s1 + $0xa50] sm:$0xff]  ;;  %v53_v25 = vld [vmem:[%s12950_s1 + $0x78] sm:$0xff] }
 0x139   :  { %v372_v20 = vld [vmem:[%s12950_s1 + $0xa70] sm:$0xff] }
 0x13a   :  { %3243 = vmatpush1.bf16.msra.mxu0 %v8434_v48 }
 0x13b   :  { %3286 = vmatpush1.bf16.msra.mxu1 %v8562_v49  ;;  %3244 = vmatprep.subr.bf16.mxu0 %v8427_v12  ;;  %v392_v49 = vld [vmem:[%s12950_s1 + $0xb10] sm:$0xff] }
 0x13c   :  { %3287 = vmatprep.subr.bf16.mxu1 %v8555_v50  ;;  %v396_v12 = vld [vmem:[%s12950_s1 + $0xb30] sm:$0xff] }
 0x13e   :  { %3245 = vmatpush1.bf16.msra.mxu0 %v8426_v53  ;;  %v2971_v53 = vpop.f32.mrf.mxu1 }
 0x13f   :  { %3288 = vmatpush1.bf16.msra.mxu1 %v8554_v54  ;;  %3246 = vmatprep.subr.bf16.mxu0 %v8419_v24  ;;  %v8196_v54 = vcombine.low %v81_v39, %v85_v40  ;;  %v8507_v24 = vcombine.high %v392_v49, %v396_v12 }
 0x140   :  { %3289 = vmatprep.subr.bf16.mxu1 %v8547_v57 }
 0x142   :  { %3247 = vmatpush1.bf16.msra.mxu0 %v8418_v0  ;;  %v8506_v0 = vcombine.low %v392_v49, %v396_v12 }
 0x143   :  { %3290 = vmatpush1.bf16.msra.mxu1 %v8546_v3  ;;  %3248 = vmatprep.subr.bf16.mxu0 %v8411_v4  ;;  %v8188_v3 = vcombine.low %v73_v15, %v77_v51  ;;  %v8499_v4 = vcombine.high %v384_v58, %v388_v60 }
 0x144   :  { %3291 = vmatprep.subr.bf16.mxu1 %v8539_v5 }
 0x146   :  { %3249 = vmatpush1.bf16.msra.mxu0 %v8410_v10  ;;  %v8498_v10 = vcombine.low %v384_v58, %v388_v60  ;;  %v209_v58 = vld [vmem:[%s12950_s1 + $0x558] sm:$0xff] }
 0x147   :  { %3292 = vmatpush1.bf16.msra.mxu1 %v8538_v13  ;;  %3250 = vmatprep.subr.bf16.mxu0 %v8531_v14  ;;  %v8491_v14 = vcombine.high %v376_v6, %v380_v7  ;;  %v213_v60 = vld [vmem:[%s12950_s1 + $0x578] sm:$0xff] }
 0x148   :  { %3320 = vmatprep.subr.bf16.mxu1 %v8213_v18  ;;  %v8173_v18 = vcombine.high %v57_v8, %v61_v9 }
 0x149   :  { %v2924_v38 = vpop.f32.mrf.mxu0 }
 0x14a   :  { %v2925_v41 = vadd.f32 %v2924_v38, %v10325_v1  ;;  %3310 = vmatmul.mubr.bf16.vlgmr.msra.gmra.mxu1 %v10550_v42  ;;  %3251 = vmatpush2.bf16.msra.mxu0 %v8530_v26  ;;  %v8197_v1 = vcombine.high %v81_v39, %v85_v40  ;;  %v8490_v26 = vcombine.low %v376_v6, %v380_v7  ;;  %v45_v38 = vld [vmem:[%s12950_s1 + $0x38] sm:$0xff] }
 0x14b   :  { %3321 = vmatpush1.bf16.msra.mxu1 %v8212_v32  ;;  %v10555_v59 = vpop.f32.mrf.mxu0  ;;  %3252 = vmatprep.subr.bf16.mxu0 %v8523_v33  ;;  %v8483_v32 = vcombine.high %v368_v19, %v372_v20  ;;  %v8165_v33 = vcombine.high %v49_v22, %v53_v25  ;;  %v8482_v39 = vcombine.low %v368_v19, %v372_v20  ;;  %v201_v7 = vld [vmem:[%s12950_s1 + $0x518] sm:$0xff] }
 0x14c   :  { %v2968_v48 = vadd.f32 %v2967_v30, %v2925_v41  ;;  %3322 = vmatprep.subr.bf16.mxu1 %v8205_v35  ;;  %3352 = vmatprep.mubr.bf16.mxu1 %v10213_v28  ;;  %v8189_v28 = vcombine.high %v73_v15, %v77_v51  ;;  %v8172_v30 = vcombine.low %v57_v8, %v61_v9  ;;  %v360_v35 = vld [vmem:[%s12950_s1 + $0xa10] sm:$0xff]  ;;  %v217_v51 = vld [vmem:[%s12950_s1 + $0x598] sm:$0xff] }
 0x14d   :  { %v2928_v50 = vpop.f32.mrf.mxu0  ;;  %v8164_v40 = vcombine.low %v49_v22, %v53_v25  ;;  %v8475_v41 = vcombine.high %v360_v35, %v364_v36  ;;  %v8474_v49 = vcombine.low %v360_v35, %v364_v36  ;;  %v8156_v12 = vcombine.low %v41_v37, %v45_v38  ;;  %v205_v8 = vld [vmem:[%s12950_s1 + $0x538] sm:$0xff] }
 0x14e   :  { %v2929_v52 = vadd.f32 %v2928_v50, %v10341_v16  ;;  %3253 = vmatpush2.bf16.msra.mxu0 %v8522_v44  ;;  %v65_v16 = vld [vmem:[%s12950_s1 + $0xd8] sm:$0xff]  ;;  %v8157_v44 = vcombine.high %v41_v37, %v45_v38 }
 0x14f   :  { %3323 = vmatpush1.bf16.msra.mxu1 %v8204_v46  ;;  %3254 = vmatprep.subr.bf16.mxu0 %v8515_v47  ;;  %v8181_v5 = vcombine.high %v65_v16, %v69_v61  ;;  %v8180_v13 = vcombine.low %v65_v16, %v69_v61  ;;  %v225_v46 = vld [vmem:[%s12950_s1 + $0x5d8] sm:$0xff]  ;;  %v10654_v16 = vld [vmem:[%s12951_s0 + $0x10] ss:$28 sps:$4 sm:$0xff]  }
 0x150   :  { %v2972_v57 = vadd.f32 %v2971_v53, %v2929_v52  ;;  %3324 = vmatprep.subr.bf16.mxu1 %v8197_v1  ;;  %v229_v47 = vld [vmem:[%s12950_s1 + $0x5f8] sm:$0xff] }
 0x151   :  { %v165_v1 = vld [vmem:[%s12950_s1 + $0x3f8] sm:$0xff]  ;;  %v8341_v50 = vcombine.high %v225_v46, %v229_v47 }
 0x152   :  { %v10583_v63 = vpack.c.bf16 %v2972_v57, %v2968_v48  ;;  %3255 = vmatpush2.bf16.msra.mxu0 %v8514_v23  ;;  %v161_v48 = vld [vmem:[%s12950_s1 + $0x3d8] sm:$0xff] }
 0x153   :  { %3325 = vmatpush1.bf16.msra.mxu1 %v8196_v54  ;;  %3256 = vmatprep.subr.bf16.mxu0 %v8507_v24  ;;  %v8277_v15 = vcombine.high %v161_v48, %v165_v1  ;;  %v221_v52 = vld [vmem:[%s12950_s1 + $0x5b8] sm:$0xff]  ;;  %v8340_v54 = vcombine.low %v225_v46, %v229_v47  ;;  %v8276_v24 = vcombine.low %v161_v48, %v165_v1 }
 0x154   :  { %3326 = vmatprep.subr.bf16.mxu1 %v8189_v28  ;;  %v153_v23 = vld [vmem:[%s12950_s1 + $0x398] sm:$0xff]  ;;  %v8333_v57 = vcombine.high %v217_v51, %v221_v52  ;;  %vm3500_vm2 = vcmp.gt.bf16.partialorder %v10583_v63, 0 }
 0x155   :  { %v157_v53 = vld [vmem:[%s12950_s1 + $0x3b8] sm:$0xff] }
 0x156   :  { %3257 = vmatpush2.bf16.msra.mxu0 %v8506_v0  ;;  %v8269_v28 = vcombine.high %v153_v23, %v157_v53  ;;  %v145_v61 = vld [vmem:[%s12950_s1 + $0x358] sm:$0xff] }
 0x157   :  { %3327 = vmatpush1.bf16.msra.mxu1 %v8188_v3  ;;  %3258 = vmatprep.subr.bf16.mxu0 %v8499_v4  ;;  %v149_v0 = vld [vmem:[%s12950_s1 + $0x378] sm:$0xff]  ;;  %v8332_v3 = vcombine.low %v217_v51, %v221_v52  ;;  %v8268_v4 = vcombine.low %v153_v23, %v157_v53 }
 0x158   :  { %3328 = vmatprep.subr.bf16.mxu1 %v8181_v5  ;;  %v8325_v5 = vcombine.high %v209_v58, %v213_v60  ;;  %v8261_v6 = vcombine.high %v145_v61, %v149_v0  ;;  %v137_v9 = vld [vmem:[%s12950_s1 + $0x318] sm:$0xff] }
 0x159   :  { %v193_v19 = vld [vmem:[%s12950_s1 + $0x4d8] sm:$0xff] }
 0x15a   :  { %3259 = vmatpush2.bf16.msra.mxu0 %v8498_v10  ;;  %v8324_v10 = vcombine.low %v209_v58, %v213_v60  ;;  %v197_v20 = vld [vmem:[%s12950_s1 + $0x4f8] sm:$0xff]  ;;  %v498_v58 = vsub.s32 2, %v10276_v34 }
 0x15b   :  { %3329 = vmatpush1.bf16.msra.mxu1 %v8180_v13  ;;  %3260 = vmatprep.subr.bf16.mxu0 %v8491_v14  ;;  %v8260_v13 = vcombine.low %v145_v61, %v149_v0  ;;  %v8317_v14 = vcombine.high %v201_v7, %v205_v8  ;;  %v129_v22 = vld [vmem:[%s12950_s1 + $0x2d8] sm:$0xff] }
 0x15c   :  { %3330 = vmatprep.subr.bf16.mxu1 %v8173_v18  ;;  %v133_v25 = vld [vmem:[%s12950_s1 + $0x2f8] sm:$0xff] }
 0x15d   :  { %v185_v35 = vld [vmem:[%s12950_s1 + $0x498] sm:$0xff] }
 0x15e   :  { %3261 = vmatpush2.bf16.msra.mxu0 %v8490_v26  ;;  %v8316_v26 = vcombine.low %v201_v7, %v205_v8  ;;  %v189_v36 = vld [vmem:[%s12950_s1 + $0x4b8] sm:$0xff] }
 0x15f   :  { %3331 = vmatpush1.bf16.msra.mxu1 %v8172_v30  ;;  %3262 = vmatprep.subr.bf16.mxu0 %v8483_v32  ;;  %v8309_v32 = vcombine.high %v193_v19, %v197_v20  ;;  %v121_v37 = vld [vmem:[%s12950_s1 + $0x298] sm:$0xff] }
 0x160   :  { %3332 = vmatprep.subr.bf16.mxu1 %v8165_v33  ;;  %v8245_v33 = vcombine.high %v129_v22, %v133_v25  ;;  %v125_v38 = vld [vmem:[%s12950_s1 + $0x2b8] sm:$0xff] }
 0x161   :  { %v177_v46 = vld [vmem:[%s12950_s1 + $0x458] sm:$0xff] }
 0x162   :  { %3263 = vmatpush2.bf16.msra.mxu0 %v8482_v39  ;;  %v8308_v39 = vcombine.low %v193_v19, %v197_v20  ;;  %v181_v47 = vld [vmem:[%s12950_s1 + $0x478] sm:$0xff] }
 0x163   :  { %3333 = vmatpush1.bf16.msra.mxu1 %v8164_v40  ;;  %3264 = vmatprep.subr.bf16.mxu0 %v8475_v41  ;;  %v8244_v40 = vcombine.low %v129_v22, %v133_v25  ;;  %v8301_v41 = vcombine.high %v185_v35, %v189_v36  ;;  %v113_v48 = vld [vmem:[%s12950_s1 + $0x258] sm:$0xff]  ;;  %v10756_v22 = vpop.f32.mrf.mxu0 }
 0x164   :  { %3334 = vmatprep.subr.bf16.mxu1 %v8157_v44  ;;  %v8237_v44 = vcombine.high %v121_v37, %v125_v38  ;;  %v117_v1 = vld [vmem:[%s12950_s1 + $0x278] sm:$0xff] }
 0x165   :  { %v169_v51 = vld [vmem:[%s12950_s1 + $0x418] sm:$0xff] }
 0x166   :  { %3265 = vmatpush2.bf16.msra.mxu0 %v8474_v49  ;;  %v8300_v49 = vcombine.low %v185_v35, %v189_v36  ;;  %v173_v52 = vld [vmem:[%s12950_s1 + $0x438] sm:$0xff] }
 0x167   :  { %3335 = vmatpush1.bf16.msra.mxu1 %v8156_v12  ;;  %3363 = vmatprep.subr.bf16.mxu0 %v8341_v50  ;;  %v8236_v12 = vcombine.low %v121_v37, %v125_v38  ;;  %v8293_v50 = vcombine.high %v177_v46, %v181_v47  ;;  %v105_v23 = vld [vmem:[%s12950_s1 + $0x218] sm:$0xff] }
 0x168   :  { %3336 = vmatprep.subr.bf16.mxu1 %v8277_v15  ;;  %v8229_v15 = vcombine.high %v113_v48, %v117_v1  ;;  %v109_v53 = vld [vmem:[%s12950_s1 + $0x238] sm:$0xff] }
 0x169   :  { %3267 = vmatmul.mubr.bf16.vlgmr.msra.gmra.mxu0 %v10654_v16  ;;  %v8221_v60 = vcombine.high %v105_v23, %v109_v53  ;;  %v289_v61 = vld [vmem:[%s12950_s1 + $0x7d8] sm:$0xff]  ;;  %v8220_v7 = vcombine.low %v105_v23, %v109_v53 }
 0x16a   :  { %3364 = vmatpush1.bf16.msra.mxu0 %v8340_v54  ;;  %3395 = vmatprep.mubr.bf16.mxu0 %v10225_v55  ;;  %v141_v55 = vld [vmem:[%s12950_s1 + $0x338] sm:$0xff]  ;;  %v8292_v54 = vcombine.low %v177_v46, %v181_v47 }
 0x16b   :  { %3337 = vmatpush2.bf16.msra.mxu1 %v8276_v24  ;;  %3365 = vmatprep.subr.bf16.mxu0 %v8333_v57  ;;  %v8253_v18 = vcombine.high %v137_v9, %v141_v55  ;;  %v8252_v30 = vcombine.low %v137_v9, %v141_v55  ;;  %v10724_v24 = vpop.f32.mrf.mxu1  ;;  %v8228_v57 = vcombine.low %v113_v48, %v117_v1  ;;  %v293_v0 = vld [vmem:[%s12950_s1 + $0x7f8] sm:$0xff] }
 0x16c   :  { %3338 = vmatprep.subr.bf16.mxu1 %v8269_v28  ;;  %v8285_v28 = vcombine.high %v169_v51, %v173_v52  ;;  %v8405_v8 = vcombine.high %v289_v61, %v293_v0  ;;  %v499_v9 = vrot.slane %v10294_v56, %v498_v58  ;;  %v349_v19 = vld [vmem:[%s12950_s1 + $0x9b8] sm:$0xff]  ;;  %v8404_v20 = vcombine.low %v289_v61, %v293_v0 }
 0x16d   :  { %v277_v35 = vld [vmem:[%s12950_s1 + $0x778] sm:$0xff] }
 0x16e   :  { %3366 = vmatpush1.bf16.msra.mxu0 %v8332_v3  ;;  %v3010_v3 = vpop.f32.mrf.mxu1  ;;  %v337_v38 = vld [vmem:[%s12950_s1 + $0x958] sm:$0xff] }
 0x16f   :  { %3339 = vmatpush2.bf16.msra.mxu1 %v8268_v4  ;;  %3367 = vmatprep.subr.bf16.mxu0 %v8325_v5  ;;  %v353_v4 = vld [vmem:[%s12950_s1 + $0x9d8] sm:$0xff] }
 0x170   :  { %3340 = vmatprep.subr.bf16.mxu1 %v8261_v6  ;;  %v357_v5 = vld [vmem:[%s12950_s1 + $0x9f8] sm:$0xff]  ;;  %v8284_v6 = vcombine.low %v169_v51, %v173_v52 }
 0x171   :  { %v8469_v55 = vcombine.high %v353_v4, %v357_v5  ;;  %v8468_v25 = vcombine.low %v353_v4, %v357_v5  ;;  %v249_v5 = vld [vmem:[%s12950_s1 + $0x698] sm:$0xff] }
 0x172   :  { %3368 = vmatpush1.bf16.msra.mxu0 %v8324_v10  ;;  %v281_v10 = vld [vmem:[%s12950_s1 + $0x798] sm:$0xff] }
 0x173   :  { %3341 = vmatpush2.bf16.msra.mxu1 %v8260_v13  ;;  %3369 = vmatprep.subr.bf16.mxu0 %v8317_v14  ;;  %v285_v13 = vld [vmem:[%s12950_s1 + $0x7b8] sm:$0xff]  ;;  %v10748_v14 = vpop.f32.mrf.mxu1 }
 0x174   :  { %3342 = vmatprep.subr.bf16.mxu1 %v8253_v18  ;;  %v345_v18 = vld [vmem:[%s12950_s1 + $0x998] sm:$0xff] }
 0x175   :  { %v3014_v36 = vpop.f32.mrf.mxu1  ;;  %v8460_v46 = vcombine.low %v345_v18, %v349_v19 }
 0x176   :  { %3370 = vmatpush1.bf16.msra.mxu0 %v8316_v26  ;;  %v8397_v26 = vcombine.high %v281_v10, %v285_v13  ;;  %v3015_v48 = vadd.f32 %v3014_v36, %v499_v9 }
 0x177   :  { %3343 = vmatpush2.bf16.msra.mxu1 %v8252_v30  ;;  %3371 = vmatprep.subr.bf16.mxu0 %v8309_v32  ;;  %v3011_v30 = vadd.f32 %v3010_v3, %v499_v9  ;;  %v8461_v32 = vcombine.high %v345_v18, %v349_v19  ;;  %v317_v9 = vld [vmem:[%s12950_s1 + $0x8b8] sm:$0xff] }
 0x178   :  { %3344 = vmatprep.subr.bf16.mxu1 %v8245_v33  ;;  %v273_v33 = vld [vmem:[%s12950_s1 + $0x758] sm:$0xff] }
 0x179   :  { %v8389_v47 = vcombine.high %v273_v33, %v277_v35  ;;  %v8388_v52 = vcombine.low %v273_v33, %v277_v35  ;;  %v241_v19 = vld [vmem:[%s12950_s1 + $0x658] sm:$0xff] }
 0x17a   :  { %3372 = vmatpush1.bf16.msra.mxu0 %v8308_v39  ;;  %v341_v39 = vld [vmem:[%s12950_s1 + $0x978] sm:$0xff] }
 0x17b   :  { %3345 = vmatpush2.bf16.msra.mxu1 %v8244_v40  ;;  %3373 = vmatprep.subr.bf16.mxu0 %v8301_v41  ;;  %v8396_v41 = vcombine.low %v281_v10, %v285_v13  ;;  %v8453_v1 = vcombine.high %v337_v38, %v341_v39  ;;  %v8452_v23 = vcombine.low %v337_v38, %v341_v39  ;;  %v237_v38 = vld [vmem:[%s12950_s1 + $0x638] sm:$0xff] }
 0x17c   :  { %3346 = vmatprep.subr.bf16.mxu1 %v8237_v44 }
 0x17e   :  { %3374 = vmatpush1.bf16.msra.mxu0 %v8300_v49  ;;  %v265_v49 = vld [vmem:[%s12950_s1 + $0x718] sm:$0xff] }
 0x17f   :  { %3347 = vmatpush2.bf16.msra.mxu1 %v8236_v12  ;;  %3375 = vmatprep.subr.bf16.mxu0 %v8293_v50  ;;  %v269_v12 = vld [vmem:[%s12950_s1 + $0x738] sm:$0xff] }
 0x180   :  { %3348 = vmatprep.subr.bf16.mxu1 %v8229_v15  ;;  %v329_v50 = vld [vmem:[%s12950_s1 + $0x918] sm:$0xff]  ;;  %v8381_v53 = vcombine.high %v265_v49, %v269_v12  ;;  %v8380_v61 = vcombine.low %v265_v49, %v269_v12 }
 0x181   :  { %v333_v15 = vld [vmem:[%s12950_s1 + $0x938] sm:$0xff] }
 0x182   :  { %3376 = vmatpush1.bf16.msra.mxu0 %v8292_v54  ;;  %v8445_v54 = vcombine.high %v329_v50, %v333_v15  ;;  %v8444_v0 = vcombine.low %v329_v50, %v333_v15  ;;  %v485_v12 = vld [vmem:[%s12950_s1 + $0xdf8] sm:$0xff] }
 0x183   :  { %3349 = vmatpush2.bf16.msra.mxu1 %v8228_v57  ;;  %3377 = vmatprep.subr.bf16.mxu0 %v8285_v28  ;;  %v261_v57 = vld [vmem:[%s12950_s1 + $0x6f8] sm:$0xff] }
 0x184   :  { %3350 = vmatprep.subr.bf16.mxu1 %v8221_v60  ;;  %v321_v28 = vld [vmem:[%s12950_s1 + $0x8d8] sm:$0xff] }
 0x185   :  { %v325_v60 = vld [vmem:[%s12950_s1 + $0x8f8] sm:$0xff] }
 0x186   :  { %3378 = vmatpush1.bf16.msra.mxu0 %v8284_v6  ;;  %v8437_v4 = vcombine.high %v321_v28, %v325_v60  ;;  %v253_v6 = vld [vmem:[%s12950_s1 + $0x6b8] sm:$0xff]  ;;  %v8436_v10 = vcombine.low %v321_v28, %v325_v60 }
 0x187   :  { %3351 = vmatpush2.bf16.msra.mxu1 %v8220_v7  ;;  %3379 = vmatprep.subr.bf16.mxu0 %v8405_v8  ;;  %v494_v7 = vsub.s32 1, %v10276_v34  ;;  %v313_v8 = vld [vmem:[%s12950_s1 + $0x898] sm:$0xff]  ;;  %v8365_v13 = vcombine.high %v249_v5, %v253_v6 }
 0x188   :  { %3406 = vmatprep.subr.bf16.mxu1 %v8469_v55  ;;  %v8429_v18 = vcombine.high %v313_v8, %v317_v9  ;;  %v8428_v35 = vcombine.low %v313_v8, %v317_v9  ;;  %v421_v15 = vld [vmem:[%s12950_s1 + $0xbf8] sm:$0xff]  ;;  %v3016_v8 = vpop.f32.mrf.mxu1 }
 0x189   :  { %v3053_v37 = vpop.f32.mrf.mxu0  ;;  %v413_v60 = vld [vmem:[%s12950_s1 + $0xbb8] sm:$0xff] }
 0x18a   :  { %v10770_v40 = vadd.f32 %v3053_v37, %v3011_v30  ;;  %3353 = vmatmul.mubr.bf16.vlgmr.msra.gmra.mxu1 %v10424_v11  ;;  %3380 = vmatpush2.bf16.msra.mxu0 %v8404_v20  ;;  %v245_v20 = vld [vmem:[%s12950_s1 + $0x678] sm:$0xff] }
 0x18b   :  { %3407 = vmatpush1.bf16.msra.mxu1 %v8468_v25  ;;  %v10773_v44 = vpop.f32.mrf.mxu0  ;;  %3381 = vmatprep.subr.bf16.mxu0 %v8397_v26  ;;  %v495_v25 = vrot.slane %v10294_v56, %v494_v7  ;;  %v305_v26 = vld [vmem:[%s12950_s1 + $0x858] sm:$0xff]  ;;  %v8357_v36 = vcombine.high %v241_v19, %v245_v20 }
 0x18c   :  { %3408 = vmatprep.subr.bf16.mxu1 %v8461_v32  ;;  %3438 = vmatprep.mubr.bf16.mxu1 %v10455_v29  ;;  %v257_v29 = vld [vmem:[%s12950_s1 + $0x6d8] sm:$0xff]  ;;  %v8364_v32 = vcombine.low %v249_v5, %v253_v6 }
 0x18d   :  { %v3057_v11 = vpop.f32.mrf.mxu0  ;;  %v8373_v3 = vcombine.high %v257_v29, %v261_v57  ;;  %v8372_v55 = vcombine.low %v257_v29, %v261_v57  ;;  %v309_v30 = vld [vmem:[%s12950_s1 + $0x878] sm:$0xff]  ;;  %v2845_v33 = vadd.f32 %v10532_v27, %v495_v25  ;;  %v2841_v39 = vadd.f32 %v10323_v62, %v495_v25 }
 0x18e   :  { %v10788_v51 = vadd.f32 %v3057_v11, %v3015_v48  ;;  %3382 = vmatpush2.bf16.msra.mxu0 %v8396_v41  ;;  %v8421_v37 = vcombine.high %v305_v26, %v309_v30  ;;  %v233_v56 = vld [vmem:[%s12950_s1 + $0x618] sm:$0xff]  ;;  %v8420_v48 = vcombine.low %v305_v26, %v309_v30 }
 0x18f   :  { %3409 = vmatpush1.bf16.msra.mxu1 %v8460_v46  ;;  %3383 = vmatprep.subr.bf16.mxu0 %v8389_v47  ;;  %v297_v27 = vld [vmem:[%s12950_s1 + $0x818] sm:$0xff]  ;;  %v8356_v46 = vcombine.low %v241_v19, %v245_v20  ;;  %v2888_v47 = vadd.f32 %v10524_v21, %v2845_v33  ;;  %v2884_v11 = vadd.f32 %v10327_v2, %v2841_v39 }
 0x190   :  { %3410 = vmatprep.subr.bf16.mxu1 %v8453_v1  ;;  %v301_v41 = vld [vmem:[%s12950_s1 + $0x838] sm:$0xff]  ;;  %v8349_v1 = vcombine.high %v233_v56, %v237_v38 }
 0x191   :  { %v8413_v49 = vcombine.high %v297_v27, %v301_v41  ;;  %v481_v62 = vld [vmem:[%s12950_s1 + $0xdd8] sm:$0xff]  ;;  %v2931_v50 = vadd.f32 %v10756_v22, %v2888_v47 }
 0x192   :  { %3384 = vmatpush2.bf16.msra.mxu0 %v8388_v52  ;;  %v417_v21 = vld [vmem:[%s12950_s1 + $0xbd8] sm:$0xff]  ;;  %v502_v52 = vsub.s32 3, %v10276_v34  ;;  %v8597_v2 = vcombine.high %v481_v62, %v485_v12 }
 0x193   :  { %3411 = vmatpush1.bf16.msra.mxu1 %v8452_v23  ;;  %3385 = vmatprep.subr.bf16.mxu0 %v8381_v53  ;;  %v8348_v23 = vcombine.low %v233_v56, %v237_v38  ;;  %v2927_v53 = vadd.f32 %v10555_v59, %v2884_v11  ;;  %v8533_v22 = vcombine.high %v417_v21, %v421_v15  ;;  %v473_v29 = vld [vmem:[%s12950_s1 + $0xd98] sm:$0xff] }
 0x194   :  { %3412 = vmatprep.subr.bf16.mxu1 %v8445_v54  ;;  %v8412_v54 = vcombine.low %v297_v27, %v301_v41  ;;  %v477_v57 = vld [vmem:[%s12950_s1 + $0xdb8] sm:$0xff]  ;;  %v2974_v28 = vadd.f32 %v10724_v24, %v2931_v50  ;;  %v8532_v5 = vcombine.low %v417_v21, %v421_v15 }
 0x195   :  { %v409_v59 = vld [vmem:[%s12950_s1 + $0xb98] sm:$0xff]  ;;  %v2970_v24 = vadd.f32 %v10553_v45, %v2927_v53  ;;  %v8589_v6 = vcombine.high %v473_v29, %v477_v57  ;;  %v8588_v26 = vcombine.low %v473_v29, %v477_v57 }
 0x196   :  { %3386 = vmatpush2.bf16.msra.mxu0 %v8380_v61  ;;  %v10877_v61 = vld [vmem:[%s12952_s2] sm:$0xff]  ;;  %v8525_v9 = vcombine.high %v409_v59, %v413_v60  ;;  %v401_v45 = vld [vmem:[%s12950_s1 + $0xb58] sm:$0xff]  ;;  %v8524_v25 = vcombine.low %v409_v59, %v413_v60 }
 0x197   :  { %3413 = vmatpush1.bf16.msra.mxu1 %v8444_v0  ;;  %3387 = vmatprep.subr.bf16.mxu0 %v8373_v3  ;;  %v503_v0 = vrot.slane %v10877_v61, %v502_v52  ;;  %v8596_v3 = vcombine.low %v481_v62, %v485_v12  ;;  %v405_v19 = vld [vmem:[%s12950_s1 + $0xb78] sm:$0xff] }
 0x198   :  { %3414 = vmatprep.subr.bf16.mxu1 %v8437_v4  ;;  %v3059_v4 = vpop.f32.mrf.mxu0  ;;  %v8517_v56 = vcombine.high %v401_v45, %v405_v19  ;;  %v393_v27 = vld [vmem:[%s12950_s1 + $0xb18] sm:$0xff] }
 0x199   :  { %v3013_v30 = vadd.f32 %v10748_v14, %v503_v0  ;;  %v3017_v38 = vadd.f32 %v3016_v8, %v503_v0  ;;  %v397_v41 = vld [vmem:[%s12950_s1 + $0xb38] sm:$0xff] }
 0x19a   :  { %3388 = vmatpush2.bf16.msra.mxu0 %v8372_v55  ;;  %v465_v55 = vld [vmem:[%s12950_s1 + $0xd58] sm:$0xff]  ;;  %v8509_v15 = vcombine.high %v393_v27, %v397_v41  ;;  %v8508_v29 = vcombine.low %v393_v27, %v397_v41  ;;  %v3612_v41 = vld [vmem:[%s12953_s3 + $0x1c0] sm:$0xff] }
 0x19b   :  { %3415 = vmatpush1.bf16.msra.mxu1 %v8436_v10  ;;  %3389 = vmatprep.subr.bf16.mxu0 %v8365_v13  ;;  %v469_v10 = vld [vmem:[%s12950_s1 + $0xd78] sm:$0xff]  ;;  %v10889_v13 = vpack.c.bf16 %v2974_v28, %v2970_v24  ;;  %v3060_v62 = vadd.f32 %v3059_v4, %v3017_v38 }
 0x19c   :  { %3416 = vmatprep.subr.bf16.mxu1 %v8429_v18  ;;  %v8581_v33 = vcombine.high %v465_v55, %v469_v10  ;;  %v453_v50 = vld [vmem:[%s12950_s1 + $0xcf8] sm:$0xff] }
 0x19d   :  { %v3509_v14 = vmin.bf16 %v9398_v31, %v10889_v13  ;;  %v441_v24 = vld [vmem:[%s12950_s1 + $0xc98] sm:$0xff]  ;;  %vm3501_vm0 = vcmp.gt.bf16.partialorder %v10889_v13, 0 }
 0x19e   :  { %3390 = vmatpush2.bf16.msra.mxu0 %v8364_v32  ;;  %v445_v4 = vld [vmem:[%s12950_s1 + $0xcb8] sm:$0xff] }
 0x19f   :  { %3417 = vmatpush1.bf16.msra.mxu1 %v8428_v35  ;;  %3391 = vmatprep.subr.bf16.mxu0 %v8357_v36  ;;  %v457_v35 = vld [vmem:[%s12950_s1 + $0xd18] sm:$0xff] }
 0x1a0   :  { %3418 = vmatprep.subr.bf16.mxu1 %v8421_v37  ;;  %v461_v36 = vld [vmem:[%s12950_s1 + $0xd38] sm:$0xff] }
 0x1a1   :  { %v8572_v57 = vcombine.low %v457_v35, %v461_v36  ;;  %v381_v8 = vld [vmem:[%s12950_s1 + $0xab8] sm:$0xff] }
 0x1a2   :  { %3392 = vmatpush2.bf16.msra.mxu0 %v8356_v46 }
 0x1a3   :  { %3419 = vmatpush1.bf16.msra.mxu1 %v8420_v48  ;;  %3393 = vmatprep.subr.bf16.mxu0 %v8349_v1  ;;  %v8516_v48 = vcombine.low %v401_v45, %v405_v19  ;;  %v8580_v1 = vcombine.low %v465_v55, %v469_v10  ;;  %v433_v19 = vld [vmem:[%s12950_s1 + $0xc58] sm:$0xff] }
 0x1a4   :  { %3420 = vmatprep.subr.bf16.mxu1 %v8413_v49  ;;  %v8573_v49 = vcombine.high %v457_v35, %v461_v36  ;;  %v425_v36 = vld [vmem:[%s12950_s1 + $0xc18] sm:$0xff] }
 0x1a6   :  { %3394 = vmatpush2.bf16.msra.mxu0 %v8348_v23  ;;  %v3520_v23 = vmul.bf16 1069105081, %v3509_v14  ;;  %v365_v14 = vld [vmem:[%s12950_s1 + $0xa38] sm:$0xff] }
 0x1a7   :  { %3421 = vmatpush1.bf16.msra.mxu1 %v8412_v54  ;;  %3449 = vmatprep.subr.bf16.mxu0 %v8597_v2  ;;  %v389_v2 = vld [vmem:[%s12950_s1 + $0xaf8] sm:$0xff] }
 0x1a8   :  { %3422 = vmatprep.subr.bf16.mxu1 %v8533_v22  ;;  %9348 = vpow.bf16 %v3520_v23 }
 0x1a9   :  { %v3139_v18 = vpop.f32.mrf.mxu0  ;;  %3396 = vmatmul.mubr.bf16.vlgmr.msra.gmra.mxu0 %v10436_v17 }
 0x1aa   :  { %v3096_v20 = vpop.f32.mrf.mxu1  ;;  %3450 = vmatpush1.bf16.msra.mxu0 %v8596_v3  ;;  %3481 = vmatprep.mubr.bf16.mxu0 %v9398_v31 }
 0x1ab   :  { %v3097_v32 = vadd.f32 %v3096_v20, %v10770_v40  ;;  %3423 = vmatpush2.bf16.msra.mxu1 %v8532_v5  ;;  %v3141_v17 = vpop.f32.mrf.mxu0  ;;  %3451 = vmatprep.subr.bf16.mxu0 %v8589_v6  ;;  %v3056_v40 = vadd.f32 %v10773_v44, %v3013_v30  ;;  %v449_v44 = vld [vmem:[%s12950_s1 + $0xcd8] sm:$0xff] }
 0x1ac   :  { %v3098_v37 = vpop.f32.mrf.mxu1  ;;  %3424 = vmatprep.subr.bf16.mxu1 %v8525_v9  ;;  %v8565_v28 = vcombine.high %v449_v44, %v453_v50  ;;  %v377_v6 = vld [vmem:[%s12950_s1 + $0xa98] sm:$0xff]  ;;  %v8564_v9 = vcombine.low %v449_v44, %v453_v50  ;;  %v3604_v44 = vld [vmem:[%s12953_s3 + $0x180] sm:$0xff] }
 0x1ad   :  { %v3140_v39 = vadd.f32 %v3139_v18, %v3097_v32  ;;  %v3143_v47 = vpop.f32.mrf.mxu0  ;;  %v3099_v12 = vadd.f32 %v3098_v37, %v3056_v40  ;;  %v8557_v18 = vcombine.high %v441_v24, %v445_v4  ;;  %v8493_v45 = vcombine.high %v377_v6, %v381_v8  ;;  %v437_v20 = vld [vmem:[%s12950_s1 + $0xc78] sm:$0xff]  ;;  %v3608_v50 = vld [vmem:[%s12953_s3 + $0x1a0] sm:$0xff] }
 0x1ae   :  { %v3100_v46 = vpop.f32.mrf.mxu1  ;;  %3452 = vmatpush1.bf16.msra.mxu0 %v8588_v26  ;;  %v369_v26 = vld [vmem:[%s12950_s1 + $0xa58] sm:$0xff]  ;;  %v8556_v32 = vcombine.low %v441_v24, %v445_v4  ;;  %v8548_v38 = vcombine.low %v433_v19, %v437_v20  ;;  %v8646_v4 = vcombine.low %v3604_v44, %v3608_v50 }
 0x1af   :  { %v3101_v11 = vadd.f32 %v3100_v46, %v10788_v51  ;;  %3425 = vmatpush2.bf16.msra.mxu1 %v8524_v25  ;;  %3453 = vmatprep.subr.bf16.mxu0 %v8581_v33  ;;  %v385_v51 = vld [vmem:[%s12950_s1 + $0xad8] sm:$0xff]  ;;  %v3145_v22 = vpop.f32.mrf.mxu0  ;;  %v3142_v59 = vadd.f32 %v3141_v17, %v3099_v12  ;;  %v8492_v17 = vcombine.low %v377_v6, %v381_v8  ;;  %v3616_v46 = vld [vmem:[%s12953_s3 + $0x1e0] sm:$0xff] }
 0x1b0   :  { %v3102_v21 = vpop.f32.mrf.mxu1  ;;  %3426 = vmatprep.subr.bf16.mxu1 %v8517_v56  ;;  %v8501_v3 = vcombine.high %v385_v51, %v389_v2  ;;  %v8500_v10 = vcombine.low %v385_v51, %v389_v2  ;;  %v373_v30 = vld [vmem:[%s12950_s1 + $0xa78] sm:$0xff]  ;;  %v8549_v33 = vcombine.high %v433_v19, %v437_v20  ;;  %v8655_v12 = vcombine.high %v3612_v41, %v3616_v46  ;;  %v3580_v20 = vld [vmem:[%s12953_s3 + $0xc0] sm:$0xff] }
 0x1b1   :  { %v3144_v53 = vadd.f32 %v3143_v47, %v3101_v11  ;;  %v3103_v54 = vadd.f32 %v3102_v21, %v3060_v62  ;;  %v8485_v35 = vcombine.high %v369_v26, %v373_v30  ;;  %v429_v37 = vld [vmem:[%s12950_s1 + $0xc38] sm:$0xff]  ;;  %v8484_v40 = vcombine.low %v369_v26, %v373_v30  ;;  %v3740_v47 = vld [vmem:[%s12953_s3 + $0x5c0] sm:$0xff] }
 0x1b2   :  { %3454 = vmatpush1.bf16.msra.mxu0 %v8580_v1  ;;  %v361_v56 = vld [vmem:[%s12950_s1 + $0xa18] sm:$0xff]  ;;  %v8540_v1 = vcombine.low %v425_v36, %v429_v37  ;;  %v3732_v21 = vld [vmem:[%s12953_s3 + $0x580] sm:$0xff]  ;;  %v8654_v23 = vcombine.low %v3612_v41, %v3616_v46  ;;  %v8647_v2 = vcombine.high %v3604_v44, %v3608_v50 }
 0x1b3   :  { %v10929_v60 = vpack.c.bf16 %v3144_v53, %v3140_v39  ;;  %v3146_v0 = vadd.f32 %v3145_v22, %v3103_v54  ;;  %3427 = vmatpush2.bf16.msra.mxu1 %v8516_v48  ;;  %3455 = vmatprep.subr.bf16.mxu0 %v8573_v49  ;;  %v8541_v39 = vcombine.high %v425_v36, %v429_v37  ;;  %v3744_v48 = vld [vmem:[%s12953_s3 + $0x5e0] sm:$0xff]  ;;  %v9399_v53 = vmov 1065369472  }
 0x1b4   :  { %3428 = vmatprep.subr.bf16.mxu1 %v8509_v15  ;;  %v8477_v27 = vcombine.high %v361_v56, %v365_v14  ;;  %v8476_v62 = vcombine.low %v361_v56, %v365_v14  ;;  %v8783_v11 = vcombine.high %v3740_v47, %v3744_v48  ;;  %v3736_v15 = vld [vmem:[%s12953_s3 + $0x5a0] sm:$0xff]  ;;  %v8782_v51 = vcombine.low %v3740_v47, %v3744_v48 }
 0x1b5   :  { %v10937_v5 = vpack.c.bf16 %v3146_v0, %v3142_v59  ;;  %v8775_v22 = vcombine.high %v3732_v21, %v3736_v15  ;;  %v3724_v59 = vld [vmem:[%s12953_s3 + $0x540] sm:$0xff]  ;;  %vm3502_vm3 = vcmp.gt.bf16.partialorder %v10929_v60, 0 }
 0x1b6   :  { %3456 = vmatpush1.bf16.msra.mxu0 %v8572_v57  ;;  %v9349_v49 = vpop.eup %9348  ;;  %v3600_v57 = vld [vmem:[%s12953_s3 + $0x160] sm:$0xff] }
 0x1b7   :  { %v3511_v55 = vmin.bf16 %v9398_v31, %v10937_v5  ;;  %3429 = vmatpush2.bf16.msra.mxu1 %v8508_v29  ;;  %3457 = vmatprep.subr.bf16.mxu0 %v8565_v28  ;;  %v3541_v54 = vsub.bf16 %v9349_v49, %v9399_v53  ;;  %v3596_v29 = vld [vmem:[%s12953_s3 + $0x140] sm:$0xff]  ;;  %vm3503_vm1 = vcmp.gt.bf16.partialorder %v10937_v5, 0 }
 0x1b8   :  { %3430 = vmatprep.subr.bf16.mxu1 %v8501_v3  ;;  %v3728_v0 = vld [vmem:[%s12953_s3 + $0x560] sm:$0xff]  ;;  %v8639_v6 = vcombine.high %v3596_v29, %v3600_v57 }
 0x1b9   :  { %v3526_v25 = vmul.bf16 1069105081, %v3511_v55  ;;  %v11012_v3 = vsel %vm3501_vm0, %v10889_v13, %v3541_v54  ;;  %v3588_v13 = vld [vmem:[%s12953_s3 + $0x100] sm:$0xff] }
 0x1ba   :  { %3458 = vmatpush1.bf16.msra.mxu0 %v8564_v9  ;;  %v3592_v9 = vld [vmem:[%s12953_s3 + $0x120] sm:$0xff] }
 0x1bb   :  { %9350 = vpow.bf16 %v3526_v25  ;;  %3431 = vmatpush2.bf16.msra.mxu1 %v8500_v10  ;;  %3459 = vmatprep.subr.bf16.mxu0 %v8557_v18  ;;  %v3716_v55 = vld [vmem:[%s12953_s3 + $0x500] sm:$0xff]  ;;  %v8638_v10 = vcombine.low %v3596_v29, %v3600_v57  ;;  %v8766_v18 = vcombine.low %v3724_v59, %v3728_v0 }
 0x1bc   :  { %3432 = vmatprep.subr.bf16.mxu1 %v8493_v45  ;;  %v8631_v45 = vcombine.high %v3588_v13, %v3592_v9  ;;  %v3584_v25 = vld [vmem:[%s12953_s3 + $0xe0] sm:$0xff] }
 0x1bd   :  { %v3708_v26 = vld [vmem:[%s12953_s3 + $0x4c0] sm:$0xff] }
 0x1be   :  { %3460 = vmatpush1.bf16.msra.mxu0 %v8556_v32  ;;  %v3712_v30 = vld [vmem:[%s12953_s3 + $0x4e0] sm:$0xff]  ;;  %v8630_v32 = vcombine.low %v3588_v13, %v3592_v9 }
 0x1bf   :  { %3433 = vmatpush2.bf16.msra.mxu1 %v8492_v17  ;;  %3461 = vmatprep.subr.bf16.mxu0 %v8549_v33  ;;  %v8623_v33 = vcombine.high %v3580_v20, %v3584_v25  ;;  %v3572_v36 = vld [vmem:[%s12953_s3 + $0x80] sm:$0xff] }
 0x1c0   :  { %3434 = vmatprep.subr.bf16.mxu1 %v8485_v35  ;;  %v8751_v35 = vcombine.high %v3708_v26, %v3712_v30  ;;  %v3576_v37 = vld [vmem:[%s12953_s3 + $0xa0] sm:$0xff] }
 0x1c1   :  { %v3700_v56 = vld [vmem:[%s12953_s3 + $0x480] sm:$0xff] }
 0x1c2   :  { %3462 = vmatpush1.bf16.msra.mxu0 %v8548_v38  ;;  %v3704_v14 = vld [vmem:[%s12953_s3 + $0x4a0] sm:$0xff]  ;;  %v8622_v38 = vcombine.low %v3580_v20, %v3584_v25  ;;  %v3508_v25 = vmin.bf16 %v9398_v31, %v10583_v63 }
 0x1c3   :  { %3435 = vmatpush2.bf16.msra.mxu1 %v8484_v40  ;;  %3463 = vmatprep.subr.bf16.mxu0 %v8541_v39  ;;  %v8750_v40 = vcombine.low %v3708_v26, %v3712_v30  ;;  %v8615_v39 = vcombine.high %v3572_v36, %v3576_v37  ;;  %v3564_v41 = vld [vmem:[%s12953_s3 + $0x40] sm:$0xff]  ;;  %v8742_v49 = vcombine.low %v3700_v56, %v3704_v14 }
 0x1c4   :  { %3436 = vmatprep.subr.bf16.mxu1 %v8477_v27  ;;  %v8743_v27 = vcombine.high %v3700_v56, %v3704_v14  ;;  %v3568_v46 = vld [vmem:[%s12953_s3 + $0x60] sm:$0xff]  ;;  %v3517_v14 = vmul.bf16 1069105081, %v3508_v25 }
 0x1c5   :  { %v3692_v47 = vld [vmem:[%s12953_s3 + $0x440] sm:$0xff] }
 0x1c6   :  { %3464 = vmatpush1.bf16.msra.mxu0 %v8540_v1  ;;  %v3696_v48 = vld [vmem:[%s12953_s3 + $0x460] sm:$0xff]  ;;  %v8614_v1 = vcombine.low %v3572_v36, %v3576_v37  ;;  %9352 = vpow.bf16 %v3517_v14 }
 0x1c7   :  { %3437 = vmatpush2.bf16.msra.mxu1 %v8476_v62  ;;  %6670 = vmatprep.subr.bf16.mxu0 %v8655_v12  ;;  %v8607_v62 = vcombine.high %v3564_v41, %v3568_v46  ;;  %v8735_v12 = vcombine.high %v3692_v47, %v3696_v48  ;;  %v3560_v44 = vld [vmem:[%s12953_s3 + $0x20] sm:$0xff] }
 0x1c8   :  { %6713 = vmatprep.subr.bf16.mxu1 %v8783_v11  ;;  %v3556_v11 = vld [vmem:[%s12953_s3] sm:$0xff] }
 0x1c9   :  { %v9351_v28 = vpop.eup %9350  ;;  %3482 = vmatmul.mubr.bf16.vlgmr.msra.gmra.mxu0 %v10550_v42  ;;  %v8774_v42 = vcombine.low %v3732_v21, %v3736_v15  ;;  %v3684_v50 = vld [vmem:[%s12953_s3 + $0x400] sm:$0xff]  ;;  %v8606_v15 = vcombine.low %v3564_v41, %v3568_v46  ;;  %v8599_v54 = vcombine.high %v3556_v11, %v3560_v44 }
 0x1ca   :  { %3439 = vmatmul.mubr.bf16.vlgmr.msra.gmra.mxu1 %v10654_v16  ;;  %6671 = vmatpush1.bf16.msra.mxu0 %v8654_v23  ;;  %v3543_v24 = vsub.bf16 %v9351_v28, %v9399_v53  ;;  %v8767_v16 = vcombine.high %v3724_v59, %v3728_v0  ;;  %v3688_v21 = vld [vmem:[%s12953_s3 + $0x420] sm:$0xff]  ;;  %v8734_v23 = vcombine.low %v3692_v47, %v3696_v48 }
 0x1cb   :  { %6702 = vmatprep.mubr.bf16.mxu0 %v11012_v3  ;;  %6714 = vmatpush1.bf16.msra.mxu1 %v8782_v51  ;;  %v8727_v51 = vcombine.high %v3684_v50, %v3688_v21  ;;  %v3804_v29 = vld [vmem:[%s12953_s3 + $0x7c0] sm:$0xff]  ;;  %v8598_v28 = vcombine.low %v3556_v11, %v3560_v44  ;;  %v8726_v59 = vcombine.low %v3684_v50, %v3688_v21 }
 0x1cc   :  { %v11018_v8 = vsel %vm3503_vm1, %v10937_v5, %v3543_v24  ;;  %6672 = vmatprep.subr.bf16.mxu0 %v8647_v2  ;;  %6715 = vmatprep.subr.bf16.mxu1 %v8775_v22  ;;  %v3720_v5 = vld [vmem:[%s12953_s3 + $0x520] sm:$0xff] }
 0x1cd   :  { %6745 = vmatprep.mubr.bf16.mxu1 %v11018_v8  ;;  %v8759_v19 = vcombine.high %v3716_v55, %v3720_v5  ;;  %v8758_v17 = vcombine.low %v3716_v55, %v3720_v5  ;;  %v3676_v2 = vld [vmem:[%s12953_s3 + $0x3c0] sm:$0xff] }
 0x1ce   :  { %6673 = vmatpush1.bf16.msra.mxu0 %v8646_v4  ;;  %v3680_v22 = vld [vmem:[%s12953_s3 + $0x3e0] sm:$0xff] }
 0x1cf   :  { %6716 = vmatpush1.bf16.msra.mxu1 %v8774_v42  ;;  %6674 = vmatprep.subr.bf16.mxu0 %v8639_v6  ;;  %v3808_v57 = vld [vmem:[%s12953_s3 + $0x7e0] sm:$0xff]  ;;  %v8719_v0 = vcombine.high %v3676_v2, %v3680_v22  ;;  %v8718_v13 = vcombine.low %v3676_v2, %v3680_v22 }
 0x1d0   :  { %6717 = vmatprep.subr.bf16.mxu1 %v8767_v16  ;;  %v8847_v24 = vcombine.high %v3804_v29, %v3808_v57  ;;  %v3668_v4 = vld [vmem:[%s12953_s3 + $0x380] sm:$0xff]  ;;  %v8846_v9 = vcombine.low %v3804_v29, %v3808_v57 }
 0x1d1   :  { %v3672_v42 = vld [vmem:[%s12953_s3 + $0x3a0] sm:$0xff] }
 0x1d2   :  { %6675 = vmatpush1.bf16.msra.mxu0 %v8638_v10  ;;  %v3796_v6 = vld [vmem:[%s12953_s3 + $0x780] sm:$0xff]  ;;  %v8711_v55 = vcombine.high %v3668_v4, %v3672_v42  ;;  %v8710_v20 = vcombine.low %v3668_v4, %v3672_v42 }
 0x1d3   :  { %6718 = vmatpush1.bf16.msra.mxu1 %v8766_v18  ;;  %6676 = vmatprep.subr.bf16.mxu0 %v8631_v45  ;;  %v3800_v16 = vld [vmem:[%s12953_s3 + $0x7a0] sm:$0xff] }
 0x1d4   :  { %6719 = vmatprep.subr.bf16.mxu1 %v8759_v19  ;;  %v8839_v5 = vcombine.high %v3796_v6, %v3800_v16  ;;  %v3660_v10 = vld [vmem:[%s12953_s3 + $0x340] sm:$0xff]  ;;  %v8838_v26 = vcombine.low %v3796_v6, %v3800_v16 }
 0x1d5   :  { %v3664_v18 = vld [vmem:[%s12953_s3 + $0x360] sm:$0xff] }
 0x1d6   :  { %6677 = vmatpush1.bf16.msra.mxu0 %v8630_v32  ;;  %v3788_v45 = vld [vmem:[%s12953_s3 + $0x740] sm:$0xff]  ;;  %v8703_v30 = vcombine.high %v3660_v10, %v3664_v18  ;;  %v3510_v32 = vmin.bf16 %v9398_v31, %v10929_v60  ;;  %v8702_v56 = vcombine.low %v3660_v10, %v3664_v18 }
 0x1d7   :  { %6720 = vmatpush1.bf16.msra.mxu1 %v8758_v17  ;;  %6678 = vmatprep.subr.bf16.mxu0 %v8623_v33  ;;  %v3792_v19 = vld [vmem:[%s12953_s3 + $0x760] sm:$0xff] }
 0x1d8   :  { %6721 = vmatprep.subr.bf16.mxu1 %v8751_v35  ;;  %v8831_v17 = vcombine.high %v3788_v45, %v3792_v19  ;;  %v3652_v33 = vld [vmem:[%s12953_s3 + $0x300] sm:$0xff] }
 0x1d9   :  { %v3656_v35 = vld [vmem:[%s12953_s3 + $0x320] sm:$0xff] }
 0x1da   :  { %6679 = vmatpush1.bf16.msra.mxu0 %v8622_v38  ;;  %v3780_v36 = vld [vmem:[%s12953_s3 + $0x700] sm:$0xff]  ;;  %v8830_v38 = vcombine.low %v3788_v45, %v3792_v19  ;;  %v9353_v45 = vpop.eup %9352 }
 0x1db   :  { %6722 = vmatpush1.bf16.msra.mxu1 %v8750_v40  ;;  %6680 = vmatprep.subr.bf16.mxu0 %v8615_v39  ;;  %v3784_v37 = vld [vmem:[%s12953_s3 + $0x720] sm:$0xff]  ;;  %v8695_v40 = vcombine.high %v3652_v33, %v3656_v35  ;;  %v3523_v39 = vmul.bf16 1069105081, %v3510_v32 }
 0x1dc   :  { %6723 = vmatprep.subr.bf16.mxu1 %v8743_v27  ;;  %v8823_v27 = vcombine.high %v3780_v36, %v3784_v37  ;;  %v3644_v41 = vld [vmem:[%s12953_s3 + $0x2c0] sm:$0xff] }
 0x1dd   :  { %v3648_v46 = vld [vmem:[%s12953_s3 + $0x2e0] sm:$0xff]  ;;  %9354 = vpow.bf16 %v3523_v39 }
 0x1de   :  { %6681 = vmatpush1.bf16.msra.mxu0 %v8614_v1  ;;  %v3772_v47 = vld [vmem:[%s12953_s3 + $0x6c0] sm:$0xff]  ;;  %v8694_v1 = vcombine.low %v3652_v33, %v3656_v35 }
 0x1df   :  { %6724 = vmatpush1.bf16.msra.mxu1 %v8742_v49  ;;  %6682 = vmatprep.subr.bf16.mxu0 %v8607_v62  ;;  %v3776_v48 = vld [vmem:[%s12953_s3 + $0x6e0] sm:$0xff]  ;;  %v8822_v49 = vcombine.low %v3780_v36, %v3784_v37  ;;  %v8687_v62 = vcombine.high %v3644_v41, %v3648_v46 }
 0x1e0   :  { %6725 = vmatprep.subr.bf16.mxu1 %v8735_v12  ;;  %v8815_v12 = vcombine.high %v3772_v47, %v3776_v48  ;;  %v3636_v11 = vld [vmem:[%s12953_s3 + $0x280] sm:$0xff] }
 0x1e1   :  { %v3640_v44 = vld [vmem:[%s12953_s3 + $0x2a0] sm:$0xff] }
 0x1e2   :  { %6683 = vmatpush1.bf16.msra.mxu0 %v8606_v15  ;;  %v3764_v50 = vld [vmem:[%s12953_s3 + $0x680] sm:$0xff]  ;;  %v8686_v15 = vcombine.low %v3644_v41, %v3648_v46 }
 0x1e3   :  { %6726 = vmatpush1.bf16.msra.mxu1 %v8734_v23  ;;  %6684 = vmatprep.subr.bf16.mxu0 %v8599_v54  ;;  %v3768_v21 = vld [vmem:[%s12953_s3 + $0x6a0] sm:$0xff]  ;;  %v8814_v23 = vcombine.low %v3772_v47, %v3776_v48  ;;  %v8679_v54 = vcombine.high %v3636_v11, %v3640_v44 }
 0x1e4   :  { %6727 = vmatprep.subr.bf16.mxu1 %v8727_v51  ;;  %v8807_v51 = vcombine.high %v3764_v50, %v3768_v21  ;;  %v3628_v2 = vld [vmem:[%s12953_s3 + $0x240] sm:$0xff] }
 0x1e5   :  { %v3632_v22 = vld [vmem:[%s12953_s3 + $0x260] sm:$0xff] }
 0x1e6   :  { %6685 = vmatpush1.bf16.msra.mxu0 %v8598_v28  ;;  %v3756_v29 = vld [vmem:[%s12953_s3 + $0x640] sm:$0xff]  ;;  %v8678_v28 = vcombine.low %v3636_v11, %v3640_v44 }
 0x1e7   :  { %6728 = vmatpush1.bf16.msra.mxu1 %v8726_v59  ;;  %6686 = vmatprep.subr.bf16.mxu0 %v8719_v0  ;;  %v3760_v57 = vld [vmem:[%s12953_s3 + $0x660] sm:$0xff]  ;;  %v8806_v59 = vcombine.low %v3764_v50, %v3768_v21  ;;  %v8671_v0 = vcombine.high %v3628_v2, %v3632_v22 }
 0x1e8   :  { %6729 = vmatprep.subr.bf16.mxu1 %v8847_v24  ;;  %v8799_v24 = vcombine.high %v3756_v29, %v3760_v57  ;;  %v3620_v4 = vld [vmem:[%s12953_s3 + $0x200] sm:$0xff] }
 0x1e9   :  { %v3624_v42 = vld [vmem:[%s12953_s3 + $0x220] sm:$0xff] }
 0x1ea   :  { %6687 = vmatpush2.bf16.msra.mxu0 %v8718_v13  ;;  %v3748_v6 = vld [vmem:[%s12953_s3 + $0x600] sm:$0xff]  ;;  %v8670_v13 = vcombine.low %v3628_v2, %v3632_v22 }
 0x1eb   :  { %6730 = vmatpush2.bf16.msra.mxu1 %v8846_v9  ;;  %6688 = vmatprep.subr.bf16.mxu0 %v8711_v55  ;;  %v3752_v16 = vld [vmem:[%s12953_s3 + $0x620] sm:$0xff]  ;;  %v8798_v9 = vcombine.low %v3756_v29, %v3760_v57  ;;  %v8663_v55 = vcombine.high %v3620_v4, %v3624_v42  ;;  %v9355_v25 = vpop.eup %9354 }
 0x1ec   :  { %6731 = vmatprep.subr.bf16.mxu1 %v8839_v5  ;;  %v8791_v5 = vcombine.high %v3748_v6, %v3752_v16  ;;  %v3868_v10 = vld [vmem:[%s12953_s3 + $0x9c0] sm:$0xff]  ;;  %v3542_v37 = vsub.bf16 %v9355_v25, %v9399_v53 }
 0x1ed   :  { %v3872_v18 = vld [vmem:[%s12953_s3 + $0x9e0] sm:$0xff] }
 0x1ee   :  { %6689 = vmatpush2.bf16.msra.mxu0 %v8710_v20  ;;  %v3996_v19 = vld [vmem:[%s12953_s3 + $0xdc0] sm:$0xff]  ;;  %v8911_v32 = vcombine.high %v3868_v10, %v3872_v18  ;;  %v11220_v48 = vsel %vm3502_vm3, %v10929_v60, %v3542_v37 }
 0x1ef   :  { %6732 = vmatpush2.bf16.msra.mxu1 %v8838_v26  ;;  %6690 = vmatprep.subr.bf16.mxu0 %v8703_v30  ;;  %v4000_v20 = vld [vmem:[%s12953_s3 + $0xde0] sm:$0xff]  ;;  %v8662_v26 = vcombine.low %v3620_v4, %v3624_v42  ;;  %v8790_v30 = vcombine.low %v3748_v6, %v3752_v16 }
 0x1f0   :  { %6733 = vmatprep.subr.bf16.mxu1 %v8831_v17  ;;  %v3540_v17 = vsub.bf16 %v9353_v45, %v9399_v53  ;;  %v3860_v33 = vld [vmem:[%s12953_s3 + $0x980] sm:$0xff]  ;;  %v9039_v36 = vcombine.high %v3996_v19, %v4000_v20  ;;  %v9038_v39 = vcombine.low %v3996_v19, %v4000_v20 }
 0x1f1   :  { %v3864_v35 = vld [vmem:[%s12953_s3 + $0x9a0] sm:$0xff] }
 0x1f2   :  { %6691 = vmatpush2.bf16.msra.mxu0 %v8702_v56  ;;  %v3988_v56 = vld [vmem:[%s12953_s3 + $0xd80] sm:$0xff] }
 0x1f3   :  { %6734 = vmatpush2.bf16.msra.mxu1 %v8830_v38  ;;  %6692 = vmatprep.subr.bf16.mxu0 %v8695_v40  ;;  %v3992_v14 = vld [vmem:[%s12953_s3 + $0xda0] sm:$0xff]  ;;  %v8910_v38 = vcombine.low %v3868_v10, %v3872_v18  ;;  %v8903_v40 = vcombine.high %v3860_v33, %v3864_v35 }
 0x1f4   :  { %6735 = vmatprep.subr.bf16.mxu1 %v8823_v27  ;;  %v11209_v27 = vsel %vm3500_vm2, %v10583_v63, %v3540_v17  ;;  %v3852_v41 = vld [vmem:[%s12953_s3 + $0x940] sm:$0xff]  ;;  %v9031_v47 = vcombine.high %v3988_v56, %v3992_v14 }
 0x1f5   :  { %v3856_v46 = vld [vmem:[%s12953_s3 + $0x960] sm:$0xff] }
 0x1f6   :  { %6693 = vmatpush2.bf16.msra.mxu0 %v8694_v1  ;;  %v3980_v63 = vld [vmem:[%s12953_s3 + $0xd40] sm:$0xff] }
 0x1f7   :  { %6736 = vmatpush2.bf16.msra.mxu1 %v8822_v49  ;;  %6694 = vmatprep.subr.bf16.mxu0 %v8687_v62  ;;  %v3984_v1 = vld [vmem:[%s12953_s3 + $0xd60] sm:$0xff]  ;;  %v8902_v49 = vcombine.low %v3860_v33, %v3864_v35  ;;  %v8895_v62 = vcombine.high %v3852_v41, %v3856_v46 }
 0x1f8   :  { %6737 = vmatprep.subr.bf16.mxu1 %v8815_v12  ;;  %v9030_v12 = vcombine.low %v3988_v56, %v3992_v14  ;;  %v3844_v60 = vld [vmem:[%s12953_s3 + $0x900] sm:$0xff]  ;;  %v9023_v44 = vcombine.high %v3980_v63, %v3984_v1  ;;  %v506_v14 = vsub.s32 4, %v10276_v34 }
 0x1f9   :  { %v3848_v11 = vld [vmem:[%s12953_s3 + $0x920] sm:$0xff] }
 0x1fa   :  { %6695 = vmatpush2.bf16.msra.mxu0 %v8686_v15  ;;  %v3972_v50 = vld [vmem:[%s12953_s3 + $0xd00] sm:$0xff]  ;;  %v8894_v15 = vcombine.low %v3852_v41, %v3856_v46 }
 0x1fb   :  { %6738 = vmatpush2.bf16.msra.mxu1 %v8814_v23  ;;  %6696 = vmatprep.subr.bf16.mxu0 %v8679_v54  ;;  %v3976_v21 = vld [vmem:[%s12953_s3 + $0xd20] sm:$0xff]  ;;  %v8887_v23 = vcombine.high %v3844_v60, %v3848_v11  ;;  %v9022_v54 = vcombine.low %v3980_v63, %v3984_v1 }
 0x1fc   :  { %6739 = vmatprep.subr.bf16.mxu1 %v8807_v51  ;;  %v3836_v51 = vld [vmem:[%s12953_s3 + $0x8c0] sm:$0xff]  ;;  %v9015_v22 = vcombine.high %v3972_v50, %v3976_v21 }
 0x1fd   :  { %v3840_v2 = vld [vmem:[%s12953_s3 + $0x8e0] sm:$0xff] }
 0x1fe   :  { %6697 = vmatpush2.bf16.msra.mxu0 %v8678_v28  ;;  %v3964_v29 = vld [vmem:[%s12953_s3 + $0xcc0] sm:$0xff]  ;;  %v8886_v28 = vcombine.low %v3844_v60, %v3848_v11  ;;  %v507_v60 = vrot.slane %v10877_v61, %v506_v14 }
 0x1ff   :  { %6740 = vmatpush2.bf16.msra.mxu1 %v8806_v59  ;;  %6698 = vmatprep.subr.bf16.mxu0 %v8671_v0  ;;  %v3968_v57 = vld [vmem:[%s12953_s3 + $0xce0] sm:$0xff]  ;;  %v8879_v59 = vcombine.high %v3836_v51, %v3840_v2  ;;  %v9014_v0 = vcombine.low %v3972_v50, %v3976_v21 }
 0x200   :  { %6741 = vmatprep.subr.bf16.mxu1 %v8799_v24  ;;  %v3828_v24 = vld [vmem:[%s12953_s3 + $0x880] sm:$0xff]  ;;  %v9007_v42 = vcombine.high %v3964_v29, %v3968_v57 }
 0x201   :  { %v3832_v4 = vld [vmem:[%s12953_s3 + $0x8a0] sm:$0xff] }
 0x202   :  { %6699 = vmatpush2.bf16.msra.mxu0 %v8670_v13  ;;  %v3956_v6 = vld [vmem:[%s12953_s3 + $0xc80] sm:$0xff]  ;;  %v8878_v13 = vcombine.low %v3836_v51, %v3840_v2  ;;  %v8870_v25 = vcombine.low %v3828_v24, %v3832_v4 }
 0x203   :  { %6742 = vmatpush2.bf16.msra.mxu1 %v8798_v9  ;;  %6700 = vmatprep.subr.bf16.mxu0 %v8663_v55  ;;  %v3960_v16 = vld [vmem:[%s12953_s3 + $0xca0] sm:$0xff]  ;;  %v11265_v9 = vpop.f32.mrf.mxu1  ;;  %v8871_v55 = vcombine.high %v3828_v24, %v3832_v4 }
 0x204   :  { %6743 = vmatprep.subr.bf16.mxu1 %v8791_v5  ;;  %v9006_v5 = vcombine.low %v3964_v29, %v3968_v57  ;;  %v3820_v10 = vld [vmem:[%s12953_s3 + $0x840] sm:$0xff]  ;;  %v8999_v45 = vcombine.high %v3956_v6, %v3960_v16  ;;  %v8998_v17 = vcombine.low %v3956_v6, %v3960_v16 }
 0x205   :  { %v3824_v18 = vld [vmem:[%s12953_s3 + $0x860] sm:$0xff] }
 0x206   :  { %6701 = vmatpush2.bf16.msra.mxu0 %v8662_v26  ;;  %v3948_v19 = vld [vmem:[%s12953_s3 + $0xc40] sm:$0xff]  ;;  %v3182_v26 = vpop.f32.mrf.mxu0 }
 0x207   :  { %6744 = vmatpush2.bf16.msra.mxu1 %v8790_v30  ;;  %6756 = vmatprep.subr.bf16.mxu0 %v8911_v32  ;;  %v3952_v20 = vld [vmem:[%s12953_s3 + $0xc60] sm:$0xff]  ;;  %v11279_v30 = vpop.f32.mrf.mxu1  ;;  %v8863_v32 = vcombine.high %v3820_v10, %v3824_v18  ;;  %v3183_v57 = vadd.f32 %v3182_v26, %v507_v60  ;;  %v11346_v26 = vld [vmem:[%s12953_s3 + $0x5e8] sm:$0xff] }
 0x208   :  { %6799 = vmatprep.subr.bf16.mxu1 %v9039_v36  ;;  %v3812_v33 = vld [vmem:[%s12953_s3 + $0x800] sm:$0xff]  ;;  %v8991_v36 = vcombine.high %v3948_v19, %v3952_v20 }
 0x209   :  { %6703 = vmatmul.mubr.bf16.vlgmr.msra.gmra.mxu0 %v11209_v27  ;;  %v3816_v35 = vld [vmem:[%s12953_s3 + $0x820] sm:$0xff]  ;;  %v3229_v41 = vpop.f32.mrf.mxu1 }
 0x20a   :  { %6746 = vmatmul.mubr.bf16.vlgmr.msra.gmra.mxu1 %v11220_v48  ;;  %6757 = vmatpush1.bf16.msra.mxu0 %v8910_v38  ;;  %v3940_v37 = vld [vmem:[%s12953_s3 + $0xc00] sm:$0xff]  ;;  %v8862_v38 = vcombine.low %v3820_v10, %v3824_v18  ;;  %v8855_v46 = vcombine.high %v3812_v33, %v3816_v35  ;;  %v8854_v11 = vcombine.low %v3812_v33, %v3816_v35 }
 0x20b   :  { %6758 = vmatprep.subr.bf16.mxu0 %v8903_v40  ;;  %6800 = vmatpush1.bf16.msra.mxu1 %v9038_v39  ;;  %v3944_v56 = vld [vmem:[%s12953_s3 + $0xc20] sm:$0xff]  ;;  %v510_v40 = vsub.s32 5, %v10276_v34  ;;  %v3184_v39 = vpop.f32.mrf.mxu0  ;;  %v3231_v21 = vpop.f32.mrf.mxu1 }
 0x20c   :  { %6801 = vmatprep.subr.bf16.mxu1 %v9031_v47  ;;  %v8990_v47 = vcombine.low %v3948_v19, %v3952_v20  ;;  %v3932_v63 = vld [vmem:[%s12953_s3 + $0xbc0] sm:$0xff] }
 0x20d   :  { %v3936_v1 = vld [vmem:[%s12953_s3 + $0xbe0] sm:$0xff]  ;;  %v3186_v50 = vpop.f32.mrf.mxu0 }
 0x20e   :  { %6759 = vmatpush1.bf16.msra.mxu0 %v8902_v49  ;;  %v8983_v49 = vcombine.high %v3940_v37, %v3944_v56  ;;  %v3928_v51 = vld [vmem:[%s12953_s3 + $0xba0] sm:$0xff] }
 0x20f   :  { %6760 = vmatprep.subr.bf16.mxu0 %v8895_v62  ;;  %6802 = vmatpush1.bf16.msra.mxu1 %v9030_v12  ;;  %v4060_v62 = vld [vmem:[%s12953_s3 + $0xfc0] sm:$0xff] }
 0x210   :  { %6803 = vmatprep.subr.bf16.mxu1 %v9023_v44  ;;  %v4064_v12 = vld [vmem:[%s12953_s3 + $0xfe0] sm:$0xff]  ;;  %v511_v44 = vrot.slane %v10877_v61, %v510_v40 }
 0x211   :  { %v9103_v2 = vcombine.high %v4060_v62, %v4064_v12  ;;  %v4052_v61 = vld [vmem:[%s12953_s3 + $0xf80] sm:$0xff]  ;;  %v9102_v4 = vcombine.low %v4060_v62, %v4064_v12 }
 0x212   :  { %6761 = vmatpush1.bf16.msra.mxu0 %v8894_v15  ;;  %v8975_v15 = vcombine.high %v3932_v63, %v3936_v1  ;;  %v4056_v29 = vld [vmem:[%s12953_s3 + $0xfa0] sm:$0xff] }
 0x213   :  { %6762 = vmatprep.subr.bf16.mxu0 %v8887_v23  ;;  %6804 = vmatpush1.bf16.msra.mxu1 %v9022_v54  ;;  %v8982_v23 = vcombine.low %v3940_v37, %v3944_v56  ;;  %v3924_v54 = vld [vmem:[%s12953_s3 + $0xb80] sm:$0xff] }
 0x214   :  { %6805 = vmatprep.subr.bf16.mxu1 %v9015_v22  ;;  %v3311_v22 = vpop.f32.mrf.mxu1  ;;  %v8967_v24 = vcombine.high %v3924_v54, %v3928_v51  ;;  %v3916_v6 = vld [vmem:[%s12953_s3 + $0xb40] sm:$0xff]  ;;  %v8966_v20 = vcombine.low %v3924_v54, %v3928_v51 }
 0x215   :  { %v3920_v16 = vld [vmem:[%s12953_s3 + $0xb60] sm:$0xff] }
 0x216   :  { %6763 = vmatpush1.bf16.msra.mxu0 %v8886_v28  ;;  %v8974_v28 = vcombine.low %v3932_v63, %v3936_v1  ;;  %v4044_v10 = vld [vmem:[%s12953_s3 + $0xf40] sm:$0xff]  ;;  %v8959_v33 = vcombine.high %v3916_v6, %v3920_v16  ;;  %v8958_v62 = vcombine.low %v3916_v6, %v3920_v16 }
 0x217   :  { %6764 = vmatprep.subr.bf16.mxu0 %v8879_v59  ;;  %6806 = vmatpush1.bf16.msra.mxu1 %v9014_v0  ;;  %v3185_v59 = vadd.f32 %v3184_v39, %v511_v44  ;;  %v3188_v0 = vpop.f32.mrf.mxu0  ;;  %v4048_v18 = vld [vmem:[%s12953_s3 + $0xf60] sm:$0xff] }
 0x218   :  { %6807 = vmatprep.subr.bf16.mxu1 %v9007_v42  ;;  %v3187_v42 = vadd.f32 %v3186_v50, %v507_v60  ;;  %v3189_v19 = vadd.f32 %v3188_v0, %v511_v44  ;;  %v3908_v37 = vld [vmem:[%s12953_s3 + $0xb00] sm:$0xff] }
 0x219   :  { %v3912_v56 = vld [vmem:[%s12953_s3 + $0xb20] sm:$0xff] }
 0x21a   :  { %6765 = vmatpush1.bf16.msra.mxu0 %v8878_v13  ;;  %v9095_v13 = vcombine.high %v4052_v61, %v4056_v29  ;;  %v3230_v35 = vadd.f32 %v3229_v41, %v3187_v42  ;;  %v4036_v41 = vld [vmem:[%s12953_s3 + $0xf00] sm:$0xff]  ;;  %v3232_v63 = vadd.f32 %v3231_v21, %v3189_v19  ;;  %v8951_v60 = vcombine.high %v3908_v37, %v3912_v56 }
 0x21b   :  { %6766 = vmatprep.subr.bf16.mxu0 %v8871_v55  ;;  %6808 = vmatpush1.bf16.msra.mxu1 %v9006_v5  ;;  %v3313_v55 = vpop.f32.mrf.mxu1  ;;  %v3904_v21 = vld [vmem:[%s12953_s3 + $0xae0] sm:$0xff] }
 0x21c   :  { %6809 = vmatprep.subr.bf16.mxu1 %v8999_v45  ;;  %v3226_v45 = vadd.f32 %v11265_v9, %v3183_v57  ;;  %v9094_v9 = vcombine.low %v4052_v61, %v4056_v29  ;;  %v3892_v42 = vld [vmem:[%s12953_s3 + $0xa80] sm:$0xff] }
 0x21d   :  { %v3315_v39 = vpop.f32.mrf.mxu1  ;;  %v3896_v6 = vld [vmem:[%s12953_s3 + $0xaa0] sm:$0xff] }
 0x21e   :  { %6767 = vmatpush1.bf16.msra.mxu0 %v8870_v25  ;;  %v11341_v25 = vld [vmem:[%s12953_s3 + $0x5c8] sm:$0xff] }
 0x21f   :  { %6768 = vmatprep.subr.bf16.mxu0 %v8863_v32  ;;  %6810 = vmatpush1.bf16.msra.mxu1 %v8998_v17  ;;  %v3228_v32 = vadd.f32 %v11279_v30, %v3185_v59  ;;  %v8784_v30 = vcombine.low %v11341_v25, %v11346_v26  ;;  %v3317_v51 = vpop.f32.mrf.mxu1 }
 0x220   :  { %6811 = vmatprep.subr.bf16.mxu1 %v8991_v36 }
 0x222   :  { %6769 = vmatpush1.bf16.msra.mxu0 %v8862_v38  ;;  %v9087_v38 = vcombine.high %v4044_v10, %v4048_v18 }
 0x223   :  { %6770 = vmatprep.subr.bf16.mxu0 %v8855_v46  ;;  %6812 = vmatpush1.bf16.msra.mxu1 %v8990_v47  ;;  %v4040_v47 = vld [vmem:[%s12953_s3 + $0xf20] sm:$0xff] }
 0x224   :  { %6813 = vmatprep.subr.bf16.mxu1 %v8983_v49  ;;  %v9079_v54 = vcombine.high %v4036_v41, %v4040_v47  ;;  %v9078_v0 = vcombine.low %v4036_v41, %v4040_v47  ;;  %v4004_v41 = vld [vmem:[%s12953_s3 + $0xe00] sm:$0xff] }
 0x225   :  { %v4008_v47 = vld [vmem:[%s12953_s3 + $0xe20] sm:$0xff] }
 0x226   :  { %6771 = vmatpush1.bf16.msra.mxu0 %v8854_v11  ;;  %v9086_v11 = vcombine.low %v4044_v10, %v4048_v18 }
 0x227   :  { %6772 = vmatprep.subr.bf16.mxu0 %v8975_v15  ;;  %6814 = vmatpush1.bf16.msra.mxu1 %v8982_v23  ;;  %v3900_v23 = vld [vmem:[%s12953_s3 + $0xac0] sm:$0xff] }
 0x228   :  { %6815 = vmatprep.subr.bf16.mxu1 %v9103_v2  ;;  %v4028_v2 = vld [vmem:[%s12953_s3 + $0xec0] sm:$0xff]  ;;  %v8943_v59 = vcombine.high %v3900_v23, %v3904_v21  ;;  %v8942_v18 = vcombine.low %v3900_v23, %v3904_v21 }
 0x229   :  { %v3268_v5 = vpop.f32.mrf.mxu0 }
 0x22a   :  { %6773 = vmatpush2.bf16.msra.mxu0 %v8974_v28  ;;  %v3269_v36 = vadd.f32 %v3268_v5, %v3226_v45  ;;  %v8950_v28 = vcombine.low %v3908_v37, %v3912_v56  ;;  %v8935_v45 = vcombine.high %v3892_v42, %v3896_v6 }
 0x22b   :  { %v3270_v17 = vpop.f32.mrf.mxu0  ;;  %6774 = vmatprep.subr.bf16.mxu0 %v8967_v24  ;;  %6816 = vmatpush2.bf16.msra.mxu1 %v9102_v4 }
 0x22c   :  { %6817 = vmatprep.subr.bf16.mxu1 %v9095_v13  ;;  %v3271_v1 = vadd.f32 %v3270_v17, %v3228_v32  ;;  %v3312_v44 = vadd.f32 %v3311_v22, %v3269_v36  ;;  %v4032_v22 = vld [vmem:[%s12953_s3 + $0xee0] sm:$0xff]  ;;  %v8934_v36 = vcombine.low %v3892_v42, %v3896_v6  ;;  %v3593_v6 = vld [vmem:[%s12953_s3 + $0x128] sm:$0xff] }
 0x22d   :  { %v3272_v46 = vpop.f32.mrf.mxu0  ;;  %v9071_v16 = vcombine.high %v4028_v2, %v4032_v22  ;;  %v4020_v13 = vld [vmem:[%s12953_s3 + $0xe80] sm:$0xff]  ;;  %v9070_v19 = vcombine.low %v4028_v2, %v4032_v22  ;;  %v3609_v2 = vld [vmem:[%s12953_s3 + $0x1a8] sm:$0xff] }
 0x22e   :  { %v3273_v49 = vadd.f32 %v3272_v46, %v3230_v35  ;;  %6775 = vmatpush2.bf16.msra.mxu0 %v8966_v20  ;;  %v3314_v61 = vadd.f32 %v3313_v55, %v3271_v1  ;;  %v4024_v55 = vld [vmem:[%s12953_s3 + $0xea0] sm:$0xff] }
 0x22f   :  { %v3274_v12 = vpop.f32.mrf.mxu0  ;;  %6776 = vmatprep.subr.bf16.mxu0 %v8959_v33  ;;  %6818 = vmatpush2.bf16.msra.mxu1 %v9094_v9  ;;  %v3884_v32 = vld [vmem:[%s12953_s3 + $0xa40] sm:$0xff]  ;;  %v9063_v33 = vcombine.high %v4020_v13, %v4024_v55  ;;  %v9062_v56 = vcombine.low %v4020_v13, %v4024_v55  ;;  %v3581_v55 = vld [vmem:[%s12953_s3 + $0xc8] sm:$0xff] }
 0x230   :  { %v3316_v50 = vadd.f32 %v3315_v39, %v3273_v49  ;;  %v3275_v15 = vadd.f32 %v3274_v12, %v3232_v63  ;;  %6819 = vmatprep.subr.bf16.mxu1 %v9087_v38  ;;  %v3888_v17 = vld [vmem:[%s12953_s3 + $0xa60] sm:$0xff]  ;;  %v3617_v12 = vld [vmem:[%s12953_s3 + $0x1e8] sm:$0xff] }
 0x231   :  { %v4012_v9 = vld [vmem:[%s12953_s3 + $0xe40] sm:$0xff]  ;;  %v8927_v37 = vcombine.high %v3884_v32, %v3888_v17  ;;  %v8926_v63 = vcombine.low %v3884_v32, %v3888_v17  ;;  %v3565_v17 = vld [vmem:[%s12953_s3 + $0x48] sm:$0xff] }
 0x232   :  { %v11375_v29 = vpack.c.bf16 %v3316_v50, %v3312_v44  ;;  %v3318_v57 = vadd.f32 %v3317_v51, %v3275_v15  ;;  %6777 = vmatpush2.bf16.msra.mxu0 %v8958_v62  ;;  %v4016_v35 = vld [vmem:[%s12953_s3 + $0xe60] sm:$0xff]  ;;  %v3613_v62 = vld [vmem:[%s12953_s3 + $0x1c8] sm:$0xff]  ;;  %v9046_v50 = vcombine.low %v4004_v41, %v4008_v47  ;;  %v8785_v15 = vcombine.high %v11341_v25, %v11346_v26 }
 0x233   :  { %6778 = vmatprep.subr.bf16.mxu0 %v8951_v60  ;;  %6820 = vmatpush2.bf16.msra.mxu1 %v9086_v11  ;;  %v3876_v38 = vld [vmem:[%s12953_s3 + $0xa00] sm:$0xff]  ;;  %v9055_v46 = vcombine.high %v4012_v9, %v4016_v35  ;;  %v9054_v49 = vcombine.low %v4012_v9, %v4016_v35  ;;  %v9047_v60 = vcombine.high %v4004_v41, %v4008_v47  ;;  %v3605_v51 = vld [vmem:[%s12953_s3 + $0x188] sm:$0xff] }
 0x234   :  { %v3512_v24 = vmin.bf16 %v9398_v31, %v11375_v29  ;;  %v11379_v4 = vpack.c.bf16 %v3318_v57, %v3314_v61  ;;  %6821 = vmatprep.subr.bf16.mxu1 %v9079_v54  ;;  %v3880_v39 = vld [vmem:[%s12953_s3 + $0xa20] sm:$0xff]  ;;  %v8657_v44 = vcombine.high %v3613_v62, %v3617_v12  ;;  %v8656_v61 = vcombine.low %v3613_v62, %v3617_v12  ;;  %v3661_v12 = vld [vmem:[%s12953_s3 + $0x348] sm:$0xff] }
 0x235   :  { %v8919_v1 = vcombine.high %v3876_v38, %v3880_v39  ;;  %v8918_v11 = vcombine.low %v3876_v38, %v3880_v39  ;;  %vm3504_vm5 = vcmp.gt.bf16.partialorder %v11375_v29, 0  ;;  %v3677_v39 = vld [vmem:[%s12953_s3 + $0x3c8] sm:$0xff] }
 0x236   :  { %v3529_v5 = vmul.bf16 1069105081, %v3512_v24  ;;  %v3513_v10 = vmin.bf16 %v9398_v31, %v11379_v4  ;;  %6779 = vmatpush2.bf16.msra.mxu0 %v8950_v28  ;;  %vm3505_vm4 = vcmp.gt.bf16.partialorder %v11379_v4, 0  ;;  %v8649_v28 = vcombine.high %v3605_v51, %v3609_v2  ;;  %v3601_v24 = vld [vmem:[%s12953_s3 + $0x168] sm:$0xff] }
 0x237   :  { %6780 = vmatprep.subr.bf16.mxu0 %v8943_v59  ;;  %6822 = vmatpush2.bf16.msra.mxu1 %v9078_v0  ;;  %v3597_v0 = vld [vmem:[%s12953_s3 + $0x148] sm:$0xff] }
 0x238   :  { %9356 = vpow.bf16 %v3529_v5  ;;  %v3532_v20 = vmul.bf16 1069105081, %v3513_v10  ;;  %6823 = vmatprep.subr.bf16.mxu1 %v9071_v16  ;;  %v8641_v42 = vcombine.high %v3597_v0, %v3601_v24  ;;  %v8640_v16 = vcombine.low %v3597_v0, %v3601_v24  ;;  %v3585_v5 = vld [vmem:[%s12953_s3 + $0xe8] sm:$0xff] }
 0x239   :  { %v3717_v25 = vld [vmem:[%s12953_s3 + $0x508] sm:$0xff] }
 0x23a   :  { %9358 = vpow.bf16 %v3532_v20  ;;  %6781 = vmatpush2.bf16.msra.mxu0 %v8942_v18  ;;  %v8625_v18 = vcombine.high %v3581_v55, %v3585_v5  ;;  %v8624_v20 = vcombine.low %v3581_v55, %v3585_v5  ;;  %v3721_v26 = vld [vmem:[%s12953_s3 + $0x528] sm:$0xff] }
 0x23b   :  { %6782 = vmatprep.subr.bf16.mxu0 %v8935_v45  ;;  %6824 = vmatpush2.bf16.msra.mxu1 %v9070_v19  ;;  %v3573_v45 = vld [vmem:[%s12953_s3 + $0x88] sm:$0xff] }
 0x23c   :  { %6825 = vmatprep.subr.bf16.mxu1 %v9063_v33  ;;  %v3577_v19 = vld [vmem:[%s12953_s3 + $0xa8] sm:$0xff] }
 0x23d   :  { %v8617_v32 = vcombine.high %v3573_v45, %v3577_v19  ;;  %v3569_v33 = vld [vmem:[%s12953_s3 + $0x68] sm:$0xff]  ;;  %v8616_v9 = vcombine.low %v3573_v45, %v3577_v19  ;;  %v514_v45 = vsub.s32 6, %v10276_v34 }
 0x23e   :  { %6783 = vmatpush2.bf16.msra.mxu0 %v8934_v36  ;;  %v8609_v35 = vcombine.high %v3565_v17, %v3569_v33  ;;  %v3557_v36 = vld [vmem:[%s12953_s3 + $0x8] sm:$0xff] }
 0x23f   :  { %6784 = vmatprep.subr.bf16.mxu0 %v8927_v37  ;;  %6826 = vmatpush2.bf16.msra.mxu1 %v9062_v56  ;;  %v3561_v37 = vld [vmem:[%s12953_s3 + $0x28] sm:$0xff]  ;;  %v8608_v56 = vcombine.low %v3565_v17, %v3569_v33 }
 0x240   :  { %6827 = vmatprep.subr.bf16.mxu1 %v9055_v46  ;;  %v8601_v38 = vcombine.high %v3557_v36, %v3561_v37  ;;  %v3681_v46 = vld [vmem:[%s12953_s3 + $0x3e8] sm:$0xff]  ;;  %v8600_v41 = vcombine.low %v3557_v36, %v3561_v37  ;;  %v9396_v36 = vld [vmem:[%s12952_s2] sm:$0xff] }
 0x241   :  { %v8721_v47 = vcombine.high %v3677_v39, %v3681_v46  ;;  %v515_v37 = vrot.slane %v9396_v36, %v514_v45 }
 0x242   :  { %6785 = vmatpush2.bf16.msra.mxu0 %v8926_v63  ;;  %v3669_v63 = vld [vmem:[%s12953_s3 + $0x388] sm:$0xff] }
 0x243   :  { %6786 = vmatprep.subr.bf16.mxu0 %v8919_v1  ;;  %6828 = vmatpush2.bf16.msra.mxu1 %v9054_v49  ;;  %v3673_v1 = vld [vmem:[%s12953_s3 + $0x3a8] sm:$0xff]  ;;  %v8720_v49 = vcombine.low %v3677_v39, %v3681_v46 }
 0x244   :  { %6829 = vmatprep.subr.bf16.mxu1 %v9047_v60  ;;  %v8713_v62 = vcombine.high %v3669_v63, %v3673_v1  ;;  %v3665_v60 = vld [vmem:[%s12953_s3 + $0x368] sm:$0xff] }
 0x246   :  { %v9357_v23 = vpop.eup %9356  ;;  %6787 = vmatpush2.bf16.msra.mxu0 %v8918_v11  ;;  %v8712_v11 = vcombine.low %v3669_v63, %v3673_v1  ;;  %v3865_v63 = vld [vmem:[%s12953_s3 + $0x9a8] sm:$0xff] }
 0x247   :  { %6842 = vmatprep.subr.bf16.mxu0 %v8657_v44  ;;  %6830 = vmatpush2.bf16.msra.mxu1 %v9046_v50  ;;  %v3544_v54 = vsub.bf16 %v9357_v23, %v9399_v53  ;;  %v8705_v44 = vcombine.high %v3661_v12, %v3665_v60  ;;  %v3653_v50 = vld [vmem:[%s12953_s3 + $0x308] sm:$0xff]  ;;  %v8704_v23 = vcombine.low %v3661_v12, %v3665_v60 }
 0x248   :  { %v9359_v21 = vpop.eup %9358  ;;  %6885 = vmatprep.subr.bf16.mxu1 %v8785_v15  ;;  %v3657_v15 = vld [vmem:[%s12953_s3 + $0x328] sm:$0xff] }
 0x249   :  { %v3545_v22 = vsub.bf16 %v9359_v21, %v9399_v53  ;;  %v11442_v59 = vsel %vm3504_vm5, %v11375_v29, %v3544_v54  ;;  %v3589_v29 = vld [vmem:[%s12953_s3 + $0x108] sm:$0xff]  ;;  %v8697_v21 = vcombine.high %v3653_v50, %v3657_v15 }
 0x24a   :  { %v8633_v13 = vcombine.high %v3589_v29, %v3593_v6  ;;  %v8632_v10 = vcombine.low %v3589_v29, %v3593_v6  ;;  %v3645_v54 = vld [vmem:[%s12953_s3 + $0x2c8] sm:$0xff] }
 0x24b   :  { %v11437_v57 = vsel %vm3505_vm4, %v11379_v4, %v3545_v22  ;;  %v8648_v4 = vcombine.low %v3605_v51, %v3609_v2  ;;  %v3649_v51 = vld [vmem:[%s12953_s3 + $0x2e8] sm:$0xff]  ;;  %v8696_v2 = vcombine.low %v3653_v50, %v3657_v15 }
 0x24c   :  { %6788 = vmatprep.mubr.bf16.mxu0 %v11437_v57  ;;  %v8689_v22 = vcombine.high %v3645_v54, %v3649_v51  ;;  %v8688_v0 = vcombine.low %v3645_v54, %v3649_v51  ;;  %v3629_v29 = vld [vmem:[%s12953_s3 + $0x248] sm:$0xff] }
 0x24d   :  { %6789 = vmatmul.mubr.bf16.vlgmr.msra.gmra.mxu0 %v11442_v59  ;;  %v3633_v6 = vld [vmem:[%s12953_s3 + $0x268] sm:$0xff] }
 0x24e   :  { %6843 = vmatpush1.bf16.msra.mxu0 %v8656_v61  ;;  %6874 = vmatprep.mubr.bf16.mxu0 %v11012_v3  ;;  %v3637_v61 = vld [vmem:[%s12953_s3 + $0x288] sm:$0xff]  ;;  %v8673_v55 = vcombine.high %v3629_v29, %v3633_v6  ;;  %v8672_v19 = vcombine.low %v3629_v29, %v3633_v6 }
 0x24f   :  { %6844 = vmatprep.subr.bf16.mxu0 %v8649_v28  ;;  %v3641_v28 = vld [vmem:[%s12953_s3 + $0x2a8] sm:$0xff] }
 0x250   :  { %v3857_v54 = vld [vmem:[%s12953_s3 + $0x968] sm:$0xff] }
 0x252   :  { %6845 = vmatpush1.bf16.msra.mxu0 %v8648_v4  ;;  %v8681_v4 = vcombine.high %v3637_v61, %v3641_v28 }
 0x253   :  { %6846 = vmatprep.subr.bf16.mxu0 %v8641_v42  ;;  %v3354_v42 = vpop.f32.mrf.mxu1 }
 0x254   :  { %v3355_v1 = vadd.f32 %v3354_v42, %v515_v37 }
 0x255   :  { %v3356_v5 = vpop.f32.mrf.mxu1 }
 0x256   :  { %6847 = vmatpush1.bf16.msra.mxu0 %v8640_v16  ;;  %v8680_v16 = vcombine.low %v3637_v61, %v3641_v28 }
 0x257   :  { %6848 = vmatprep.subr.bf16.mxu0 %v8633_v13  ;;  %v3358_v33 = vpop.f32.mrf.mxu1 }
 0x25a   :  { %6849 = vmatpush1.bf16.msra.mxu0 %v8632_v10  ;;  %v3621_v10 = vld [vmem:[%s12953_s3 + $0x208] sm:$0xff] }
 0x25b   :  { %6850 = vmatprep.subr.bf16.mxu0 %v8625_v18  ;;  %v3625_v18 = vld [vmem:[%s12953_s3 + $0x228] sm:$0xff] }
 0x25c   :  { %v8665_v17 = vcombine.high %v3621_v10, %v3625_v18 }
 0x25e   :  { %6851 = vmatpush1.bf16.msra.mxu0 %v8624_v20  ;;  %v518_v20 = vsub.s32 7, %v10276_v34 }
 0x25f   :  { %6852 = vmatprep.subr.bf16.mxu0 %v8617_v32 }
 0x262   :  { %6853 = vmatpush1.bf16.msra.mxu0 %v8616_v9  ;;  %v3869_v9 = vld [vmem:[%s12953_s3 + $0x9c8] sm:$0xff] }
 0x263   :  { %6854 = vmatprep.subr.bf16.mxu0 %v8609_v35  ;;  %v3873_v35 = vld [vmem:[%s12953_s3 + $0x9e8] sm:$0xff] }
 0x264   :  { %v8913_v46 = vcombine.high %v3869_v9, %v3873_v35  ;;  %v8912_v12 = vcombine.low %v3869_v9, %v3873_v35 }
 0x266   :  { %6855 = vmatpush1.bf16.msra.mxu0 %v8608_v56  ;;  %v8664_v56 = vcombine.low %v3621_v10, %v3625_v18 }
 0x267   :  { %6856 = vmatprep.subr.bf16.mxu0 %v8601_v38  ;;  %v519_v38 = vrot.slane %v9396_v36, %v518_v20  ;;  %v3837_v36 = vld [vmem:[%s12953_s3 + $0x8c8] sm:$0xff] }
 0x269   :  { %v3397_v24 = vpop.f32.mrf.mxu0  ;;  %v3357_v60 = vadd.f32 %v3356_v5, %v519_v38 }
 0x26a   :  { %6857 = vmatpush1.bf16.msra.mxu0 %v8600_v41  ;;  %v3360_v41 = vpop.f32.mrf.mxu1 }
 0x26b   :  { %6858 = vmatprep.subr.bf16.mxu0 %v8721_v47  ;;  %v3399_v13 = vpop.f32.mrf.mxu0  ;;  %v3861_v47 = vld [vmem:[%s12953_s3 + $0x988] sm:$0xff]  ;;  %v3361_v51 = vadd.f32 %v3360_v41, %v519_v38 }
 0x26c   :  { %v8905_v15 = vcombine.high %v3861_v47, %v3865_v63 }
 0x26d   :  { %v3401_v32 = vpop.f32.mrf.mxu0 }
 0x26e   :  { %6859 = vmatpush2.bf16.msra.mxu0 %v8720_v49 }
 0x26f   :  { %6860 = vmatprep.subr.bf16.mxu0 %v8713_v62  ;;  %v3403_v39 = vpop.f32.mrf.mxu0 }
 0x272   :  { %6861 = vmatpush2.bf16.msra.mxu0 %v8712_v11  ;;  %v3359_v11 = vadd.f32 %v3358_v33, %v515_v37  ;;  %v3841_v37 = vld [vmem:[%s12953_s3 + $0x8e8] sm:$0xff] }
 0x273   :  { %6862 = vmatprep.subr.bf16.mxu0 %v8705_v44  ;;  %v3398_v44 = vadd.f32 %v3397_v24, %v3355_v1  ;;  %v8904_v24 = vcombine.low %v3861_v47, %v3865_v63  ;;  %v8881_v47 = vcombine.high %v3837_v36, %v3841_v37  ;;  %v3829_v63 = vld [vmem:[%s12953_s3 + $0x888] sm:$0xff] }
 0x274   :  { %v3833_v1 = vld [vmem:[%s12953_s3 + $0x8a8] sm:$0xff] }
 0x276   :  { %6863 = vmatpush2.bf16.msra.mxu0 %v8704_v23 }
 0x277   :  { %6864 = vmatprep.subr.bf16.mxu0 %v8697_v21  ;;  %v3853_v21 = vld [vmem:[%s12953_s3 + $0x948] sm:$0xff] }
 0x278   :  { %v8897_v6 = vcombine.high %v3853_v21, %v3857_v54 }
 0x27a   :  { %6865 = vmatpush2.bf16.msra.mxu0 %v8696_v2  ;;  %v3400_v2 = vadd.f32 %v3399_v13, %v3357_v60  ;;  %v3845_v13 = vld [vmem:[%s12953_s3 + $0x908] sm:$0xff] }
 0x27b   :  { %6866 = vmatprep.subr.bf16.mxu0 %v8689_v22  ;;  %v3402_v22 = vadd.f32 %v3401_v32, %v3359_v11  ;;  %v8896_v32 = vcombine.low %v3853_v21, %v3857_v54  ;;  %v3821_v60 = vld [vmem:[%s12953_s3 + $0x848] sm:$0xff] }
 0x27c   :  { %v3825_v11 = vld [vmem:[%s12953_s3 + $0x868] sm:$0xff] }
 0x27d   :  { %v8864_v21 = vcombine.low %v3821_v60, %v3825_v11 }
 0x27e   :  { %6867 = vmatpush2.bf16.msra.mxu0 %v8688_v0 }
 0x27f   :  { %6868 = vmatprep.subr.bf16.mxu0 %v8681_v4  ;;  %v3404_v4 = vadd.f32 %v3403_v39, %v3361_v51  ;;  %v3933_v51 = vld [vmem:[%s12953_s3 + $0xbc8] sm:$0xff] }
 0x282   :  { %6869 = vmatpush2.bf16.msra.mxu0 %v8680_v16 }
 0x283   :  { %6870 = vmatprep.subr.bf16.mxu0 %v8673_v55  ;;  %v3849_v55 = vld [vmem:[%s12953_s3 + $0x928] sm:$0xff] }
 0x284   :  { %v8889_v35 = vcombine.high %v3845_v13, %v3849_v55  ;;  %v8888_v39 = vcombine.low %v3845_v13, %v3849_v55 }
 0x286   :  { %6871 = vmatpush2.bf16.msra.mxu0 %v8672_v19 }
 0x287   :  { %6872 = vmatprep.subr.bf16.mxu0 %v8665_v17 }
 0x289   :  { %v3483_v49 = vpop.f32.mrf.mxu0 }
 0x28a   :  { %v3440_v62 = vpop.f32.mrf.mxu1  ;;  %6873 = vmatpush2.bf16.msra.mxu0 %v8664_v56 }
 0x28b   :  { %v3485_v50 = vpop.f32.mrf.mxu0  ;;  %6928 = vmatprep.subr.bf16.mxu0 %v8913_v46  ;;  %v3441_v61 = vadd.f32 %v3440_v62, %v3398_v44  ;;  %v8880_v62 = vcombine.low %v3837_v36, %v3841_v37  ;;  %v8872_v44 = vcombine.low %v3829_v63, %v3833_v1 }
 0x28c   :  { %v3442_v23 = vpop.f32.mrf.mxu1 }
 0x28d   :  { %6875 = vmatmul.mubr.bf16.vlgmr.msra.gmra.mxu0 %v11209_v27  ;;  %v3487_v0 = vpop.f32.mrf.mxu0  ;;  %v3443_v42 = vadd.f32 %v3442_v23, %v3400_v2  ;;  %v3484_v5 = vadd.f32 %v3483_v49, %v3441_v61  ;;  %v3817_v23 = vld [vmem:[%s12953_s3 + $0x828] sm:$0xff] }
 0x28e   :  { %v3444_v28 = vpop.f32.mrf.mxu1  ;;  %6929 = vmatpush1.bf16.msra.mxu0 %v8912_v12  ;;  %6960 = vmatprep.mubr.bf16.mxu0 %v11437_v57  ;;  %v8873_v12 = vcombine.high %v3829_v63, %v3833_v1  ;;  %v3937_v2 = vld [vmem:[%s12953_s3 + $0xbe8] sm:$0xff] }
 0x28f   :  { %v3445_v29 = vadd.f32 %v3444_v28, %v3402_v22  ;;  %6930 = vmatprep.subr.bf16.mxu0 %v8905_v15  ;;  %v3489_v19 = vpop.f32.mrf.mxu0  ;;  %v3486_v17 = vadd.f32 %v3485_v50, %v3443_v42  ;;  %v8865_v50 = vcombine.high %v3821_v60, %v3825_v11  ;;  %v3813_v15 = vld [vmem:[%s12953_s3 + $0x808] sm:$0xff]  ;;  %v8977_v28 = vcombine.high %v3933_v51, %v3937_v2 }
 0x290   :  { %v3446_v16 = vpop.f32.mrf.mxu1  ;;  %v8857_v54 = vcombine.high %v3813_v15, %v3817_v23  ;;  %v8856_v22 = vcombine.low %v3813_v15, %v3817_v23  ;;  %v3737_v42 = vld [vmem:[%s12953_s3 + $0x5a8] sm:$0xff]  ;;  %v8976_v13 = vcombine.low %v3933_v51, %v3937_v2 }
 0x291   :  { %v3488_v10 = vadd.f32 %v3487_v0, %v3445_v29  ;;  %v3447_v18 = vadd.f32 %v3446_v16, %v3404_v4  ;;  %v3733_v0 = vld [vmem:[%s12953_s3 + $0x588] sm:$0xff] }
 0x292   :  { %6931 = vmatpush1.bf16.msra.mxu0 %v8904_v24  ;;  %v3925_v29 = vld [vmem:[%s12953_s3 + $0xb88] sm:$0xff] }
 0x293   :  { %v3498_v33 = vpack.c.bf16 %v3488_v10, %v3484_v5  ;;  %v3490_v9 = vadd.f32 %v3489_v19, %v3447_v18  ;;  %6932 = vmatprep.subr.bf16.mxu0 %v8897_v6  ;;  %v3929_v6 = vld [vmem:[%s12953_s3 + $0xba8] sm:$0xff]  ;;  %v8777_v5 = vcombine.high %v3733_v0, %v3737_v42 }
 0x294   :  { %v8969_v10 = vcombine.high %v3925_v29, %v3929_v6  ;;  %v3917_v18 = vld [vmem:[%s12953_s3 + $0xb48] sm:$0xff] }
 0x295   :  { %v3514_v56 = vmin.bf16 %v9398_v31, %v3498_v33  ;;  %v3499_v38 = vpack.c.bf16 %v3490_v9, %v3486_v17  ;;  %vm3506_vm7 = vcmp.gt.bf16.partialorder %v3498_v33, 0  ;;  %v3921_v19 = vld [vmem:[%s12953_s3 + $0xb68] sm:$0xff] }
 0x296   :  { %6933 = vmatpush1.bf16.msra.mxu0 %v8896_v32  ;;  %v3725_v17 = vld [vmem:[%s12953_s3 + $0x548] sm:$0xff]  ;;  %v8961_v36 = vcombine.high %v3917_v18, %v3921_v19 }
 0x297   :  { %v3535_v46 = vmul.bf16 1069105081, %v3514_v56  ;;  %v3515_v41 = vmin.bf16 %v9398_v31, %v3499_v38  ;;  %6934 = vmatprep.subr.bf16.mxu0 %v8889_v35  ;;  %vm3507_vm6 = vcmp.gt.bf16.partialorder %v3499_v38, 0  ;;  %v3729_v9 = vld [vmem:[%s12953_s3 + $0x568] sm:$0xff]  ;;  %v8968_v35 = vcombine.low %v3925_v29, %v3929_v6 }
 0x298   :  { %v8769_v37 = vcombine.high %v3725_v17, %v3729_v9  ;;  %v3909_v56 = vld [vmem:[%s12953_s3 + $0xb08] sm:$0xff] }
 0x299   :  { %9360 = vpow.bf16 %v3535_v46  ;;  %v3538_v49 = vmul.bf16 1069105081, %v3515_v41  ;;  %v8761_v41 = vcombine.high %v3717_v25, %v3721_v26  ;;  %v3905_v63 = vld [vmem:[%s12953_s3 + $0xae8] sm:$0xff] }
 0x29a   :  { %6935 = vmatpush1.bf16.msra.mxu0 %v8888_v39  ;;  %v8768_v39 = vcombine.low %v3725_v17, %v3729_v9  ;;  %v3709_v1 = vld [vmem:[%s12953_s3 + $0x4c8] sm:$0xff]  ;;  %v3614_v9 = vld [vmem:[%s12953_s3 + $0x1d0] sm:$0xff] }
 0x29b   :  { %9362 = vpow.bf16 %v3538_v49  ;;  %6936 = vmatprep.subr.bf16.mxu0 %v8881_v47  ;;  %v3901_v47 = vld [vmem:[%s12953_s3 + $0xac8] sm:$0xff] }
 0x29c   :  { %v3713_v49 = vld [vmem:[%s12953_s3 + $0x4e8] sm:$0xff]  ;;  %v8945_v60 = vcombine.high %v3901_v47, %v3905_v63 }
 0x29d   :  { %v8753_v11 = vcombine.high %v3709_v1, %v3713_v49  ;;  %v3701_v15 = vld [vmem:[%s12953_s3 + $0x488] sm:$0xff] }
 0x29e   :  { %6937 = vmatpush1.bf16.msra.mxu0 %v8880_v62  ;;  %v3705_v23 = vld [vmem:[%s12953_s3 + $0x4a8] sm:$0xff] }
 0x29f   :  { %6938 = vmatprep.subr.bf16.mxu0 %v8873_v12  ;;  %v8760_v12 = vcombine.low %v3717_v25, %v3721_v26  ;;  %v8745_v2 = vcombine.high %v3701_v15, %v3705_v23  ;;  %v3877_v6 = vld [vmem:[%s12953_s3 + $0xa08] sm:$0xff]  ;;  %v3606_v26 = vld [vmem:[%s12953_s3 + $0x190] sm:$0xff] }
 0x2a2   :  { %6939 = vmatpush1.bf16.msra.mxu0 %v8872_v44  ;;  %v3893_v44 = vld [vmem:[%s12953_s3 + $0xa88] sm:$0xff] }
 0x2a3   :  { %6940 = vmatprep.subr.bf16.mxu0 %v8865_v50  ;;  %v3897_v50 = vld [vmem:[%s12953_s3 + $0xaa8] sm:$0xff] }
 0x2a4   :  { %v8937_v51 = vcombine.high %v3893_v44, %v3897_v50 }
 0x2a6   :  { %6941 = vmatpush1.bf16.msra.mxu0 %v8864_v21  ;;  %v8944_v21 = vcombine.low %v3901_v47, %v3905_v63 }
 0x2a7   :  { %v9361_v61 = vpop.eup %9360  ;;  %6942 = vmatprep.subr.bf16.mxu0 %v8857_v54  ;;  %v8752_v54 = vcombine.low %v3709_v1, %v3713_v49  ;;  %v3598_v49 = vld [vmem:[%s12953_s3 + $0x150] sm:$0xff] }
 0x2a8   :  { %v3546_v4 = vsub.bf16 %v9361_v61, %v9399_v53  ;;  %v3889_v61 = vld [vmem:[%s12953_s3 + $0xa68] sm:$0xff] }
 0x2a9   :  { %v9363_v24 = vpop.eup %9362 }
 0x2aa   :  { %6943 = vmatpush1.bf16.msra.mxu0 %v8856_v22  ;;  %v3547_v16 = vsub.bf16 %v9363_v24, %v9399_v53  ;;  %v11620_v32 = vsel %vm3506_vm7, %v3498_v33, %v3546_v4  ;;  %v8776_v33 = vcombine.low %v3733_v0, %v3737_v42  ;;  %v3885_v22 = vld [vmem:[%s12953_s3 + $0xa48] sm:$0xff]  ;;  %v8936_v24 = vcombine.low %v3893_v44, %v3897_v50 }
 0x2ab   :  { %6944 = vmatprep.subr.bf16.mxu0 %v8977_v28  ;;  %v3693_v28 = vld [vmem:[%s12953_s3 + $0x448] sm:$0xff]  ;;  %v8744_v4 = vcombine.low %v3701_v15, %v3705_v23  ;;  %v8929_v42 = vcombine.high %v3885_v22, %v3889_v61  ;;  %v3590_v23 = vld [vmem:[%s12953_s3 + $0x110] sm:$0xff] }
 0x2ac   :  { %v11611_v55 = vsel %vm3507_vm6, %v3499_v38, %v3547_v16  ;;  %v3913_v38 = vld [vmem:[%s12953_s3 + $0xb28] sm:$0xff] }
 0x2ad   :  { %6831 = vmatprep.mubr.bf16.mxu1 %v11611_v55  ;;  %v8953_v46 = vcombine.high %v3909_v56, %v3913_v38  ;;  %v8952_v62 = vcombine.low %v3909_v56, %v3913_v38  ;;  %v3697_v0 = vld [vmem:[%s12953_s3 + $0x468] sm:$0xff] }
 0x2ae   :  { %6832 = vmatmul.mubr.bf16.vlgmr.msra.gmra.mxu1 %v11620_v32  ;;  %6945 = vmatpush2.bf16.msra.mxu0 %v8976_v13  ;;  %v8737_v29 = vcombine.high %v3693_v28, %v3697_v0  ;;  %v3881_v16 = vld [vmem:[%s12953_s3 + $0xa28] sm:$0xff] }
 0x2af   :  { %6886 = vmatpush1.bf16.msra.mxu1 %v8784_v30  ;;  %6917 = vmatprep.mubr.bf16.mxu1 %v11018_v8  ;;  %v8960_v30 = vcombine.low %v3917_v18, %v3921_v19  ;;  %v3685_v13 = vld [vmem:[%s12953_s3 + $0x408] sm:$0xff]  ;;  %v8736_v18 = vcombine.low %v3693_v28, %v3697_v0  ;;  %v8921_v19 = vcombine.high %v3877_v6, %v3881_v16  ;;  %v3582_v0 = vld [vmem:[%s12953_s3 + $0xd0] sm:$0xff] }
 0x2b0   :  { %6887 = vmatprep.subr.bf16.mxu1 %v8777_v5  ;;  %6946 = vmatprep.subr.bf16.mxu0 %v8969_v10  ;;  %v3689_v5 = vld [vmem:[%s12953_s3 + $0x428] sm:$0xff]  ;;  %v8928_v10 = vcombine.low %v3885_v22, %v3889_v61 }
 0x2b1   :  { %v8729_v17 = vcombine.high %v3685_v13, %v3689_v5  ;;  %v8728_v56 = vcombine.low %v3685_v13, %v3689_v5  ;;  %v3574_v5 = vld [vmem:[%s12953_s3 + $0x90] sm:$0xff] }
 0x2b2   :  { %6947 = vmatpush2.bf16.msra.mxu0 %v8968_v35  ;;  %v3618_v35 = vld [vmem:[%s12953_s3 + $0x1f0] sm:$0xff] }
 0x2b3   :  { %6888 = vmatpush1.bf16.msra.mxu1 %v8776_v33  ;;  %6948 = vmatprep.subr.bf16.mxu0 %v8961_v36  ;;  %v3805_v33 = vld [vmem:[%s12953_s3 + $0x7c8] sm:$0xff]  ;;  %v8659_v38 = vcombine.high %v3614_v9, %v3618_v35 }
 0x2b4   :  { %6889 = vmatprep.subr.bf16.mxu1 %v8769_v37  ;;  %v3809_v36 = vld [vmem:[%s12953_s3 + $0x7e8] sm:$0xff]  ;;  %v8920_v37 = vcombine.low %v3877_v6, %v3881_v16 }
 0x2b5   :  { %v8849_v25 = vcombine.high %v3805_v33, %v3809_v36  ;;  %v8848_v47 = vcombine.low %v3805_v33, %v3809_v36  ;;  %v3566_v36 = vld [vmem:[%s12953_s3 + $0x50] sm:$0xff] }
 0x2b6   :  { %6949 = vmatpush2.bf16.msra.mxu0 %v8960_v30  ;;  %v3610_v30 = vld [vmem:[%s12953_s3 + $0x1b0] sm:$0xff] }
 0x2b7   :  { %6890 = vmatpush1.bf16.msra.mxu1 %v8768_v39  ;;  %6950 = vmatprep.subr.bf16.mxu0 %v8953_v46  ;;  %v3797_v39 = vld [vmem:[%s12953_s3 + $0x788] sm:$0xff]  ;;  %v8651_v63 = vcombine.high %v3606_v26, %v3610_v30 }
 0x2b8   :  { %6891 = vmatprep.subr.bf16.mxu1 %v8761_v41  ;;  %v3801_v46 = vld [vmem:[%s12953_s3 + $0x7a8] sm:$0xff]  ;;  %v8658_v41 = vcombine.low %v3614_v9, %v3618_v35 }
 0x2b9   :  { %v8841_v1 = vcombine.high %v3797_v39, %v3801_v46  ;;  %v8840_v44 = vcombine.low %v3797_v39, %v3801_v46  ;;  %v3558_v46 = vld [vmem:[%s12953_s3 + $0x10] sm:$0xff] }
 0x2ba   :  { %6951 = vmatpush2.bf16.msra.mxu0 %v8952_v62  ;;  %v3602_v62 = vld [vmem:[%s12953_s3 + $0x170] sm:$0xff] }
 0x2bb   :  { %6892 = vmatpush1.bf16.msra.mxu1 %v8760_v12  ;;  %6952 = vmatprep.subr.bf16.mxu0 %v8945_v60  ;;  %v3789_v12 = vld [vmem:[%s12953_s3 + $0x748] sm:$0xff]  ;;  %v8643_v50 = vcombine.high %v3598_v49, %v3602_v62 }
 0x2bc   :  { %6893 = vmatprep.subr.bf16.mxu1 %v8753_v11  ;;  %v3793_v60 = vld [vmem:[%s12953_s3 + $0x768] sm:$0xff]  ;;  %v8650_v11 = vcombine.low %v3606_v26, %v3610_v30 }
 0x2bd   :  { %v8833_v15 = vcombine.high %v3789_v12, %v3793_v60  ;;  %v8832_v22 = vcombine.low %v3789_v12, %v3793_v60  ;;  %v3678_v60 = vld [vmem:[%s12953_s3 + $0x3d0] sm:$0xff] }
 0x2be   :  { %6953 = vmatpush2.bf16.msra.mxu0 %v8944_v21  ;;  %v3594_v21 = vld [vmem:[%s12953_s3 + $0x130] sm:$0xff] }
 0x2bf   :  { %6894 = vmatpush1.bf16.msra.mxu1 %v8752_v54  ;;  %6954 = vmatprep.subr.bf16.mxu0 %v8937_v51  ;;  %v3781_v54 = vld [vmem:[%s12953_s3 + $0x708] sm:$0xff]  ;;  %v8635_v61 = vcombine.high %v3590_v23, %v3594_v21 }
 0x2c0   :  { %6895 = vmatprep.subr.bf16.mxu1 %v8745_v2  ;;  %v3785_v51 = vld [vmem:[%s12953_s3 + $0x728] sm:$0xff]  ;;  %v8642_v2 = vcombine.low %v3598_v49, %v3602_v62 }
 0x2c1   :  { %v8825_v28 = vcombine.high %v3781_v54, %v3785_v51  ;;  %v8824_v6 = vcombine.low %v3781_v54, %v3785_v51  ;;  %v3989_v51 = vld [vmem:[%s12953_s3 + $0xd88] sm:$0xff] }
 0x2c2   :  { %6955 = vmatpush2.bf16.msra.mxu0 %v8936_v24  ;;  %v3586_v24 = vld [vmem:[%s12953_s3 + $0xf0] sm:$0xff] }
 0x2c3   :  { %6896 = vmatpush1.bf16.msra.mxu1 %v8744_v4  ;;  %6956 = vmatprep.subr.bf16.mxu0 %v8929_v42  ;;  %v3773_v4 = vld [vmem:[%s12953_s3 + $0x6c8] sm:$0xff]  ;;  %v8627_v16 = vcombine.high %v3582_v0, %v3586_v24 }
 0x2c4   :  { %6897 = vmatprep.subr.bf16.mxu1 %v8737_v29  ;;  %v3777_v42 = vld [vmem:[%s12953_s3 + $0x6e8] sm:$0xff]  ;;  %v8634_v29 = vcombine.low %v3590_v23, %v3594_v21 }
 0x2c5   :  { %v8817_v13 = vcombine.high %v3773_v4, %v3777_v42  ;;  %v8816_v9 = vcombine.low %v3773_v4, %v3777_v42  ;;  %v3662_v42 = vld [vmem:[%s12953_s3 + $0x350] sm:$0xff] }
 0x2c6   :  { %6957 = vmatpush2.bf16.msra.mxu0 %v8928_v10  ;;  %v3578_v10 = vld [vmem:[%s12953_s3 + $0xb0] sm:$0xff] }
 0x2c7   :  { %6898 = vmatpush1.bf16.msra.mxu1 %v8736_v18  ;;  %6958 = vmatprep.subr.bf16.mxu0 %v8921_v19  ;;  %v3765_v18 = vld [vmem:[%s12953_s3 + $0x688] sm:$0xff]  ;;  %v8619_v35 = vcombine.high %v3574_v5, %v3578_v10 }
 0x2c8   :  { %6899 = vmatprep.subr.bf16.mxu1 %v8729_v17  ;;  %v3769_v19 = vld [vmem:[%s12953_s3 + $0x6a8] sm:$0xff]  ;;  %v8626_v17 = vcombine.low %v3582_v0, %v3586_v24 }
 0x2c9   :  { %v8809_v33 = vcombine.high %v3765_v18, %v3769_v19  ;;  %v8808_v26 = vcombine.low %v3765_v18, %v3769_v19  ;;  %v3654_v19 = vld [vmem:[%s12953_s3 + $0x310] sm:$0xff] }
 0x2ca   :  { %6959 = vmatpush2.bf16.msra.mxu0 %v8920_v37  ;;  %v3570_v37 = vld [vmem:[%s12953_s3 + $0x70] sm:$0xff] }
 0x2cb   :  { %6900 = vmatpush1.bf16.msra.mxu1 %v8728_v56  ;;  %7014 = vmatprep.subr.bf16.mxu0 %v8659_v38  ;;  %v3757_v56 = vld [vmem:[%s12953_s3 + $0x648] sm:$0xff]  ;;  %v8611_v30 = vcombine.high %v3566_v36, %v3570_v37 }
 0x2cc   :  { %6901 = vmatprep.subr.bf16.mxu1 %v8849_v25  ;;  %v3761_v38 = vld [vmem:[%s12953_s3 + $0x668] sm:$0xff]  ;;  %v8618_v25 = vcombine.low %v3574_v5, %v3578_v10 }
 0x2cd   :  { %6961 = vmatmul.mubr.bf16.vlgmr.msra.gmra.mxu0 %v11442_v59  ;;  %v8801_v39 = vcombine.high %v3757_v56, %v3761_v38  ;;  %v8800_v49 = vcombine.low %v3757_v56, %v3761_v38  ;;  %v3646_v38 = vld [vmem:[%s12953_s3 + $0x2d0] sm:$0xff] }
 0x2ce   :  { %7015 = vmatpush1.bf16.msra.mxu0 %v8658_v41  ;;  %7046 = vmatprep.mubr.bf16.mxu0 %v11012_v3  ;;  %v3562_v41 = vld [vmem:[%s12953_s3 + $0x30] sm:$0xff] }
 0x2cf   :  { %6902 = vmatpush2.bf16.msra.mxu1 %v8848_v47  ;;  %7016 = vmatprep.subr.bf16.mxu0 %v8651_v63  ;;  %v3749_v47 = vld [vmem:[%s12953_s3 + $0x608] sm:$0xff]  ;;  %v8603_v62 = vcombine.high %v3558_v46, %v3562_v41 }
 0x2d0   :  { %6903 = vmatprep.subr.bf16.mxu1 %v8841_v1  ;;  %v3753_v63 = vld [vmem:[%s12953_s3 + $0x628] sm:$0xff]  ;;  %v8610_v1 = vcombine.low %v3566_v36, %v3570_v37 }
 0x2d1   :  { %v8793_v12 = vcombine.high %v3749_v47, %v3753_v63  ;;  %v8792_v23 = vcombine.low %v3749_v47, %v3753_v63  ;;  %v3638_v63 = vld [vmem:[%s12953_s3 + $0x290] sm:$0xff] }
 0x2d2   :  { %7017 = vmatpush1.bf16.msra.mxu0 %v8650_v11  ;;  %v3682_v11 = vld [vmem:[%s12953_s3 + $0x3f0] sm:$0xff] }
 0x2d3   :  { %6904 = vmatpush2.bf16.msra.mxu1 %v8840_v44  ;;  %7018 = vmatprep.subr.bf16.mxu0 %v8643_v50  ;;  %v3997_v44 = vld [vmem:[%s12953_s3 + $0xdc8] sm:$0xff]  ;;  %v8723_v21 = vcombine.high %v3678_v60, %v3682_v11 }
 0x2d4   :  { %6905 = vmatprep.subr.bf16.mxu1 %v8833_v15  ;;  %v4001_v50 = vld [vmem:[%s12953_s3 + $0xde8] sm:$0xff]  ;;  %v8602_v15 = vcombine.low %v3558_v46, %v3562_v41 }
 0x2d5   :  { %v9041_v54 = vcombine.high %v3997_v44, %v4001_v50  ;;  %v9040_v0 = vcombine.low %v3997_v44, %v4001_v50  ;;  %v3630_v50 = vld [vmem:[%s12953_s3 + $0x250] sm:$0xff] }
 0x2d6   :  { %7019 = vmatpush1.bf16.msra.mxu0 %v8642_v2  ;;  %v3993_v2 = vld [vmem:[%s12953_s3 + $0xda8] sm:$0xff] }
 0x2d7   :  { %6906 = vmatpush2.bf16.msra.mxu1 %v8832_v22  ;;  %7020 = vmatprep.subr.bf16.mxu0 %v8635_v61  ;;  %v3670_v22 = vld [vmem:[%s12953_s3 + $0x390] sm:$0xff]  ;;  %v9033_v24 = vcombine.high %v3989_v51, %v3993_v2  ;;  %v9032_v5 = vcombine.low %v3989_v51, %v3993_v2 }
 0x2d8   :  { %6907 = vmatprep.subr.bf16.mxu1 %v8825_v28  ;;  %v3674_v61 = vld [vmem:[%s12953_s3 + $0x3b0] sm:$0xff]  ;;  %v8722_v28 = vcombine.low %v3678_v60, %v3682_v11 }
 0x2d9   :  { %v8715_v4 = vcombine.high %v3670_v22, %v3674_v61 }
 0x2da   :  { %7021 = vmatpush1.bf16.msra.mxu0 %v8634_v29  ;;  %v3666_v29 = vld [vmem:[%s12953_s3 + $0x370] sm:$0xff] }
 0x2db   :  { %6908 = vmatpush2.bf16.msra.mxu1 %v8824_v6  ;;  %7022 = vmatprep.subr.bf16.mxu0 %v8627_v16  ;;  %v3981_v6 = vld [vmem:[%s12953_s3 + $0xd48] sm:$0xff]  ;;  %v8707_v10 = vcombine.high %v3662_v42, %v3666_v29 }
 0x2dc   :  { %6909 = vmatprep.subr.bf16.mxu1 %v8817_v13  ;;  %v3985_v16 = vld [vmem:[%s12953_s3 + $0xd68] sm:$0xff]  ;;  %v8714_v13 = vcombine.low %v3670_v22, %v3674_v61  ;;  %v3622_v61 = vld [vmem:[%s12953_s3 + $0x210] sm:$0xff] }
 0x2dd   :  { %v9025_v18 = vcombine.high %v3981_v6, %v3985_v16  ;;  %v9024_v36 = vcombine.low %v3981_v6, %v3985_v16  ;;  %v3870_v16 = vld [vmem:[%s12953_s3 + $0x9d0] sm:$0xff] }
 0x2de   :  { %7023 = vmatpush1.bf16.msra.mxu0 %v8626_v17  ;;  %v3658_v17 = vld [vmem:[%s12953_s3 + $0x330] sm:$0xff] }
 0x2df   :  { %6910 = vmatpush2.bf16.msra.mxu1 %v8816_v9  ;;  %7024 = vmatprep.subr.bf16.mxu0 %v8619_v35  ;;  %v3973_v9 = vld [vmem:[%s12953_s3 + $0xd08] sm:$0xff]  ;;  %v8699_v37 = vcombine.high %v3654_v19, %v3658_v17 }
 0x2e0   :  { %6911 = vmatprep.subr.bf16.mxu1 %v8809_v33  ;;  %v3977_v35 = vld [vmem:[%s12953_s3 + $0xd28] sm:$0xff]  ;;  %v8706_v33 = vcombine.low %v3662_v42, %v3666_v29 }
 0x2e1   :  { %v9017_v56 = vcombine.high %v3973_v9, %v3977_v35  ;;  %v9016_v46 = vcombine.low %v3973_v9, %v3977_v35  ;;  %v3862_v35 = vld [vmem:[%s12953_s3 + $0x990] sm:$0xff] }
 0x2e2   :  { %7025 = vmatpush1.bf16.msra.mxu0 %v8618_v25  ;;  %v3650_v25 = vld [vmem:[%s12953_s3 + $0x2f0] sm:$0xff] }
 0x2e3   :  { %6912 = vmatpush2.bf16.msra.mxu1 %v8808_v26  ;;  %7026 = vmatprep.subr.bf16.mxu0 %v8611_v30  ;;  %v3965_v26 = vld [vmem:[%s12953_s3 + $0xcc8] sm:$0xff]  ;;  %v8691_v41 = vcombine.high %v3646_v38, %v3650_v25 }
 0x2e4   :  { %6913 = vmatprep.subr.bf16.mxu1 %v8801_v39  ;;  %v3969_v30 = vld [vmem:[%s12953_s3 + $0xce8] sm:$0xff]  ;;  %v8698_v39 = vcombine.low %v3654_v19, %v3658_v17 }
 0x2e5   :  { %v9009_v47 = vcombine.high %v3965_v26, %v3969_v30  ;;  %v9008_v60 = vcombine.low %v3965_v26, %v3969_v30  ;;  %v3854_v30 = vld [vmem:[%s12953_s3 + $0x950] sm:$0xff] }
 0x2e6   :  { %7027 = vmatpush1.bf16.msra.mxu0 %v8610_v1  ;;  %v3642_v1 = vld [vmem:[%s12953_s3 + $0x2b0] sm:$0xff] }
 0x2e7   :  { %6914 = vmatpush2.bf16.msra.mxu1 %v8800_v49  ;;  %7028 = vmatprep.subr.bf16.mxu0 %v8603_v62  ;;  %v3957_v49 = vld [vmem:[%s12953_s3 + $0xc88] sm:$0xff]  ;;  %v8683_v11 = vcombine.high %v3638_v63, %v3642_v1 }
 0x2e8   :  { %6915 = vmatprep.subr.bf16.mxu1 %v8793_v12  ;;  %v3961_v62 = vld [vmem:[%s12953_s3 + $0xca8] sm:$0xff]  ;;  %v8690_v12 = vcombine.low %v3646_v38, %v3650_v25 }
 0x2e9   :  { %v9001_v44 = vcombine.high %v3957_v49, %v3961_v62  ;;  %v9000_v51 = vcombine.low %v3957_v49, %v3961_v62  ;;  %v3846_v62 = vld [vmem:[%s12953_s3 + $0x910] sm:$0xff] }
 0x2ea   :  { %7029 = vmatpush1.bf16.msra.mxu0 %v8602_v15  ;;  %v3634_v15 = vld [vmem:[%s12953_s3 + $0x270] sm:$0xff] }
 0x2eb   :  { %6916 = vmatpush2.bf16.msra.mxu1 %v8792_v23  ;;  %7030 = vmatprep.subr.bf16.mxu0 %v8723_v21  ;;  %v3949_v23 = vld [vmem:[%s12953_s3 + $0xc48] sm:$0xff]  ;;  %v8675_v2 = vcombine.high %v3630_v50, %v3634_v15 }
 0x2ec   :  { %6971 = vmatprep.subr.bf16.mxu1 %v9041_v54  ;;  %v3953_v21 = vld [vmem:[%s12953_s3 + $0xc68] sm:$0xff]  ;;  %v8682_v54 = vcombine.low %v3638_v63, %v3642_v1 }
 0x2ed   :  { %v8993_v22 = vcombine.high %v3949_v23, %v3953_v21  ;;  %v8992_v42 = vcombine.low %v3949_v23, %v3953_v21  ;;  %v3838_v21 = vld [vmem:[%s12953_s3 + $0x8d0] sm:$0xff] }
 0x2ee   :  { %6918 = vmatmul.mubr.bf16.vlgmr.msra.gmra.mxu1 %v11220_v48  ;;  %7031 = vmatpush2.bf16.msra.mxu0 %v8722_v28  ;;  %v3626_v28 = vld [vmem:[%s12953_s3 + $0x230] sm:$0xff] }
 0x2ef   :  { %6972 = vmatpush1.bf16.msra.mxu1 %v9040_v0  ;;  %7003 = vmatprep.mubr.bf16.mxu1 %v11611_v55  ;;  %v3941_v0 = vld [vmem:[%s12953_s3 + $0xc08] sm:$0xff]  ;;  %v8667_v29 = vcombine.high %v3622_v61, %v3626_v28 }
 0x2f0   :  { %6973 = vmatprep.subr.bf16.mxu1 %v9033_v24  ;;  %7032 = vmatprep.subr.bf16.mxu0 %v8715_v4  ;;  %v3945_v24 = vld [vmem:[%s12953_s3 + $0xc28] sm:$0xff]  ;;  %v8674_v4 = vcombine.low %v3630_v50, %v3634_v15 }
 0x2f1   :  { %v8985_v6 = vcombine.high %v3941_v0, %v3945_v24  ;;  %v8984_v19 = vcombine.low %v3941_v0, %v3945_v24  ;;  %v3830_v24 = vld [vmem:[%s12953_s3 + $0x890] sm:$0xff] }
 0x2f2   :  { %7033 = vmatpush2.bf16.msra.mxu0 %v8714_v13  ;;  %v3874_v13 = vld [vmem:[%s12953_s3 + $0x9f0] sm:$0xff] }
 0x2f3   :  { %6974 = vmatpush1.bf16.msra.mxu1 %v9032_v5  ;;  %7034 = vmatprep.subr.bf16.mxu0 %v8707_v10  ;;  %v4061_v5 = vld [vmem:[%s12953_s3 + $0xfc8] sm:$0xff]  ;;  %v8915_v17 = vcombine.high %v3870_v16, %v3874_v13 }
 0x2f4   :  { %6975 = vmatprep.subr.bf16.mxu1 %v9025_v18  ;;  %v4065_v10 = vld [vmem:[%s12953_s3 + $0xfe8] sm:$0xff]  ;;  %v8666_v18 = vcombine.low %v3622_v61, %v3626_v28 }
 0x2f5   :  { %v9105_v9 = vcombine.high %v4061_v5, %v4065_v10  ;;  %v9104_v38 = vcombine.low %v4061_v5, %v4065_v10  ;;  %v3822_v10 = vld [vmem:[%s12953_s3 + $0x850] sm:$0xff] }
 0x2f6   :  { %7035 = vmatpush2.bf16.msra.mxu0 %v8706_v33  ;;  %v3866_v33 = vld [vmem:[%s12953_s3 + $0x9b0] sm:$0xff] }
 0x2f7   :  { %6976 = vmatpush1.bf16.msra.mxu1 %v9024_v36  ;;  %7036 = vmatprep.subr.bf16.mxu0 %v8699_v37  ;;  %v4053_v36 = vld [vmem:[%s12953_s3 + $0xf88] sm:$0xff]  ;;  %v8907_v25 = vcombine.high %v3862_v35, %v3866_v33 }
 0x2f8   :  { %6977 = vmatprep.subr.bf16.mxu1 %v9017_v56  ;;  %v4057_v37 = vld [vmem:[%s12953_s3 + $0xfa8] sm:$0xff]  ;;  %v8914_v56 = vcombine.low %v3870_v16, %v3874_v13 }
 0x2f9   :  { %v9097_v26 = vcombine.high %v4053_v36, %v4057_v37  ;;  %v9096_v63 = vcombine.low %v4053_v36, %v4057_v37  ;;  %v3814_v37 = vld [vmem:[%s12953_s3 + $0x810] sm:$0xff] }
 0x2fa   :  { %7037 = vmatpush2.bf16.msra.mxu0 %v8698_v39  ;;  %v3858_v39 = vld [vmem:[%s12953_s3 + $0x970] sm:$0xff] }
 0x2fb   :  { %6978 = vmatpush1.bf16.msra.mxu1 %v9016_v46  ;;  %7038 = vmatprep.subr.bf16.mxu0 %v8691_v41  ;;  %v4045_v46 = vld [vmem:[%s12953_s3 + $0xf48] sm:$0xff]  ;;  %v8899_v1 = vcombine.high %v3854_v30, %v3858_v39 }
 0x2fc   :  { %6979 = vmatprep.subr.bf16.mxu1 %v9009_v47  ;;  %v4049_v41 = vld [vmem:[%s12953_s3 + $0xf68] sm:$0xff]  ;;  %v8906_v47 = vcombine.low %v3862_v35, %v3866_v33 }
 0x2fd   :  { %v9089_v49 = vcombine.high %v4045_v46, %v4049_v41  ;;  %v9088_v50 = vcombine.low %v4045_v46, %v4049_v41  ;;  %v3934_v41 = vld [vmem:[%s12953_s3 + $0xbd0] sm:$0xff] }
 0x2fe   :  { %7039 = vmatpush2.bf16.msra.mxu0 %v8690_v12  ;;  %v3850_v12 = vld [vmem:[%s12953_s3 + $0x930] sm:$0xff] }
 0x2ff   :  { %6980 = vmatpush1.bf16.msra.mxu1 %v9008_v60  ;;  %7040 = vmatprep.subr.bf16.mxu0 %v8683_v11  ;;  %v4037_v60 = vld [vmem:[%s12953_s3 + $0xf08] sm:$0xff]  ;;  %v8891_v15 = vcombine.high %v3846_v62, %v3850_v12 }
 0x300   :  { %6981 = vmatprep.subr.bf16.mxu1 %v9001_v44  ;;  %v4041_v11 = vld [vmem:[%s12953_s3 + $0xf28] sm:$0xff]  ;;  %v8898_v44 = vcombine.low %v3854_v30, %v3858_v39 }
 0x301   :  { %v9081_v23 = vcombine.high %v4037_v60, %v4041_v11  ;;  %v9080_v61 = vcombine.low %v4037_v60, %v4041_v11  ;;  %v3734_v11 = vld [vmem:[%s12953_s3 + $0x590] sm:$0xff] }
 0x302   :  { %7041 = vmatpush2.bf16.msra.mxu0 %v8682_v54  ;;  %v3842_v54 = vld [vmem:[%s12953_s3 + $0x8f0] sm:$0xff] }
 0x303   :  { %6982 = vmatpush1.bf16.msra.mxu1 %v9000_v51  ;;  %7042 = vmatprep.subr.bf16.mxu0 %v8675_v2  ;;  %v4029_v51 = vld [vmem:[%s12953_s3 + $0xec8] sm:$0xff]  ;;  %v8883_v28 = vcombine.high %v3838_v21, %v3842_v54 }
 0x304   :  { %6983 = vmatprep.subr.bf16.mxu1 %v8993_v22  ;;  %v4033_v2 = vld [vmem:[%s12953_s3 + $0xee8] sm:$0xff]  ;;  %v8890_v22 = vcombine.low %v3846_v62, %v3850_v12 }
 0x305   :  { %v9073_v0 = vcombine.high %v4029_v51, %v4033_v2  ;;  %v9072_v16 = vcombine.low %v4029_v51, %v4033_v2  ;;  %v3918_v2 = vld [vmem:[%s12953_s3 + $0xb50] sm:$0xff] }
 0x306   :  { %7043 = vmatpush2.bf16.msra.mxu0 %v8674_v4  ;;  %v3834_v4 = vld [vmem:[%s12953_s3 + $0x8b0] sm:$0xff] }
 0x307   :  { %6984 = vmatpush1.bf16.msra.mxu1 %v8992_v42  ;;  %7044 = vmatprep.subr.bf16.mxu0 %v8667_v29  ;;  %v4021_v42 = vld [vmem:[%s12953_s3 + $0xe88] sm:$0xff]  ;;  %v8875_v13 = vcombine.high %v3830_v24, %v3834_v4 }
 0x308   :  { %6985 = vmatprep.subr.bf16.mxu1 %v8985_v6  ;;  %v4025_v29 = vld [vmem:[%s12953_s3 + $0xea8] sm:$0xff]  ;;  %v8882_v6 = vcombine.low %v3838_v21, %v3842_v54 }
 0x309   :  { %v9065_v5 = vcombine.high %v4021_v42, %v4025_v29  ;;  %v9064_v35 = vcombine.low %v4021_v42, %v4025_v29  ;;  %v3910_v29 = vld [vmem:[%s12953_s3 + $0xb10] sm:$0xff] }
 0x30a   :  { %7045 = vmatpush2.bf16.msra.mxu0 %v8666_v18  ;;  %v3826_v18 = vld [vmem:[%s12953_s3 + $0x870] sm:$0xff] }
 0x30b   :  { %6986 = vmatpush1.bf16.msra.mxu1 %v8984_v19  ;;  %7100 = vmatprep.subr.bf16.mxu0 %v8915_v17  ;;  %v4013_v19 = vld [vmem:[%s12953_s3 + $0xe48] sm:$0xff]  ;;  %v8867_v33 = vcombine.high %v3822_v10, %v3826_v18 }
 0x30c   :  { %6987 = vmatprep.subr.bf16.mxu1 %v9105_v9  ;;  %v4017_v17 = vld [vmem:[%s12953_s3 + $0xe68] sm:$0xff]  ;;  %v8874_v9 = vcombine.low %v3830_v24, %v3834_v4 }
 0x30d   :  { %7047 = vmatmul.mubr.bf16.vlgmr.msra.gmra.mxu0 %v11209_v27  ;;  %v9057_v36 = vcombine.high %v4013_v19, %v4017_v17  ;;  %v9056_v30 = vcombine.low %v4013_v19, %v4017_v17  ;;  %v3902_v17 = vld [vmem:[%s12953_s3 + $0xad0] sm:$0xff] }
 0x30e   :  { %7101 = vmatpush1.bf16.msra.mxu0 %v8914_v56  ;;  %7132 = vmatprep.mubr.bf16.mxu0 %v11437_v57  ;;  %v3818_v56 = vld [vmem:[%s12953_s3 + $0x830] sm:$0xff] }
 0x30f   :  { %6988 = vmatpush2.bf16.msra.mxu1 %v9104_v38  ;;  %7102 = vmatprep.subr.bf16.mxu0 %v8907_v25  ;;  %v4005_v38 = vld [vmem:[%s12953_s3 + $0xe08] sm:$0xff]  ;;  %v8859_v39 = vcombine.high %v3814_v37, %v3818_v56 }
 0x310   :  { %6989 = vmatprep.subr.bf16.mxu1 %v9097_v26  ;;  %v4009_v25 = vld [vmem:[%s12953_s3 + $0xe28] sm:$0xff]  ;;  %v8866_v26 = vcombine.low %v3822_v10, %v3826_v18 }
 0x311   :  { %v9049_v46 = vcombine.high %v4005_v38, %v4009_v25  ;;  %v9048_v62 = vcombine.low %v4005_v38, %v4009_v25  ;;  %v3894_v25 = vld [vmem:[%s12953_s3 + $0xa90] sm:$0xff] }
 0x312   :  { %7103 = vmatpush1.bf16.msra.mxu0 %v8906_v47  ;;  %v3938_v47 = vld [vmem:[%s12953_s3 + $0xbf0] sm:$0xff] }
 0x313   :  { %6990 = vmatpush2.bf16.msra.mxu1 %v9096_v63  ;;  %7104 = vmatprep.subr.bf16.mxu0 %v8899_v1  ;;  %v3742_v63 = vld [vmem:[%s12953_s3 + $0x5d0] sm:$0xff]  ;;  %v8979_v12 = vcombine.high %v3934_v41, %v3938_v47 }
 0x314   :  { %6991 = vmatprep.subr.bf16.mxu1 %v9089_v49  ;;  %v3746_v1 = vld [vmem:[%s12953_s3 + $0x5f0] sm:$0xff]  ;;  %v8858_v49 = vcombine.low %v3814_v37, %v3818_v56 }
 0x315   :  { %v8787_v60 = vcombine.high %v3742_v63, %v3746_v1  ;;  %v8786_v21 = vcombine.low %v3742_v63, %v3746_v1  ;;  %v3886_v1 = vld [vmem:[%s12953_s3 + $0xa50] sm:$0xff] }
 0x316   :  { %7105 = vmatpush1.bf16.msra.mxu0 %v8898_v44  ;;  %v3738_v44 = vld [vmem:[%s12953_s3 + $0x5b0] sm:$0xff] }
 0x317   :  { %6992 = vmatpush2.bf16.msra.mxu1 %v9088_v50  ;;  %7106 = vmatprep.subr.bf16.mxu0 %v8891_v15  ;;  %v3926_v50 = vld [vmem:[%s12953_s3 + $0xb90] sm:$0xff]  ;;  %v8779_v54 = vcombine.high %v3734_v11, %v3738_v44  ;;  %v8778_v24 = vcombine.low %v3734_v11, %v3738_v44 }
 0x318   :  { %6993 = vmatprep.subr.bf16.mxu1 %v9081_v23  ;;  %v3930_v15 = vld [vmem:[%s12953_s3 + $0xbb0] sm:$0xff]  ;;  %v8978_v23 = vcombine.low %v3934_v41, %v3938_v47 }
 0x319   :  { %v8971_v51 = vcombine.high %v3926_v50, %v3930_v15 }
 0x31a   :  { %7107 = vmatpush1.bf16.msra.mxu0 %v8890_v22  ;;  %v3922_v22 = vld [vmem:[%s12953_s3 + $0xb70] sm:$0xff] }
 0x31b   :  { %6994 = vmatpush2.bf16.msra.mxu1 %v9080_v61  ;;  %7108 = vmatprep.subr.bf16.mxu0 %v8883_v28  ;;  %v3726_v61 = vld [vmem:[%s12953_s3 + $0x550] sm:$0xff]  ;;  %v8963_v4 = vcombine.high %v3918_v2, %v3922_v22 }
 0x31c   :  { %6995 = vmatprep.subr.bf16.mxu1 %v9073_v0  ;;  %v3730_v28 = vld [vmem:[%s12953_s3 + $0x570] sm:$0xff]  ;;  %v8970_v0 = vcombine.low %v3926_v50, %v3930_v15 }
 0x31d   :  { %v8771_v42 = vcombine.high %v3726_v61, %v3730_v28  ;;  %v8770_v10 = vcombine.low %v3726_v61, %v3730_v28  ;;  %v3878_v15 = vld [vmem:[%s12953_s3 + $0xa10] sm:$0xff]  ;;  %v3615_v28 = vld [vmem:[%s12953_s3 + $0x1d8] sm:$0xff] }
 0x31e   :  { %7109 = vmatpush1.bf16.msra.mxu0 %v8882_v6  ;;  %v3914_v6 = vld [vmem:[%s12953_s3 + $0xb30] sm:$0xff] }
 0x31f   :  { %6996 = vmatpush2.bf16.msra.mxu1 %v9072_v16  ;;  %7110 = vmatprep.subr.bf16.mxu0 %v8875_v13  ;;  %v3718_v16 = vld [vmem:[%s12953_s3 + $0x510] sm:$0xff]  ;;  %v8955_v18 = vcombine.high %v3910_v29, %v3914_v6 }
 0x320   :  { %6997 = vmatprep.subr.bf16.mxu1 %v9065_v5  ;;  %v3722_v13 = vld [vmem:[%s12953_s3 + $0x530] sm:$0xff]  ;;  %v8962_v5 = vcombine.low %v3918_v2, %v3922_v22 }
 0x321   :  { %v8763_v19 = vcombine.high %v3718_v16, %v3722_v13  ;;  %v8762_v37 = vcombine.low %v3718_v16, %v3722_v13  ;;  %v3607_v13 = vld [vmem:[%s12953_s3 + $0x198] sm:$0xff] }
 0x322   :  { %7111 = vmatpush1.bf16.msra.mxu0 %v8874_v9  ;;  %v3906_v9 = vld [vmem:[%s12953_s3 + $0xaf0] sm:$0xff] }
 0x323   :  { %6998 = vmatpush2.bf16.msra.mxu1 %v9064_v35  ;;  %7112 = vmatprep.subr.bf16.mxu0 %v8867_v33  ;;  %v3710_v35 = vld [vmem:[%s12953_s3 + $0x4d0] sm:$0xff]  ;;  %v8947_v56 = vcombine.high %v3902_v17, %v3906_v9 }
 0x324   :  { %6999 = vmatprep.subr.bf16.mxu1 %v9057_v36  ;;  %v3714_v33 = vld [vmem:[%s12953_s3 + $0x4f0] sm:$0xff]  ;;  %v8954_v36 = vcombine.low %v3910_v29, %v3914_v6 }
 0x325   :  { %v8755_v38 = vcombine.high %v3710_v35, %v3714_v33  ;;  %v8754_v41 = vcombine.low %v3710_v35, %v3714_v33  ;;  %v3790_v35 = vld [vmem:[%s12953_s3 + $0x750] sm:$0xff]  ;;  %v3599_v33 = vld [vmem:[%s12953_s3 + $0x158] sm:$0xff] }
 0x326   :  { %7113 = vmatpush1.bf16.msra.mxu0 %v8866_v26  ;;  %v3898_v26 = vld [vmem:[%s12953_s3 + $0xab0] sm:$0xff] }
 0x327   :  { %7000 = vmatpush2.bf16.msra.mxu1 %v9056_v30  ;;  %7114 = vmatprep.subr.bf16.mxu0 %v8859_v39  ;;  %v3702_v30 = vld [vmem:[%s12953_s3 + $0x490] sm:$0xff]  ;;  %v8939_v47 = vcombine.high %v3894_v25, %v3898_v26 }
 0x328   :  { %7001 = vmatprep.subr.bf16.mxu1 %v9049_v46  ;;  %v3706_v39 = vld [vmem:[%s12953_s3 + $0x4b0] sm:$0xff]  ;;  %v8946_v46 = vcombine.low %v3902_v17, %v3906_v9 }
 0x329   :  { %v8747_v63 = vcombine.high %v3702_v30, %v3706_v39  ;;  %v8746_v11 = vcombine.low %v3702_v30, %v3706_v39  ;;  %v3782_v30 = vld [vmem:[%s12953_s3 + $0x710] sm:$0xff]  ;;  %v3591_v39 = vld [vmem:[%s12953_s3 + $0x118] sm:$0xff] }
 0x32a   :  { %7115 = vmatpush1.bf16.msra.mxu0 %v8858_v49  ;;  %v3890_v49 = vld [vmem:[%s12953_s3 + $0xa70] sm:$0xff] }
 0x32b   :  { %7002 = vmatpush2.bf16.msra.mxu1 %v9048_v62  ;;  %7116 = vmatprep.subr.bf16.mxu0 %v8979_v12  ;;  %v3694_v62 = vld [vmem:[%s12953_s3 + $0x450] sm:$0xff]  ;;  %v8931_v44 = vcombine.high %v3886_v1, %v3890_v49 }
 0x32c   :  { %7057 = vmatprep.subr.bf16.mxu1 %v8787_v60  ;;  %v3698_v12 = vld [vmem:[%s12953_s3 + $0x470] sm:$0xff]  ;;  %v8938_v60 = vcombine.low %v3894_v25, %v3898_v26 }
 0x32d   :  { %v8739_v50 = vcombine.high %v3694_v62, %v3698_v12  ;;  %v8738_v2 = vcombine.low %v3694_v62, %v3698_v12  ;;  %v3583_v62 = vld [vmem:[%s12953_s3 + $0xd8] sm:$0xff] }
 0x32e   :  { %7004 = vmatmul.mubr.bf16.vlgmr.msra.gmra.mxu1 %v11620_v32  ;;  %7117 = vmatpush2.bf16.msra.mxu0 %v8978_v23  ;;  %v3882_v23 = vld [vmem:[%s12953_s3 + $0xa30] sm:$0xff] }
 0x32f   :  { %7058 = vmatpush1.bf16.msra.mxu1 %v8786_v21  ;;  %7089 = vmatprep.mubr.bf16.mxu1 %v11018_v8  ;;  %v3686_v21 = vld [vmem:[%s12953_s3 + $0x410] sm:$0xff]  ;;  %v8923_v22 = vcombine.high %v3878_v15, %v3882_v23 }
 0x330   :  { %7059 = vmatprep.subr.bf16.mxu1 %v8779_v54  ;;  %7118 = vmatprep.subr.bf16.mxu0 %v8971_v51  ;;  %v3690_v54 = vld [vmem:[%s12953_s3 + $0x430] sm:$0xff]  ;;  %v8930_v51 = vcombine.low %v3886_v1, %v3890_v49 }
 0x331   :  { %v8731_v61 = vcombine.high %v3686_v21, %v3690_v54  ;;  %v8730_v29 = vcombine.low %v3686_v21, %v3690_v54  ;;  %v3774_v49 = vld [vmem:[%s12953_s3 + $0x6d0] sm:$0xff]  ;;  %v3575_v21 = vld [vmem:[%s12953_s3 + $0x98] sm:$0xff] }
 0x332   :  { %7119 = vmatpush2.bf16.msra.mxu0 %v8970_v0  ;;  %v3619_v0 = vld [vmem:[%s12953_s3 + $0x1f8] sm:$0xff] }
 0x333   :  { %7060 = vmatpush1.bf16.msra.mxu1 %v8778_v24  ;;  %7120 = vmatprep.subr.bf16.mxu0 %v8963_v4  ;;  %v3806_v24 = vld [vmem:[%s12953_s3 + $0x7d0] sm:$0xff]  ;;  %v8661_v6 = vcombine.high %v3615_v28, %v3619_v0 }
 0x334   :  { %7061 = vmatprep.subr.bf16.mxu1 %v8771_v42  ;;  %v3810_v4 = vld [vmem:[%s12953_s3 + $0x7f0] sm:$0xff]  ;;  %v8922_v42 = vcombine.low %v3878_v15, %v3882_v23 }
 0x335   :  { %v8851_v16 = vcombine.high %v3806_v24, %v3810_v4  ;;  %v8850_v17 = vcombine.low %v3806_v24, %v3810_v4  ;;  %v3766_v23 = vld [vmem:[%s12953_s3 + $0x690] sm:$0xff]  ;;  %v3567_v24 = vld [vmem:[%s12953_s3 + $0x58] sm:$0xff] }
 0x336   :  { %7121 = vmatpush2.bf16.msra.mxu0 %v8962_v5  ;;  %v3611_v5 = vld [vmem:[%s12953_s3 + $0x1b8] sm:$0xff] }
 0x337   :  { %7062 = vmatpush1.bf16.msra.mxu1 %v8770_v10  ;;  %7122 = vmatprep.subr.bf16.mxu0 %v8955_v18  ;;  %v3798_v10 = vld [vmem:[%s12953_s3 + $0x790] sm:$0xff]  ;;  %v8653_v9 = vcombine.high %v3607_v13, %v3611_v5 }
 0x338   :  { %7063 = vmatprep.subr.bf16.mxu1 %v8763_v19  ;;  %v3802_v18 = vld [vmem:[%s12953_s3 + $0x7b0] sm:$0xff]  ;;  %v8660_v19 = vcombine.low %v3615_v28, %v3619_v0 }
 0x339   :  { %v8842_v25 = vcombine.low %v3798_v10, %v3802_v18  ;;  %v3758_v0 = vld [vmem:[%s12953_s3 + $0x650] sm:$0xff] }
 0x33a   :  { %7123 = vmatpush2.bf16.msra.mxu0 %v8954_v36  ;;  %v8843_v36 = vcombine.high %v3798_v10, %v3802_v18  ;;  %v3559_v10 = vld [vmem:[%s12953_s3 + $0x18] sm:$0xff] }
 0x33b   :  { %7064 = vmatpush1.bf16.msra.mxu1 %v8762_v37  ;;  %7124 = vmatprep.subr.bf16.mxu0 %v8947_v56  ;;  %v3603_v37 = vld [vmem:[%s12953_s3 + $0x178] sm:$0xff]  ;;  %v3794_v56 = vld [vmem:[%s12953_s3 + $0x770] sm:$0xff] }
 0x33c   :  { %7065 = vmatprep.subr.bf16.mxu1 %v8755_v38  ;;  %v8652_v38 = vcombine.low %v3607_v13, %v3611_v5  ;;  %v8645_v26 = vcombine.high %v3599_v33, %v3603_v37  ;;  %v3750_v5 = vld [vmem:[%s12953_s3 + $0x610] sm:$0xff] }
 0x33e   :  { %7125 = vmatpush2.bf16.msra.mxu0 %v8946_v46  ;;  %v8835_v46 = vcombine.high %v3790_v35, %v3794_v56 }
 0x33f   :  { %7066 = vmatpush1.bf16.msra.mxu1 %v8754_v41  ;;  %7126 = vmatprep.subr.bf16.mxu0 %v8939_v47  ;;  %v3595_v41 = vld [vmem:[%s12953_s3 + $0x138] sm:$0xff]  ;;  %v8644_v47 = vcombine.low %v3599_v33, %v3603_v37 }
 0x340   :  { %7067 = vmatprep.subr.bf16.mxu1 %v8747_v63  ;;  %v8834_v63 = vcombine.low %v3790_v35, %v3794_v56  ;;  %v8637_v1 = vcombine.high %v3591_v39, %v3595_v41  ;;  %v3679_v37 = vld [vmem:[%s12953_s3 + $0x3d8] sm:$0xff] }
 0x342   :  { %7127 = vmatpush2.bf16.msra.mxu0 %v8938_v60  ;;  %v3587_v60 = vld [vmem:[%s12953_s3 + $0xf8] sm:$0xff] }
 0x343   :  { %7068 = vmatpush1.bf16.msra.mxu1 %v8746_v11  ;;  %7128 = vmatprep.subr.bf16.mxu0 %v8931_v44  ;;  %v3778_v11 = vld [vmem:[%s12953_s3 + $0x6f0] sm:$0xff]  ;;  %v8636_v44 = vcombine.low %v3591_v39, %v3595_v41  ;;  %v8629_v15 = vcombine.high %v3583_v62, %v3587_v60 }
 0x344   :  { %7069 = vmatprep.subr.bf16.mxu1 %v8739_v50  ;;  %v8819_v54 = vcombine.high %v3774_v49, %v3778_v11  ;;  %v3994_v41 = vld [vmem:[%s12953_s3 + $0xdb0] sm:$0xff] }
 0x346   :  { %7129 = vmatpush2.bf16.msra.mxu0 %v8930_v51  ;;  %v3579_v51 = vld [vmem:[%s12953_s3 + $0xb8] sm:$0xff] }
 0x347   :  { %7070 = vmatpush1.bf16.msra.mxu1 %v8738_v2  ;;  %7130 = vmatprep.subr.bf16.mxu0 %v8923_v22  ;;  %v3770_v2 = vld [vmem:[%s12953_s3 + $0x6b0] sm:$0xff]  ;;  %v8628_v22 = vcombine.low %v3583_v62, %v3587_v60  ;;  %v8621_v28 = vcombine.high %v3575_v21, %v3579_v51  ;;  %v3663_v60 = vld [vmem:[%s12953_s3 + $0x358] sm:$0xff] }
 0x348   :  { %7071 = vmatprep.subr.bf16.mxu1 %v8731_v61  ;;  %v8818_v61 = vcombine.low %v3774_v49, %v3778_v11  ;;  %v8811_v4 = vcombine.high %v3766_v23, %v3770_v2  ;;  %v3982_v62 = vld [vmem:[%s12953_s3 + $0xd50] sm:$0xff]  ;;  %v3667_v11 = vld [vmem:[%s12953_s3 + $0x378] sm:$0xff] }
 0x34a   :  { %7131 = vmatpush2.bf16.msra.mxu0 %v8922_v42  ;;  %v3571_v42 = vld [vmem:[%s12953_s3 + $0x78] sm:$0xff] }
 0x34b   :  { %7072 = vmatpush1.bf16.msra.mxu1 %v8730_v29  ;;  %7186 = vmatprep.subr.bf16.mxu0 %v8661_v6  ;;  %v3762_v29 = vld [vmem:[%s12953_s3 + $0x670] sm:$0xff]  ;;  %v8620_v6 = vcombine.low %v3575_v21, %v3579_v51  ;;  %v8613_v13 = vcombine.high %v3567_v24, %v3571_v42  ;;  %v8709_v21 = vcombine.high %v3663_v60, %v3667_v11 }
 0x34c   :  { %7073 = vmatprep.subr.bf16.mxu1 %v8851_v16  ;;  %v8810_v16 = vcombine.low %v3766_v23, %v3770_v2  ;;  %v8803_v18 = vcombine.high %v3758_v0, %v3762_v29  ;;  %v8802_v35 = vcombine.low %v3758_v0, %v3762_v29  ;;  %v3978_v51 = vld [vmem:[%s12953_s3 + $0xd30] sm:$0xff]  ;;  %v3655_v2 = vld [vmem:[%s12953_s3 + $0x318] sm:$0xff] }
 0x34d   :  { %7133 = vmatmul.mubr.bf16.vlgmr.msra.gmra.mxu0 %v11442_v59  ;;  %v3647_v29 = vld [vmem:[%s12953_s3 + $0x2d8] sm:$0xff] }
 0x34e   :  { %7187 = vmatpush1.bf16.msra.mxu0 %v8660_v19  ;;  %7218 = vmatprep.mubr.bf16.mxu0 %v11012_v3  ;;  %v3786_v3 = vld [vmem:[%s12953_s3 + $0x730] sm:$0xff]  ;;  %v3563_v19 = vld [vmem:[%s12953_s3 + $0x38] sm:$0xff] }
 0x34f   :  { %7074 = vmatpush2.bf16.msra.mxu1 %v8850_v17  ;;  %7188 = vmatprep.subr.bf16.mxu0 %v8653_v9  ;;  %v8827_v12 = vcombine.high %v3782_v30, %v3786_v3  ;;  %v8826_v50 = vcombine.low %v3782_v30, %v3786_v3  ;;  %v3754_v17 = vld [vmem:[%s12953_s3 + $0x630] sm:$0xff]  ;;  %v8612_v9 = vcombine.low %v3567_v24, %v3571_v42 }
 0x350   :  { %7075 = vmatprep.subr.bf16.mxu1 %v8843_v36  ;;  %v8605_v33 = vcombine.high %v3559_v10, %v3563_v19  ;;  %v3998_v36 = vld [vmem:[%s12953_s3 + $0xdd0] sm:$0xff]  ;;  %v8795_v56 = vcombine.high %v3750_v5, %v3754_v17  ;;  %v8794_v30 = vcombine.low %v3750_v5, %v3754_v17 }
 0x351   :  { %v3970_v42 = vld [vmem:[%s12953_s3 + $0xcf0] sm:$0xff] }
 0x352   :  { %7189 = vmatpush1.bf16.msra.mxu0 %v8652_v38  ;;  %v3683_v38 = vld [vmem:[%s12953_s3 + $0x3f8] sm:$0xff] }
 0x353   :  { %7076 = vmatpush2.bf16.msra.mxu1 %v8842_v25  ;;  %7190 = vmatprep.subr.bf16.mxu0 %v8645_v26  ;;  %v4002_v25 = vld [vmem:[%s12953_s3 + $0xdf0] sm:$0xff]  ;;  %v8604_v26 = vcombine.low %v3559_v10, %v3563_v19  ;;  %v8725_v39 = vcombine.high %v3679_v37, %v3683_v38  ;;  %v3643_v19 = vld [vmem:[%s12953_s3 + $0x2b8] sm:$0xff] }
 0x354   :  { %7077 = vmatprep.subr.bf16.mxu1 %v8835_v46  ;;  %v3990_v46 = vld [vmem:[%s12953_s3 + $0xd90] sm:$0xff]  ;;  %v9043_v3 = vcombine.high %v3998_v36, %v4002_v25  ;;  %v9042_v49 = vcombine.low %v3998_v36, %v4002_v25  ;;  %v3631_v25 = vld [vmem:[%s12953_s3 + $0x258] sm:$0xff] }
 0x355   :  { %v9034_v23 = vcombine.low %v3990_v46, %v3994_v41 }
 0x356   :  { %7191 = vmatpush1.bf16.msra.mxu0 %v8644_v47  ;;  %v3671_v47 = vld [vmem:[%s12953_s3 + $0x398] sm:$0xff] }
 0x357   :  { %7078 = vmatpush2.bf16.msra.mxu1 %v8834_v63  ;;  %7192 = vmatprep.subr.bf16.mxu0 %v8637_v1  ;;  %v3675_v63 = vld [vmem:[%s12953_s3 + $0x3b8] sm:$0xff]  ;;  %v8724_v1 = vcombine.low %v3679_v37, %v3683_v38  ;;  %v3954_v38 = vld [vmem:[%s12953_s3 + $0xc70] sm:$0xff] }
 0x358   :  { %7079 = vmatprep.subr.bf16.mxu1 %v8827_v12  ;;  %v3986_v12 = vld [vmem:[%s12953_s3 + $0xd70] sm:$0xff] }
 0x359   :  { %v9026_v0 = vcombine.low %v3982_v62, %v3986_v12 }
 0x35a   :  { %7193 = vmatpush1.bf16.msra.mxu0 %v8636_v44  ;;  %v9035_v44 = vcombine.high %v3990_v46, %v3994_v41 }
 0x35b   :  { %7080 = vmatpush2.bf16.msra.mxu1 %v8826_v50  ;;  %7194 = vmatprep.subr.bf16.mxu0 %v8629_v15  ;;  %v8717_v50 = vcombine.high %v3671_v47, %v3675_v63  ;;  %v8716_v15 = vcombine.low %v3671_v47, %v3675_v63  ;;  %v3946_v47 = vld [vmem:[%s12953_s3 + $0xc30] sm:$0xff]  ;;  %v3623_v63 = vld [vmem:[%s12953_s3 + $0x218] sm:$0xff] }
 0x35c   :  { %7081 = vmatprep.subr.bf16.mxu1 %v8819_v54  ;;  %v3974_v54 = vld [vmem:[%s12953_s3 + $0xd10] sm:$0xff] }
 0x35d   :  { %v9018_v5 = vcombine.low %v3974_v54, %v3978_v51 }
 0x35e   :  { %7195 = vmatpush1.bf16.msra.mxu0 %v8628_v22  ;;  %v3659_v22 = vld [vmem:[%s12953_s3 + $0x338] sm:$0xff] }
 0x35f   :  { %7082 = vmatpush2.bf16.msra.mxu1 %v8818_v61  ;;  %7196 = vmatprep.subr.bf16.mxu0 %v8621_v28  ;;  %v9027_v61 = vcombine.high %v3982_v62, %v3986_v12  ;;  %v8708_v28 = vcombine.low %v3663_v60, %v3667_v11  ;;  %v8701_v24 = vcombine.high %v3655_v2, %v3659_v22  ;;  %v4062_v11 = vld [vmem:[%s12953_s3 + $0xfd0] sm:$0xff] }
 0x360   :  { %7083 = vmatprep.subr.bf16.mxu1 %v8811_v4  ;;  %v3966_v4 = vld [vmem:[%s12953_s3 + $0xcd0] sm:$0xff] }
 0x361   :  { %v9011_v17 = vcombine.high %v3966_v4, %v3970_v42  ;;  %v9010_v36 = vcombine.low %v3966_v4, %v3970_v42  ;;  %v12307_v42 = vpop.f32.mrf.mxu1 }
 0x362   :  { %7197 = vmatpush1.bf16.msra.mxu0 %v8620_v6  ;;  %v3651_v6 = vld [vmem:[%s12953_s3 + $0x2f8] sm:$0xff] }
 0x363   :  { %7084 = vmatpush2.bf16.msra.mxu1 %v8810_v16  ;;  %7198 = vmatprep.subr.bf16.mxu0 %v8613_v13  ;;  %v9019_v16 = vcombine.high %v3974_v54, %v3978_v51  ;;  %v8700_v13 = vcombine.low %v3655_v2, %v3659_v22  ;;  %v8693_v10 = vcombine.high %v3647_v29, %v3651_v6  ;;  %v3863_v22 = vld [vmem:[%s12953_s3 + $0x998] sm:$0xff] }
 0x364   :  { %7085 = vmatprep.subr.bf16.mxu1 %v8803_v18  ;;  %v3639_v18 = vld [vmem:[%s12953_s3 + $0x298] sm:$0xff] }
 0x365   :  { %v8685_v37 = vcombine.high %v3639_v18, %v3643_v19 }
 0x366   :  { %7199 = vmatpush1.bf16.msra.mxu0 %v8612_v9  ;;  %v3958_v9 = vld [vmem:[%s12953_s3 + $0xc90] sm:$0xff] }
 0x367   :  { %7086 = vmatpush2.bf16.msra.mxu1 %v8802_v35  ;;  %7200 = vmatprep.subr.bf16.mxu0 %v8605_v33  ;;  %v3962_v35 = vld [vmem:[%s12953_s3 + $0xcb0] sm:$0xff]  ;;  %v8692_v33 = vcombine.low %v3647_v29, %v3651_v6 }
 0x368   :  { %7087 = vmatprep.subr.bf16.mxu1 %v8795_v56  ;;  %v3950_v56 = vld [vmem:[%s12953_s3 + $0xc50] sm:$0xff]  ;;  %v9002_v46 = vcombine.low %v3958_v9, %v3962_v35 }
 0x369   :  { %v8994_v12 = vcombine.low %v3950_v56, %v3954_v38 }
 0x36a   :  { %7201 = vmatpush1.bf16.msra.mxu0 %v8604_v26  ;;  %v3635_v26 = vld [vmem:[%s12953_s3 + $0x278] sm:$0xff] }
 0x36b   :  { %7088 = vmatpush2.bf16.msra.mxu1 %v8794_v30  ;;  %7202 = vmatprep.subr.bf16.mxu0 %v8725_v39  ;;  %v9003_v30 = vcombine.high %v3958_v9, %v3962_v35  ;;  %v8684_v39 = vcombine.low %v3639_v18, %v3643_v19  ;;  %v8677_v41 = vcombine.high %v3631_v25, %v3635_v26  ;;  %v4046_v18 = vld [vmem:[%s12953_s3 + $0xf50] sm:$0xff]  ;;  %v12325_v9 = vpop.f32.mrf.mxu1 }
 0x36c   :  { %7143 = vmatprep.subr.bf16.mxu1 %v9043_v3  ;;  %v3942_v3 = vld [vmem:[%s12953_s3 + $0xc10] sm:$0xff]  ;;  %v8676_v62 = vcombine.low %v3631_v25, %v3635_v26 }
 0x36d   :  { %v8986_v54 = vcombine.low %v3942_v3, %v3946_v47  ;;  %v4050_v19 = vld [vmem:[%s12953_s3 + $0xf70] sm:$0xff]  ;;  %v12341_v26 = vpop.f32.mrf.mxu1 }
 0x36e   :  { %7090 = vmatmul.mubr.bf16.vlgmr.msra.gmra.mxu1 %v11220_v48  ;;  %7203 = vmatpush2.bf16.msra.mxu0 %v8724_v1  ;;  %v3627_v1 = vld [vmem:[%s12953_s3 + $0x238] sm:$0xff] }
 0x36f   :  { %7144 = vmatpush1.bf16.msra.mxu1 %v9042_v49  ;;  %7175 = vmatprep.mubr.bf16.mxu1 %v11611_v55  ;;  %v8995_v49 = vcombine.high %v3950_v56, %v3954_v38  ;;  %v8669_v60 = vcombine.high %v3623_v63, %v3627_v1  ;;  %v4042_v38 = vld [vmem:[%s12953_s3 + $0xf30] sm:$0xff] }
 0x370   :  { %7145 = vmatprep.subr.bf16.mxu1 %v9035_v44  ;;  %7204 = vmatprep.subr.bf16.mxu0 %v8717_v50  ;;  %v4066_v44 = vld [vmem:[%s12953_s3 + $0xff0] sm:$0xff]  ;;  %v3871_v50 = vld [vmem:[%s12953_s3 + $0x9d8] sm:$0xff] }
 0x371   :  { %v9107_v2 = vcombine.high %v4062_v11, %v4066_v44  ;;  %v9106_v29 = vcombine.low %v4062_v11, %v4066_v44 }
 0x372   :  { %7205 = vmatpush2.bf16.msra.mxu0 %v8716_v15  ;;  %v3875_v15 = vld [vmem:[%s12953_s3 + $0x9f8] sm:$0xff] }
 0x373   :  { %7146 = vmatpush1.bf16.msra.mxu1 %v9034_v23  ;;  %7206 = vmatprep.subr.bf16.mxu0 %v8709_v21  ;;  %v8987_v23 = vcombine.high %v3942_v3, %v3946_v47  ;;  %v8668_v21 = vcombine.low %v3623_v63, %v3627_v1  ;;  %v8917_v51 = vcombine.high %v3871_v50, %v3875_v15  ;;  %v3843_v3 = vld [vmem:[%s12953_s3 + $0x8f8] sm:$0xff]  ;;  %v4030_v63 = vld [vmem:[%s12953_s3 + $0xed0] sm:$0xff] }
 0x374   :  { %7147 = vmatprep.subr.bf16.mxu1 %v9027_v61  ;;  %v3867_v61 = vld [vmem:[%s12953_s3 + $0x9b8] sm:$0xff]  ;;  %v8916_v4 = vcombine.low %v3871_v50, %v3875_v15  ;;  %v4034_v1 = vld [vmem:[%s12953_s3 + $0xef0] sm:$0xff] }
 0x375   :  { %v8909_v6 = vcombine.high %v3863_v22, %v3867_v61  ;;  %v9075_v44 = vcombine.high %v4030_v63, %v4034_v1  ;;  %v3831_v50 = vld [vmem:[%s12953_s3 + $0x898] sm:$0xff] }
 0x376   :  { %7207 = vmatpush2.bf16.msra.mxu0 %v8708_v28  ;;  %v12299_v28 = vpop.f32.mrf.mxu0  ;;  %v3835_v15 = vld [vmem:[%s12953_s3 + $0x8b8] sm:$0xff] }
 0x377   :  { %7148 = vmatpush1.bf16.msra.mxu1 %v9026_v0  ;;  %7208 = vmatprep.subr.bf16.mxu0 %v8701_v24  ;;  %v4054_v0 = vld [vmem:[%s12953_s3 + $0xf90] sm:$0xff] }
 0x378   :  { %7149 = vmatprep.subr.bf16.mxu1 %v9019_v16  ;;  %v4058_v24 = vld [vmem:[%s12953_s3 + $0xfb0] sm:$0xff] }
 0x379   :  { %v9099_v16 = vcombine.high %v4054_v0, %v4058_v24  ;;  %v9098_v35 = vcombine.low %v4054_v0, %v4058_v24  ;;  %v3823_v24 = vld [vmem:[%s12953_s3 + $0x858] sm:$0xff] }
 0x37a   :  { %7209 = vmatpush2.bf16.msra.mxu0 %v8700_v13  ;;  %v3855_v13 = vld [vmem:[%s12953_s3 + $0x958] sm:$0xff] }
 0x37b   :  { %7150 = vmatpush1.bf16.msra.mxu1 %v9018_v5  ;;  %7210 = vmatprep.subr.bf16.mxu0 %v8693_v10  ;;  %v3859_v5 = vld [vmem:[%s12953_s3 + $0x978] sm:$0xff]  ;;  %v12315_v10 = vpop.f32.mrf.mxu0 }
 0x37c   :  { %7151 = vmatprep.subr.bf16.mxu1 %v9011_v17  ;;  %v8908_v17 = vcombine.low %v3863_v22, %v3867_v61  ;;  %v8900_v25 = vcombine.low %v3855_v13, %v3859_v5  ;;  %v9074_v22 = vcombine.low %v4030_v63, %v4034_v1  ;;  %v8877_v61 = vcombine.high %v3831_v50, %v3835_v15  ;;  %v3935_v63 = vld [vmem:[%s12953_s3 + $0xbd8] sm:$0xff] }
 0x37d   :  { %v12333_v56 = vpop.f32.mrf.mxu0  ;;  %v3939_v1 = vld [vmem:[%s12953_s3 + $0xbf8] sm:$0xff] }
 0x37e   :  { %7211 = vmatpush2.bf16.msra.mxu0 %v8692_v33  ;;  %v8901_v33 = vcombine.high %v3855_v13, %v3859_v5  ;;  %v4018_v13 = vld [vmem:[%s12953_s3 + $0xe70] sm:$0xff] }
 0x37f   :  { %7152 = vmatpush1.bf16.msra.mxu1 %v9010_v36  ;;  %7212 = vmatprep.subr.bf16.mxu0 %v8685_v37  ;;  %v3847_v36 = vld [vmem:[%s12953_s3 + $0x918] sm:$0xff]  ;;  %v6710_v47 = vpop.f32.mrf.mxu0 }
 0x380   :  { %7153 = vmatprep.subr.bf16.mxu1 %v9003_v30  ;;  %v3851_v37 = vld [vmem:[%s12953_s3 + $0x938] sm:$0xff]  ;;  %v9090_v30 = vcombine.low %v4046_v18, %v4050_v19 }
 0x382   :  { %7213 = vmatpush2.bf16.msra.mxu0 %v8684_v39  ;;  %v8893_v39 = vcombine.high %v3847_v36, %v3851_v37 }
 0x383   :  { %7154 = vmatpush1.bf16.msra.mxu1 %v9002_v46  ;;  %7214 = vmatprep.subr.bf16.mxu0 %v8677_v41  ;;  %v3839_v41 = vld [vmem:[%s12953_s3 + $0x8d8] sm:$0xff] }
 0x384   :  { %7155 = vmatprep.subr.bf16.mxu1 %v8995_v49  ;;  %v8892_v49 = vcombine.low %v3847_v36, %v3851_v37  ;;  %v8885_v11 = vcombine.high %v3839_v41, %v3843_v3  ;;  %v3815_v36 = vld [vmem:[%s12953_s3 + $0x818] sm:$0xff] }
 0x385   :  { %v3819_v37 = vld [vmem:[%s12953_s3 + $0x838] sm:$0xff] }
 0x386   :  { %7215 = vmatpush2.bf16.msra.mxu0 %v8676_v62  ;;  %v6753_v62 = vpop.f32.mrf.mxu1 }
 0x387   :  { %7156 = vmatpush1.bf16.msra.mxu1 %v8994_v12  ;;  %7216 = vmatprep.subr.bf16.mxu0 %v8669_v60  ;;  %v12355_v12 = vpop.f32.mrf.mxu0 }
 0x388   :  { %7157 = vmatprep.subr.bf16.mxu1 %v8987_v23  ;;  %v12363_v23 = vpop.f32.mrf.mxu1 }
 0x38a   :  { %7217 = vmatpush2.bf16.msra.mxu0 %v8668_v21  ;;  %v4022_v21 = vld [vmem:[%s12953_s3 + $0xe90] sm:$0xff] }
 0x38b   :  { %7158 = vmatpush1.bf16.msra.mxu1 %v8986_v54  ;;  %7272 = vmatprep.subr.bf16.mxu0 %v8917_v51  ;;  %v4026_v54 = vld [vmem:[%s12953_s3 + $0xeb0] sm:$0xff]  ;;  %v8884_v51 = vcombine.low %v3839_v41, %v3843_v3  ;;  %v8861_v41 = vcombine.high %v3815_v36, %v3819_v37 }
 0x38c   :  { %7159 = vmatprep.subr.bf16.mxu1 %v9107_v2  ;;  %v6792_v2 = vpop.f32.mrf.mxu0  ;;  %v9067_v0 = vcombine.high %v4022_v21, %v4026_v54 }
 0x38d   :  { %7219 = vmatmul.mubr.bf16.vlgmr.msra.gmra.mxu0 %v11209_v27  ;;  %v9091_v27 = vcombine.high %v4046_v18, %v4050_v19  ;;  %v8876_v18 = vcombine.low %v3831_v50, %v3835_v15  ;;  %v8981_v15 = vcombine.high %v3935_v63, %v3939_v1 }
 0x38e   :  { %7273 = vmatpush1.bf16.msra.mxu0 %v8916_v4  ;;  %7304 = vmatprep.mubr.bf16.mxu0 %v11437_v57  ;;  %v4038_v57 = vld [vmem:[%s12953_s3 + $0xf10] sm:$0xff]  ;;  %v3827_v4 = vld [vmem:[%s12953_s3 + $0x878] sm:$0xff]  ;;  %v12391_v19 = vpop.f32.mrf.mxu0 }
 0x38f   :  { %7160 = vmatpush2.bf16.msra.mxu1 %v9106_v29  ;;  %7274 = vmatprep.subr.bf16.mxu0 %v8909_v6  ;;  %v9083_v46 = vcombine.high %v4038_v57, %v4042_v38  ;;  %v9082_v60 = vcombine.low %v4038_v57, %v4042_v38  ;;  %v12380_v29 = vld [vmem:[%s12955_s4] sm:$0xff]  ;;  %v6835_v6 = vpop.f32.mrf.mxu1  ;;  %v4006_v57 = vld [vmem:[%s12953_s3 + $0xe10] sm:$0xff] }
 0x390   :  { %7161 = vmatprep.subr.bf16.mxu1 %v9099_v16  ;;  %v4014_v16 = vld [vmem:[%s12953_s3 + $0xe50] sm:$0xff]  ;;  %v4077_v5 = vrot.slane %v12380_v29, %v494_v7 }
 0x391   :  { %v12399_v7 = vpop.f32.mrf.mxu1  ;;  %v4010_v38 = vld [vmem:[%s12953_s3 + $0xe30] sm:$0xff] }
 0x392   :  { %7275 = vmatpush1.bf16.msra.mxu0 %v8908_v17  ;;  %v9066_v17 = vcombine.low %v4022_v21, %v4026_v54  ;;  %v9050_v50 = vcombine.low %v4006_v57, %v4010_v38 }
 0x393   :  { %7162 = vmatpush2.bf16.msra.mxu1 %v9098_v35  ;;  %7276 = vmatprep.subr.bf16.mxu0 %v8901_v33  ;;  %v8869_v35 = vcombine.high %v3823_v24, %v3827_v4  ;;  %v6711_v33 = vadd.f32 %v6710_v47, %v4077_v5  ;;  %v9051_v47 = vcombine.high %v4006_v57, %v4010_v38  ;;  %v3911_v38 = vld [vmem:[%s12953_s3 + $0xb18] sm:$0xff] }
 0x394   :  { %7163 = vmatprep.subr.bf16.mxu1 %v9091_v27  ;;  %v9059_v27 = vcombine.high %v4014_v16, %v4018_v13 }
 0x395   :  { %v6754_v3 = vadd.f32 %v6753_v62, %v6711_v33 }
 0x396   :  { %7277 = vmatpush1.bf16.msra.mxu0 %v8900_v25  ;;  %v6707_v25 = vadd.f32 %v12315_v10, %v4077_v5  ;;  %v3743_v10 = vld [vmem:[%s12953_s3 + $0x5d8] sm:$0xff] }
 0x397   :  { %7164 = vmatpush2.bf16.msra.mxu1 %v9090_v30  ;;  %7278 = vmatprep.subr.bf16.mxu0 %v8893_v39  ;;  %v8868_v30 = vcombine.low %v3823_v24, %v3827_v4  ;;  %v6796_v39 = vpop.f32.mrf.mxu0  ;;  %v8980_v24 = vcombine.low %v3935_v63, %v3939_v1  ;;  %v3903_v63 = vld [vmem:[%s12953_s3 + $0xad8] sm:$0xff] }
 0x398   :  { %7165 = vmatprep.subr.bf16.mxu1 %v9083_v46  ;;  %v9058_v46 = vcombine.low %v4014_v16, %v4018_v13  ;;  %v6750_v62 = vadd.f32 %v12325_v9, %v6707_v25  ;;  %v3927_v9 = vld [vmem:[%s12953_s3 + $0xb98] sm:$0xff] }
 0x399   :  { %v3915_v25 = vld [vmem:[%s12953_s3 + $0xb38] sm:$0xff] }
 0x39a   :  { %7279 = vmatpush1.bf16.msra.mxu0 %v8892_v49  ;;  %v6839_v49 = vpop.f32.mrf.mxu1  ;;  %v6793_v21 = vadd.f32 %v6792_v2, %v6750_v62  ;;  %v3907_v1 = vld [vmem:[%s12953_s3 + $0xaf8] sm:$0xff] }
 0x39b   :  { %7166 = vmatpush2.bf16.msra.mxu1 %v9082_v60  ;;  %7280 = vmatprep.subr.bf16.mxu0 %v8885_v11  ;;  %v3747_v60 = vld [vmem:[%s12953_s3 + $0x5f8] sm:$0xff]  ;;  %v6797_v11 = vadd.f32 %v6796_v39, %v6754_v3 }
 0x39c   :  { %7167 = vmatprep.subr.bf16.mxu1 %v9075_v44  ;;  %v8860_v44 = vcombine.low %v3815_v36, %v3819_v37  ;;  %v6836_v2 = vadd.f32 %v6835_v6, %v6793_v21  ;;  %v8788_v4 = vcombine.low %v3743_v10, %v3747_v60  ;;  %v3727_v6 = vld [vmem:[%s12953_s3 + $0x558] sm:$0xff] }
 0x39d   :  { %v6840_v54 = vadd.f32 %v6839_v49, %v6797_v11  ;;  %v3711_v49 = vld [vmem:[%s12953_s3 + $0x4d8] sm:$0xff]  ;;  %v8949_v11 = vcombine.high %v3903_v63, %v3907_v1 }
 0x39e   :  { %7281 = vmatpush1.bf16.msra.mxu0 %v8884_v51  ;;  %v8789_v51 = vcombine.high %v3743_v10, %v3747_v60  ;;  %v3715_v10 = vld [vmem:[%s12953_s3 + $0x4f8] sm:$0xff]  ;;  %v8956_v60 = vcombine.low %v3911_v38, %v3915_v25 }
 0x39f   :  { %7168 = vmatpush2.bf16.msra.mxu1 %v9074_v22  ;;  %7282 = vmatprep.subr.bf16.mxu0 %v8877_v61  ;;  %v3735_v22 = vld [vmem:[%s12953_s3 + $0x598] sm:$0xff]  ;;  %v12433_v16 = vpack.c.bf16 %v6840_v54, %v6836_v2 }
 0x3a0   :  { %7169 = vmatprep.subr.bf16.mxu1 %v9067_v0  ;;  %v3739_v61 = vld [vmem:[%s12953_s3 + $0x5b8] sm:$0xff] }
 0x3a1   :  { %v3931_v0 = vld [vmem:[%s12953_s3 + $0xbb8] sm:$0xff]  ;;  %v8781_v13 = vcombine.high %v3735_v22, %v3739_v61  ;;  %v7375_v37 = vmin.bf16 %v9398_v31, %v12433_v16  ;;  %vm7367_vm8 = vcmp.gt.bf16.partialorder %v12433_v16, 0 }
 0x3a2   :  { %7283 = vmatpush1.bf16.msra.mxu0 %v8876_v18  ;;  %v8973_v5 = vcombine.high %v3927_v9, %v3931_v0  ;;  %v3919_v18 = vld [vmem:[%s12953_s3 + $0xb58] sm:$0xff]  ;;  %v8972_v33 = vcombine.low %v3927_v9, %v3931_v0 }
 0x3a3   :  { %7170 = vmatpush2.bf16.msra.mxu1 %v9066_v17  ;;  %7284 = vmatprep.subr.bf16.mxu0 %v8869_v35  ;;  %v3923_v17 = vld [vmem:[%s12953_s3 + $0xb78] sm:$0xff]  ;;  %v7386_v3 = vmul.bf16 1069105081, %v7375_v37 }
 0x3a4   :  { %7171 = vmatprep.subr.bf16.mxu1 %v9059_v27  ;;  %v3731_v35 = vld [vmem:[%s12953_s3 + $0x578] sm:$0xff]  ;;  %v8780_v27 = vcombine.low %v3735_v22, %v3739_v61  ;;  %v8965_v36 = vcombine.high %v3919_v18, %v3923_v17  ;;  %v8964_v39 = vcombine.low %v3919_v18, %v3923_v17  ;;  %v8756_v22 = vcombine.low %v3711_v49, %v3715_v10 }
 0x3a5   :  { %v8773_v57 = vcombine.high %v3727_v6, %v3731_v35  ;;  %9364 = vpow.bf16 %v7386_v3  ;;  %v3703_v21 = vld [vmem:[%s12953_s3 + $0x498] sm:$0xff] }
 0x3a6   :  { %7285 = vmatpush1.bf16.msra.mxu0 %v8868_v30  ;;  %v3723_v30 = vld [vmem:[%s12953_s3 + $0x538] sm:$0xff] }
 0x3a7   :  { %7172 = vmatpush2.bf16.msra.mxu1 %v9058_v46  ;;  %7286 = vmatprep.subr.bf16.mxu0 %v8861_v41  ;;  %v8772_v46 = vcombine.low %v3727_v6, %v3731_v35  ;;  %v8957_v41 = vcombine.high %v3911_v38, %v3915_v25  ;;  %v3707_v54 = vld [vmem:[%s12953_s3 + $0x4b8] sm:$0xff] }
 0x3a8   :  { %7173 = vmatprep.subr.bf16.mxu1 %v9051_v47  ;;  %v8749_v9 = vcombine.high %v3703_v21, %v3707_v54  ;;  %v3887_v0 = vld [vmem:[%s12953_s3 + $0xa58] sm:$0xff]  ;;  %v8748_v17 = vcombine.low %v3703_v21, %v3707_v54  ;;  %v9287_v21 = vld [vmem:[%s12954_s5 + $0x30] sm:$0xff]  }
 0x3a9   :  { %v3891_v2 = vld [vmem:[%s12953_s3 + $0xa78] sm:$0xff] }
 0x3aa   :  { %7287 = vmatpush1.bf16.msra.mxu0 %v8860_v44  ;;  %v8757_v44 = vcombine.high %v3711_v49, %v3715_v10  ;;  %v8933_v6 = vcombine.high %v3887_v0, %v3891_v2  ;;  %v8932_v37 = vcombine.low %v3887_v0, %v3891_v2  ;;  %v3799_v10 = vld [vmem:[%s12953_s3 + $0x798] sm:$0xff] }
 0x3ab   :  { %7174 = vmatpush2.bf16.msra.mxu1 %v9050_v50  ;;  %7288 = vmatprep.subr.bf16.mxu0 %v8981_v15  ;;  %v3895_v50 = vld [vmem:[%s12953_s3 + $0xa98] sm:$0xff] }
 0x3ac   :  { %7229 = vmatprep.subr.bf16.mxu1 %v8789_v51  ;;  %v3899_v15 = vld [vmem:[%s12953_s3 + $0xab8] sm:$0xff]  ;;  %v8948_v51 = vcombine.low %v3903_v63, %v3907_v1 }
 0x3ad   :  { %v8941_v61 = vcombine.high %v3895_v50, %v3899_v15 }
 0x3ae   :  { %7176 = vmatmul.mubr.bf16.vlgmr.msra.gmra.mxu1 %v11620_v32  ;;  %7289 = vmatpush2.bf16.msra.mxu0 %v8980_v24  ;;  %v4073_v24 = vrot.slane %v12380_v29, %v490_v43  ;;  %v3879_v43 = vld [vmem:[%s12953_s3 + $0xa18] sm:$0xff] }
 0x3af   :  { %7230 = vmatpush1.bf16.msra.mxu1 %v8788_v4  ;;  %7261 = vmatprep.mubr.bf16.mxu1 %v11018_v8  ;;  %v3719_v8 = vld [vmem:[%s12953_s3 + $0x518] sm:$0xff] }
 0x3b0   :  { %7231 = vmatprep.subr.bf16.mxu1 %v8781_v13  ;;  %7290 = vmatprep.subr.bf16.mxu0 %v8973_v5  ;;  %v8765_v47 = vcombine.high %v3719_v8, %v3723_v30  ;;  %v8764_v62 = vcombine.low %v3719_v8, %v3723_v30  ;;  %v3695_v4 = vld [vmem:[%s12953_s3 + $0x458] sm:$0xff]  ;;  %v8940_v5 = vcombine.low %v3895_v50, %v3899_v15 }
 0x3b1   :  { %v3699_v13 = vld [vmem:[%s12953_s3 + $0x478] sm:$0xff]  ;;  %v6709_v18 = vadd.f32 %v12333_v56, %v4073_v24 }
 0x3b2   :  { %7291 = vmatpush2.bf16.msra.mxu0 %v8972_v33  ;;  %v8741_v35 = vcombine.high %v3695_v4, %v3699_v13  ;;  %v3883_v33 = vld [vmem:[%s12953_s3 + $0xa38] sm:$0xff]  ;;  %v8740_v38 = vcombine.low %v3695_v4, %v3699_v13 }
 0x3b3   :  { %7232 = vmatpush1.bf16.msra.mxu1 %v8780_v27  ;;  %7292 = vmatprep.subr.bf16.mxu0 %v8965_v36  ;;  %v6705_v27 = vadd.f32 %v12299_v28, %v4073_v24  ;;  %v3687_v56 = vld [vmem:[%s12953_s3 + $0x418] sm:$0xff]  ;;  %v8925_v25 = vcombine.high %v3879_v43, %v3883_v33  ;;  %v9290_v24 = vld [vmem:[%s12954_s5 + $0x60] sm:$0xff]  }
 0x3b4   :  { %7233 = vmatprep.subr.bf16.mxu1 %v8773_v57  ;;  %v3691_v36 = vld [vmem:[%s12953_s3 + $0x438] sm:$0xff]  ;;  %v6752_v57 = vadd.f32 %v12341_v26, %v6709_v18  ;;  %v8924_v26 = vcombine.low %v3879_v43, %v3883_v33  ;;  %v9291_v18 = vld [vmem:[%s12954_s5 + $0x20] sm:$0xff]  }
 0x3b5   :  { %v8733_v8 = vcombine.high %v3687_v56, %v3691_v36  ;;  %v6748_v28 = vadd.f32 %v12307_v42, %v6705_v27  ;;  %v8732_v63 = vcombine.low %v3687_v56, %v3691_v36  ;;  %v9284_v42 = vld [vmem:[%s12954_s5 + $0x78] sm:$0xff]   ;;  %v9294_v36 = vld [vmem:[%s12954_s5 + $0x50] sm:$0xff]  }
 0x3b6   :  { %7293 = vmatpush2.bf16.msra.mxu0 %v8964_v39  ;;  %v6795_v30 = vadd.f32 %v12391_v19, %v6752_v57  ;;  %v3807_v39 = vld [vmem:[%s12953_s3 + $0x7d8] sm:$0xff] }
 0x3b7   :  { %7234 = vmatpush1.bf16.msra.mxu1 %v8772_v46  ;;  %7294 = vmatprep.subr.bf16.mxu0 %v8957_v41  ;;  %v3811_v46 = vld [vmem:[%s12953_s3 + $0x7f8] sm:$0xff]  ;;  %v9365_v41 = vpop.eup %9364  ;;  %v6791_v3 = vadd.f32 %v12355_v12, %v6748_v28  ;;  %v9296_v28 = vld [vmem:[%s12954_s5 + $0x48] sm:$0xff]  }
 0x3b8   :  { %7235 = vmatprep.subr.bf16.mxu1 %v8765_v47  ;;  %v6838_v47 = vadd.f32 %v12399_v7, %v6795_v30  ;;  %v8853_v19 = vcombine.high %v3807_v39, %v3811_v46  ;;  %v7407_v49 = vsub.bf16 %v9365_v41, %v9399_v53  ;;  %v3803_v12 = vld [vmem:[%s12953_s3 + $0x7b8] sm:$0xff]  ;;  %v9297_v41 = vld [vmem:[%s12954_s5 + $0x8] sm:$0xff]  }
 0x3b9   :  { %v6834_v1 = vadd.f32 %v12363_v23, %v6791_v3  ;;  %v9285_v7 = vld [vmem:[%s12954_s5 + $0x38] sm:$0xff]   ;;  %v9286_v23 = vld [vmem:[%s12954_s5 + $0x70] sm:$0xff]   ;;  %v9298_v3 = vld [vmem:[%s12954_s5 + $0x40] sm:$0xff]  }
 0x3ba   :  { %7295 = vmatpush2.bf16.msra.mxu0 %v8956_v60  ;;  %v3791_v50 = vld [vmem:[%s12953_s3 + $0x758] sm:$0xff] }
 0x3bb   :  { %7236 = vmatpush1.bf16.msra.mxu1 %v8764_v62  ;;  %7296 = vmatprep.subr.bf16.mxu0 %v8949_v11  ;;  %v12541_v60 = vpack.c.bf16 %v6838_v47, %v6834_v1  ;;  %v8852_v62 = vcombine.low %v3807_v39, %v3811_v46  ;;  %v8845_v11 = vcombine.high %v3799_v10, %v3803_v12  ;;  %v3795_v15 = vld [vmem:[%s12953_s3 + $0x778] sm:$0xff]  ;;  %v9299_v1 = vld [vmem:[%s12954_s5] sm:$0xff]  }
 0x3bc   :  { %7237 = vmatprep.subr.bf16.mxu1 %v8757_v44  ;;  %v7415_v44 = vsel %vm7367_vm8, %v12433_v16, %v7407_v49  ;;  %v9288_v16 = vld [vmem:[%s12954_s5 + $0x68] sm:$0xff]   ;;  %v8836_v2 = vcombine.low %v3791_v50, %v3795_v15  ;;  %v3775_v13 = vld [vmem:[%s12953_s3 + $0x6d8] sm:$0xff] }
 0x3bd   :  { %v7374_v54 = vmin.bf16 %v9398_v31, %v12541_v60  ;;  %v3767_v43 = vld [vmem:[%s12953_s3 + $0x698] sm:$0xff]  ;;  %vm7366_vm9 = vcmp.gt.bf16.partialorder %v12541_v60, 0 }
 0x3be   :  { %7297 = vmatpush2.bf16.msra.mxu0 %v8948_v51  ;;  %v8837_v51 = vcombine.high %v3791_v50, %v3795_v15  ;;  %v3771_v33 = vld [vmem:[%s12953_s3 + $0x6b8] sm:$0xff] }
 0x3bf   :  { %7238 = vmatpush1.bf16.msra.mxu1 %v8756_v22  ;;  %7298 = vmatprep.subr.bf16.mxu0 %v8941_v61  ;;  %v3783_v22 = vld [vmem:[%s12953_s3 + $0x718] sm:$0xff]  ;;  %v7383_v0 = vmul.bf16 1069105081, %v7374_v54 }
 0x3c0   :  { %7239 = vmatprep.subr.bf16.mxu1 %v8749_v9  ;;  %v3787_v61 = vld [vmem:[%s12953_s3 + $0x738] sm:$0xff]  ;;  %v9289_v9 = vld [vmem:[%s12954_s5 + $0x28] sm:$0xff]  }
 0x3c1   :  { %v8829_v4 = vcombine.high %v3783_v22, %v3787_v61  ;;  %9366 = vpow.bf16 %v7383_v0  ;;  %v9293_v27 = vld [vmem:[%s12954_s5 + $0x18] sm:$0xff]  }
 0x3c2   :  { %7299 = vmatpush2.bf16.msra.mxu0 %v8940_v5  ;;  %v3779_v5 = vld [vmem:[%s12953_s3 + $0x6f8] sm:$0xff] }
 0x3c3   :  { %7240 = vmatpush1.bf16.msra.mxu1 %v8748_v17  ;;  %7300 = vmatprep.subr.bf16.mxu0 %v8933_v6  ;;  %v8828_v17 = vcombine.low %v3783_v22, %v3787_v61  ;;  %v9292_v6 = vld [vmem:[%s12954_s5 + $0x58] sm:$0xff]   ;;  %v8820_v56 = vcombine.low %v3775_v13, %v3779_v5 }
 0x3c4   :  { %7241 = vmatprep.subr.bf16.mxu1 %v8741_v35  ;;  %v8821_v35 = vcombine.high %v3775_v13, %v3779_v5  ;;  %v3759_v57 = vld [vmem:[%s12953_s3 + $0x658] sm:$0xff] }
 0x3c5   :  { %v3751_v39 = vld [vmem:[%s12953_s3 + $0x618] sm:$0xff] }
 0x3c6   :  { %7301 = vmatpush2.bf16.msra.mxu0 %v8932_v37  ;;  %v8813_v37 = vcombine.high %v3767_v43, %v3771_v33  ;;  %v3755_v46 = vld [vmem:[%s12953_s3 + $0x638] sm:$0xff] }
 0x3c7   :  { %7242 = vmatpush1.bf16.msra.mxu1 %v8740_v38  ;;  %7302 = vmatprep.subr.bf16.mxu0 %v8925_v25  ;;  %v3763_v38 = vld [vmem:[%s12953_s3 + $0x678] sm:$0xff]  ;;  %v9295_v25 = vld [vmem:[%s12954_s5 + $0x10] sm:$0xff]   ;;  %v8797_v47 = vcombine.high %v3751_v39, %v3755_v46  ;;  %v8796_v49 = vcombine.low %v3751_v39, %v3755_v46 }
 0x3c8   :  { %7243 = vmatprep.subr.bf16.mxu1 %v8733_v8  ;;  %v8812_v8 = vcombine.low %v3767_v43, %v3771_v33  ;;  %v8805_v30 = vcombine.high %v3759_v57, %v3763_v38  ;;  %v3987_v54 = vld [vmem:[%s12953_s3 + $0xd78] sm:$0xff] }
 0x3c9   :  { %v3967_v5 = vld [vmem:[%s12953_s3 + $0xcd8] sm:$0xff] }
 0x3ca   :  { %7303 = vmatpush2.bf16.msra.mxu0 %v8924_v26  ;;  %v8804_v26 = vcombine.low %v3759_v57, %v3763_v38  ;;  %v9322_v38 = vld [vmem:[%s12954_s5 + $0x160] sm:$0xff]   ;;  %v3955_v39 = vld [vmem:[%s12953_s3 + $0xc78] sm:$0xff] }
 0x3cb   :  { %7244 = vmatpush1.bf16.msra.mxu1 %v8732_v63  ;;  %9184 = vmatprep.subr.bf16.mxu0 %v9284_v42  ;;  %v3999_v42 = vld [vmem:[%s12953_s3 + $0xdd8] sm:$0xff] }
 0x3cc   :  { %7245 = vmatprep.subr.bf16.mxu1 %v8853_v19  ;;  %v4003_v19 = vld [vmem:[%s12953_s3 + $0xdf8] sm:$0xff] }
 0x3cd   :  { %7305 = vmatmul.mubr.bf16.vlgmr.msra.gmra.mxu0 %v11442_v59  ;;  %v8844_v59 = vcombine.low %v3799_v10, %v3803_v12  ;;  %v9045_v10 = vcombine.high %v3999_v42, %v4003_v19  ;;  %v9324_v46 = vld [vmem:[%s12954_s5 + $0x158] sm:$0xff]  }
 0x3ce   :  { %9185 = vmatpush3.bf16.msra.mxu0 %v9285_v7  ;;  %7973 = vmatprep.mubr.bf16.mxu0 %v7415_v44  ;;  %v3991_v7 = vld [vmem:[%s12953_s3 + $0xd98] sm:$0xff]  ;;  %v12642_v44 = vpop.f32.mrf.mxu1 }
 0x3cf   :  { %7246 = vmatpush2.bf16.msra.mxu1 %v8852_v62  ;;  %9186 = vmatprep.subr.bf16.mxu0 %v9286_v23  ;;  %v9367_v63 = vpop.eup %9366  ;;  %v3995_v62 = vld [vmem:[%s12953_s3 + $0xdb8] sm:$0xff]  ;;  %v9044_v23 = vcombine.low %v3999_v42, %v4003_v19 }
 0x3d0   :  { %7247 = vmatprep.subr.bf16.mxu1 %v8845_v11  ;;  %v7406_v12 = vsub.bf16 %v9367_v63, %v9399_v53  ;;  %v12640_v11 = vpop.f32.mrf.mxu0  ;;  %v9037_v15 = vcombine.high %v3991_v7, %v3995_v62  ;;  %v12661_v22 = vpop.f32.mrf.mxu1  ;;  %v4085_v63 = vrot.slane %v12380_v29, %v502_v52 }
 0x3d2   :  { %9187 = vmatpush3.bf16.msra.mxu0 %v9287_v21  ;;  %v7414_v50 = vsel %vm7366_vm9, %v12541_v60, %v7406_v12  ;;  %v3983_v21 = vld [vmem:[%s12953_s3 + $0xd58] sm:$0xff]  ;;  %v9036_v60 = vcombine.low %v3991_v7, %v3995_v62  ;;  %v9327_v12 = vld [vmem:[%s12954_s5 + $0x110] sm:$0xff]   ;;  %v9328_v62 = vld [vmem:[%s12954_s5 + $0x148] sm:$0xff]  }
 0x3d3   :  { %7248 = vmatpush2.bf16.msra.mxu1 %v8844_v59  ;;  %9188 = vmatprep.subr.bf16.mxu0 %v9288_v16  ;;  %v9316_v59 = vld [vmem:[%s12954_s5 + $0x178] sm:$0xff]   ;;  %v9029_v61 = vcombine.high %v3983_v21, %v3987_v54  ;;  %v9028_v0 = vcombine.low %v3983_v21, %v3987_v54 }
 0x3d4   :  { %7249 = vmatprep.subr.bf16.mxu1 %v8837_v51  ;;  %v9317_v16 = vld [vmem:[%s12954_s5 + $0x138] sm:$0xff]   ;;  %v12659_v51 = vpop.f32.mrf.mxu0 }
 0x3d6   :  { %9189 = vmatpush3.bf16.msra.mxu0 %v9289_v9  ;;  %v9318_v9 = vld [vmem:[%s12954_s5 + $0x170] sm:$0xff]  }
 0x3d7   :  { %7250 = vmatpush2.bf16.msra.mxu1 %v8836_v2  ;;  %9190 = vmatprep.subr.bf16.mxu0 %v9290_v24  ;;  %v9319_v2 = vld [vmem:[%s12954_s5 + $0x130] sm:$0xff]   ;;  %v12675_v24 = vpop.f32.mrf.mxu0 }
 0x3d8   :  { %7251 = vmatprep.subr.bf16.mxu1 %v8829_v4  ;;  %v12677_v4 = vpop.f32.mrf.mxu1 }
 0x3d9   :  { %v6882_v43 = vpop.f32.mrf.mxu0 }
 0x3da   :  { %9191 = vmatpush3.bf16.msra.mxu0 %v9291_v18  ;;  %v3971_v18 = vld [vmem:[%s12953_s3 + $0xcf8] sm:$0xff]  ;;  %v6925_v33 = vpop.f32.mrf.mxu1 }
 0x3db   :  { %7252 = vmatpush2.bf16.msra.mxu1 %v8828_v17  ;;  %9192 = vmatprep.subr.bf16.mxu0 %v9292_v6  ;;  %v9320_v17 = vld [vmem:[%s12954_s5 + $0x168] sm:$0xff]  }
 0x3dc   :  { %7253 = vmatprep.subr.bf16.mxu1 %v8821_v35  ;;  %v9321_v35 = vld [vmem:[%s12954_s5 + $0x128] sm:$0xff]  }
 0x3de   :  { %9193 = vmatpush3.bf16.msra.mxu0 %v9293_v27  ;;  %v9013_v27 = vcombine.high %v3967_v5, %v3971_v18 }
 0x3df   :  { %7254 = vmatpush2.bf16.msra.mxu1 %v8820_v56  ;;  %9194 = vmatprep.subr.bf16.mxu0 %v9294_v36  ;;  %v3959_v56 = vld [vmem:[%s12953_s3 + $0xc98] sm:$0xff] }
 0x3e0   :  { %7255 = vmatprep.subr.bf16.mxu1 %v8813_v37  ;;  %v3963_v36 = vld [vmem:[%s12953_s3 + $0xcb8] sm:$0xff]  ;;  %v12697_v37 = vpop.f32.mrf.mxu0 }
 0x3e1   :  { %v9004_v42 = vcombine.low %v3959_v56, %v3963_v36 }
 0x3e2   :  { %9195 = vmatpush3.bf16.msra.mxu0 %v9295_v25  ;;  %v9012_v25 = vcombine.low %v3967_v5, %v3971_v18  ;;  %v4059_v5 = vld [vmem:[%s12953_s3 + $0xfb8] sm:$0xff]  ;;  %v9331_v18 = vld [vmem:[%s12954_s5 + $0x100] sm:$0xff]  }
 0x3e3   :  { %7256 = vmatpush2.bf16.msra.mxu1 %v8812_v8  ;;  %9196 = vmatprep.subr.bf16.mxu0 %v9296_v28  ;;  %v9323_v8 = vld [vmem:[%s12954_s5 + $0x120] sm:$0xff]   ;;  %v9005_v28 = vcombine.high %v3959_v56, %v3963_v36 }
 0x3e4   :  { %7257 = vmatprep.subr.bf16.mxu1 %v8805_v30  ;;  %v3951_v30 = vld [vmem:[%s12953_s3 + $0xc58] sm:$0xff] }
 0x3e5   :  { %v8997_v19 = vcombine.high %v3951_v30, %v3955_v39 }
 0x3e6   :  { %9197 = vmatpush3.bf16.msra.mxu0 %v9297_v41  ;;  %v9325_v41 = vld [vmem:[%s12954_s5 + $0x118] sm:$0xff]  }
 0x3e7   :  { %7258 = vmatpush2.bf16.msra.mxu1 %v8804_v26  ;;  %9198 = vmatprep.subr.bf16.mxu0 %v9298_v3  ;;  %v6964_v26 = vpop.f32.mrf.mxu0 }
 0x3e8   :  { %7259 = vmatprep.subr.bf16.mxu1 %v8797_v47  ;;  %v9326_v47 = vld [vmem:[%s12954_s5 + $0x150] sm:$0xff]  }
 0x3e9   :  { %v12734_v52 = vpop.f32.mrf.mxu0 }
 0x3ea   :  { %9199 = vmatpush3.bf16.msra.mxu0 %v9299_v1  ;;  %v6883_v1 = vadd.f32 %v6882_v43, %v4085_v63 }
 0x3eb   :  { %7260 = vmatpush2.bf16.msra.mxu1 %v8796_v49  ;;  %9228 = vmatprep.subr.bf16.mxu0 %v9316_v59  ;;  %v3943_v49 = vld [vmem:[%s12953_s3 + $0xc18] sm:$0xff] }
 0x3ec   :  { %7315 = vmatprep.subr.bf16.mxu1 %v9045_v10  ;;  %v3947_v10 = vld [vmem:[%s12953_s3 + $0xc38] sm:$0xff] }
 0x3ed   :  { %7974 = vmatmul.mubr.bf16.vlgmr.msra.gmra.mxu0 %v7414_v50  ;;  %v6926_v50 = vadd.f32 %v6925_v33, %v6883_v1  ;;  %v8989_v21 = vcombine.high %v3943_v49, %v3947_v10  ;;  %v4063_v59 = vld [vmem:[%s12953_s3 + $0xfd8] sm:$0xff] }
 0x3ee   :  { %7262 = vmatmul.mubr.bf16.vlgmr.msra.gmra.mxu1 %v11220_v48  ;;  %v3975_v48 = vld [vmem:[%s12953_s3 + $0xd18] sm:$0xff]  ;;  %9229 = vmatpush3.bf16.msra.mxu0 %v9317_v16  ;;  %v12699_v57 = vpop.f32.mrf.mxu1  ;;  %v9329_v16 = vld [vmem:[%s12954_s5 + $0x108] sm:$0xff]  }
 0x3ef   :  { %7316 = vmatpush1.bf16.msra.mxu1 %v9044_v23  ;;  %7347 = vmatprep.mubr.bf16.mxu1 %v11611_v55  ;;  %v3979_v55 = vld [vmem:[%s12953_s3 + $0xd38] sm:$0xff]  ;;  %v6879_v23 = vadd.f32 %v12659_v51, %v4085_v63  ;;  %v6968_v51 = vpop.f32.mrf.mxu0 }
 0x3f0   :  { %7317 = vmatprep.subr.bf16.mxu1 %v9037_v15  ;;  %v9021_v13 = vcombine.high %v3975_v48, %v3979_v55  ;;  %9230 = vmatprep.subr.bf16.mxu0 %v9318_v9  ;;  %v9020_v6 = vcombine.low %v3975_v48, %v3979_v55  ;;  %v7007_v3 = vpop.f32.mrf.mxu1  ;;  %v8996_v15 = vcombine.low %v3951_v30, %v3955_v39  ;;  %v4047_v33 = vld [vmem:[%s12953_s3 + $0xf58] sm:$0xff] }
 0x3f1   :  { %v6922_v54 = vadd.f32 %v12661_v22, %v6879_v23  ;;  %v9330_v22 = vld [vmem:[%s12954_s5 + $0x140] sm:$0xff]   ;;  %v6969_v48 = vadd.f32 %v6968_v51, %v6926_v50  ;;  %v8988_v55 = vcombine.low %v3943_v49, %v3947_v10  ;;  %v4027_v63 = vld [vmem:[%s12953_s3 + $0xeb8] sm:$0xff]  ;;  %v4081_v10 = vrot.slane %v12380_v29, %v498_v58 }
 0x3f2   :  { %9231 = vmatpush3.bf16.msra.mxu0 %v9319_v2  ;;  %v12736_v7 = vpop.f32.mrf.mxu1  ;;  %v4015_v1 = vld [vmem:[%s12953_s3 + $0xe58] sm:$0xff] }
 0x3f3   :  { %7318 = vmatpush1.bf16.msra.mxu1 %v9036_v60  ;;  %9232 = vmatprep.subr.bf16.mxu0 %v9320_v17  ;;  %v4067_v60 = vld [vmem:[%s12953_s3 + $0xff8] sm:$0xff] }
 0x3f4   :  { %7319 = vmatprep.subr.bf16.mxu1 %v9029_v61  ;;  %v7011_v61 = vpop.f32.mrf.mxu1  ;;  %v9109_v9 = vcombine.high %v4063_v59, %v4067_v60  ;;  %v4019_v49 = vld [vmem:[%s12953_s3 + $0xe78] sm:$0xff] }
 0x3f5   :  { %v7012_v2 = vadd.f32 %v7011_v61, %v6969_v48  ;;  %v9061_v23 = vcombine.high %v4015_v1, %v4019_v49  ;;  %v4007_v50 = vld [vmem:[%s12953_s3 + $0xe18] sm:$0xff]  ;;  %v9060_v58 = vcombine.low %v4015_v1, %v4019_v49 }
 0x3f6   :  { %9233 = vmatpush3.bf16.msra.mxu0 %v9321_v35 }
 0x3f7   :  { %7320 = vmatpush1.bf16.msra.mxu1 %v9028_v0  ;;  %9234 = vmatprep.subr.bf16.mxu0 %v9322_v38  ;;  %v6965_v0 = vadd.f32 %v6964_v26, %v6922_v54 }
 0x3f8   :  { %7321 = vmatprep.subr.bf16.mxu1 %v9021_v13  ;;  %v4055_v13 = vld [vmem:[%s12953_s3 + $0xf98] sm:$0xff] }
 0x3f9   :  { %v7008_v17 = vadd.f32 %v7007_v3, %v6965_v0  ;;  %v9101_v35 = vcombine.high %v4055_v13, %v4059_v5  ;;  %v9100_v56 = vcombine.low %v4055_v13, %v4059_v5  ;;  %v9307_v13 = vld [vmem:[%s12954_s5 + $0xa0] sm:$0xff]   ;;  %v9308_v5 = vld [vmem:[%s12954_s5 + $0xd8] sm:$0xff]  }
 0x3fa   :  { %9235 = vmatpush3.bf16.msra.mxu0 %v9323_v8  ;;  %v4043_v8 = vld [vmem:[%s12953_s3 + $0xf38] sm:$0xff] }
 0x3fb   :  { %7322 = vmatpush1.bf16.msra.mxu1 %v9020_v6  ;;  %9236 = vmatprep.subr.bf16.mxu0 %v9324_v46  ;;  %v9108_v6 = vcombine.low %v4063_v59, %v4067_v60  ;;  %v12764_v43 = vpack.c.bf16 %v7012_v2, %v7008_v17  ;;  %v4031_v46 = vld [vmem:[%s12953_s3 + $0xed8] sm:$0xff]  ;;  %v9306_v2 = vld [vmem:[%s12954_s5 + $0xe0] sm:$0xff]   ;;  %v9310_v17 = vld [vmem:[%s12954_s5 + $0xd0] sm:$0xff]  }
 0x3fc   :  { %7323 = vmatprep.subr.bf16.mxu1 %v9013_v27  ;;  %v4051_v27 = vld [vmem:[%s12953_s3 + $0xf78] sm:$0xff] }
 0x3fd   :  { %v9093_v36 = vcombine.high %v4047_v33, %v4051_v27  ;;  %v7377_v38 = vmin.bf16 %v9398_v31, %v12764_v43  ;;  %vm7369_vm10 = vcmp.gt.bf16.partialorder %v12764_v43, 0 }
 0x3fe   :  { %9237 = vmatpush3.bf16.msra.mxu0 %v9325_v41  ;;  %v4035_v41 = vld [vmem:[%s12953_s3 + $0xef8] sm:$0xff] }
 0x3ff   :  { %7324 = vmatpush1.bf16.msra.mxu1 %v9012_v25  ;;  %9238 = vmatprep.subr.bf16.mxu0 %v9326_v47  ;;  %v4039_v25 = vld [vmem:[%s12953_s3 + $0xf18] sm:$0xff]  ;;  %v7392_v39 = vmul.bf16 1069105081, %v7377_v38  ;;  %v9077_v3 = vcombine.high %v4031_v46, %v4035_v41 }
 0x400   :  { %7325 = vmatprep.subr.bf16.mxu1 %v9005_v28  ;;  %v9092_v28 = vcombine.low %v4047_v33, %v4051_v27  ;;  %v9085_v30 = vcombine.high %v4039_v25, %v4043_v8  ;;  %v9084_v26 = vcombine.low %v4039_v25, %v4043_v8  ;;  %v4023_v47 = vld [vmem:[%s12953_s3 + $0xe98] sm:$0xff]  ;;  %v9314_v33 = vld [vmem:[%s12954_s5 + $0xc0] sm:$0xff]   ;;  %v7048_v25 = vpop.f32.mrf.mxu0 }
 0x401   :  { %9368 = vpow.bf16 %v7392_v39 }
 0x402   :  { %9239 = vmatpush3.bf16.msra.mxu0 %v9327_v12  ;;  %v9068_v12 = vcombine.low %v4023_v47, %v4027_v63  ;;  %v7050_v8 = vpop.f32.mrf.mxu0 }
 0x403   :  { %7326 = vmatpush1.bf16.msra.mxu1 %v9004_v42  ;;  %9240 = vmatprep.subr.bf16.mxu0 %v9328_v62  ;;  %v9076_v42 = vcombine.low %v4031_v46, %v4035_v41  ;;  %v6881_v62 = vadd.f32 %v12675_v24, %v4081_v10 }
 0x404   :  { %7327 = vmatprep.subr.bf16.mxu1 %v8997_v19  ;;  %v9069_v19 = vcombine.high %v4023_v47, %v4027_v63  ;;  %v4093_v47 = vrot.slane %v12380_v29, %v510_v40  ;;  %v9333_v40 = vld [vmem:[%s12954_s5 + $0x1b8] sm:$0xff]  }
 0x405   :  { %v6924_v54 = vadd.f32 %v12677_v4, %v6881_v62 }
 0x406   :  { %9241 = vmatpush3.bf16.msra.mxu0 %v9329_v16  ;;  %v7051_v49 = vadd.f32 %v7050_v8, %v4093_v47 }
 0x407   :  { %7328 = vmatpush1.bf16.msra.mxu1 %v8996_v15  ;;  %9242 = vmatprep.subr.bf16.mxu0 %v9330_v22  ;;  %v4011_v15 = vld [vmem:[%s12953_s3 + $0xe38] sm:$0xff]  ;;  %v6967_v60 = vadd.f32 %v12734_v52, %v6924_v54 }
 0x408   :  { %7329 = vmatprep.subr.bf16.mxu1 %v8989_v21  ;;  %v6877_v21 = vadd.f32 %v12640_v11, %v4081_v10  ;;  %v9053_v24 = vcombine.high %v4007_v50, %v4011_v15  ;;  %v9052_v51 = vcombine.low %v4007_v50, %v4011_v15  ;;  %v9300_v11 = vld [vmem:[%s12954_s5 + $0xf8] sm:$0xff]  }
 0x409   :  { %v7010_v22 = vadd.f32 %v12736_v7, %v6967_v60  ;;  %v9301_v52 = vld [vmem:[%s12954_s5 + $0xb8] sm:$0xff]   ;;  %v9334_v60 = vld [vmem:[%s12954_s5 + $0x1f0] sm:$0xff]  }
 0x40a   :  { %9243 = vmatpush3.bf16.msra.mxu0 %v9331_v18  ;;  %v6920_v59 = vadd.f32 %v12642_v44, %v6877_v21  ;;  %v9309_v18 = vld [vmem:[%s12954_s5 + $0x98] sm:$0xff]  }
 0x40b   :  { %7330 = vmatpush1.bf16.msra.mxu1 %v8988_v55  ;;  %v9332_v15 = vld [vmem:[%s12954_s5 + $0x1f8] sm:$0xff]  }
 0x40c   :  { %7331 = vmatprep.subr.bf16.mxu1 %v9109_v9  ;;  %v6963_v61 = vadd.f32 %v12697_v37, %v6920_v59  ;;  %v9302_v37 = vld [vmem:[%s12954_s5 + $0xf0] sm:$0xff]   ;;  %v9304_v9 = vld [vmem:[%s12954_s5 + $0xe8] sm:$0xff]  }
 0x40e   :  { %v7006_v4 = vadd.f32 %v12699_v57, %v6963_v61  ;;  %v9303_v57 = vld [vmem:[%s12954_s5 + $0xb0] sm:$0xff]  }
 0x40f   :  { %7332 = vmatpush2.bf16.msra.mxu1 %v9108_v6  ;;  %v9369_v16 = vpop.eup %9368  ;;  %v9311_v6 = vld [vmem:[%s12954_s5 + $0x90] sm:$0xff]  }
 0x410   :  { %7333 = vmatprep.subr.bf16.mxu1 %v9101_v35  ;;  %v7409_v44 = vsub.bf16 %v9369_v16, %v9399_v53  ;;  %v7360_v48 = vpack.c.bf16 %v7010_v22, %v7006_v4  ;;  %v9312_v35 = vld [vmem:[%s12954_s5 + $0xc8] sm:$0xff]  }
 0x412   :  { %v7417_v7 = vsel %vm7369_vm10, %v12764_v43, %v7409_v44  ;;  %v7376_v55 = vmin.bf16 %v9398_v31, %v7360_v48  ;;  %v9313_v43 = vld [vmem:[%s12954_s5 + $0x88] sm:$0xff]   ;;  %vm7368_vm11 = vcmp.gt.bf16.partialorder %v7360_v48, 0 }
 0x413   :  { %7334 = vmatpush2.bf16.msra.mxu1 %v9100_v56  ;;  %v9315_v56 = vld [vmem:[%s12954_s5 + $0x80] sm:$0xff]  }
 0x414   :  { %7335 = vmatprep.subr.bf16.mxu1 %v9093_v36  ;;  %v7389_v0 = vmul.bf16 1069105081, %v7376_v55  ;;  %v9337_v55 = vld [vmem:[%s12954_s5 + $0x1a8] sm:$0xff]  }
 0x416   :  { %9370 = vpow.bf16 %v7389_v0  ;;  %v9338_v0 = vld [vmem:[%s12954_s5 + $0x1e0] sm:$0xff]  }
 0x417   :  { %7336 = vmatpush2.bf16.msra.mxu1 %v9092_v28  ;;  %v7052_v28 = vpop.f32.mrf.mxu0 }
 0x418   :  { %7337 = vmatprep.subr.bf16.mxu1 %v9085_v30 }
 0x419   :  { %v7054_v39 = vpop.f32.mrf.mxu0 }
 0x41a   :  { %v7055_v10 = vadd.f32 %v7054_v39, %v4093_v47 }
 0x41b   :  { %7338 = vmatpush2.bf16.msra.mxu1 %v9084_v26  ;;  %v7134_v41 = vpop.f32.mrf.mxu0  ;;  %v4089_v26 = vrot.slane %v12380_v29, %v506_v14 }
 0x41c   :  { %7339 = vmatprep.subr.bf16.mxu1 %v9077_v3 }
 0x41d   :  { %v7136_v63 = vpop.f32.mrf.mxu0 }
 0x41f   :  { %7340 = vmatpush2.bf16.msra.mxu1 %v9076_v42  ;;  %v7049_v42 = vadd.f32 %v7048_v25, %v4089_v26 }
 0x420   :  { %7341 = vmatprep.subr.bf16.mxu1 %v9069_v19  ;;  %v7053_v19 = vadd.f32 %v7052_v28, %v4089_v26 }
 0x423   :  { %7342 = vmatpush2.bf16.msra.mxu1 %v9068_v12 }
 0x424   :  { %7343 = vmatprep.subr.bf16.mxu1 %v9061_v23  ;;  %v9371_v27 = vpop.eup %9370  ;;  %v7138_v23 = vpop.f32.mrf.mxu0 }
 0x425   :  { %v7408_v36 = vsub.bf16 %v9371_v27, %v9399_v53 }
 0x426   :  { %v7140_v59 = vpop.f32.mrf.mxu0 }
 0x427   :  { %7344 = vmatpush2.bf16.msra.mxu1 %v9060_v58  ;;  %v7416_v38 = vsel %vm7368_vm11, %v7360_v48, %v7408_v36 }
 0x428   :  { %7345 = vmatprep.subr.bf16.mxu1 %v9053_v24 }
 0x42b   :  { %7346 = vmatpush2.bf16.msra.mxu1 %v9052_v51 }
 0x42c   :  { %9206 = vmatprep.subr.bf16.mxu1 %v9300_v11  ;;  %v9335_v11 = vld [vmem:[%s12954_s5 + $0x1b0] sm:$0xff]  }
 0x42e   :  { %7348 = vmatmul.mubr.bf16.vlgmr.msra.gmra.mxu1 %v11620_v32  ;;  %v9305_v32 = vld [vmem:[%s12954_s5 + $0xa8] sm:$0xff]   ;;  %v7091_v30 = vpop.f32.mrf.mxu1 }
 0x42f   :  { %9207 = vmatpush3.bf16.msra.mxu1 %v9301_v52  ;;  %8014 = vmatprep.mubr.bf16.mxu1 %v7417_v7  ;;  %v7092_v12 = vadd.f32 %v7091_v30, %v7049_v42 }
 0x430   :  { %9208 = vmatprep.subr.bf16.mxu1 %v9302_v37  ;;  %v7093_v46 = vpop.f32.mrf.mxu1  ;;  %v9336_v37 = vld [vmem:[%s12954_s5 + $0x1e8] sm:$0xff]  }
 0x431   :  { %v7094_v14 = vadd.f32 %v7093_v46, %v7051_v49  ;;  %v7135_v54 = vadd.f32 %v7134_v41, %v7092_v12 }
 0x432   :  { %v7095_v3 = vpop.f32.mrf.mxu1 }
 0x433   :  { %9209 = vmatpush3.bf16.msra.mxu1 %v9303_v57  ;;  %v7096_v62 = vadd.f32 %v7095_v3, %v7053_v19  ;;  %v7137_v51 = vadd.f32 %v7136_v63, %v7094_v14  ;;  %v9397_v63 = vld [vmem:[%s12955_s4] sm:$0xff] }
 0x434   :  { %9210 = vmatprep.subr.bf16.mxu1 %v9304_v9  ;;  %v7097_v1 = vpop.f32.mrf.mxu1  ;;  %v4097_v42 = vrot.slane %v9397_v63, %v514_v45 }
 0x435   :  { %v7098_v21 = vadd.f32 %v7097_v1, %v7055_v10  ;;  %v7139_v58 = vadd.f32 %v7138_v23, %v7096_v62  ;;  %v4101_v1 = vrot.slane %v9397_v63, %v518_v20 }
 0x437   :  { %9211 = vmatpush3.bf16.msra.mxu1 %v9305_v32  ;;  %v7141_v22 = vadd.f32 %v7140_v59, %v7098_v21 }
 0x438   :  { %9212 = vmatprep.subr.bf16.mxu1 %v9306_v2 }
 0x43b   :  { %9213 = vmatpush3.bf16.msra.mxu1 %v9307_v13  ;;  %v9339_v13 = vld [vmem:[%s12954_s5 + $0x1a0] sm:$0xff]  }
 0x43c   :  { %9214 = vmatprep.subr.bf16.mxu1 %v9308_v5  ;;  %v9340_v5 = vld [vmem:[%s12954_s5 + $0x1d8] sm:$0xff]  }
 0x43f   :  { %9215 = vmatpush3.bf16.msra.mxu1 %v9309_v18  ;;  %v9341_v18 = vld [vmem:[%s12954_s5 + $0x198] sm:$0xff]  }
 0x440   :  { %9216 = vmatprep.subr.bf16.mxu1 %v9310_v17  ;;  %v9342_v17 = vld [vmem:[%s12954_s5 + $0x1d0] sm:$0xff]  }
 0x443   :  { %9217 = vmatpush3.bf16.msra.mxu1 %v9311_v6  ;;  %v9343_v6 = vld [vmem:[%s12954_s5 + $0x190] sm:$0xff]  }
 0x444   :  { %9218 = vmatprep.subr.bf16.mxu1 %v9312_v35  ;;  %v9344_v35 = vld [vmem:[%s12954_s5 + $0x1c8] sm:$0xff]  }
 0x447   :  { %9219 = vmatpush3.bf16.msra.mxu1 %v9313_v43  ;;  %v9345_v43 = vld [vmem:[%s12954_s5 + $0x188] sm:$0xff]  }
 0x448   :  { %9220 = vmatprep.subr.bf16.mxu1 %v9314_v33  ;;  %v9346_v33 = vld [vmem:[%s12954_s5 + $0x1c0] sm:$0xff]  }
 0x44b   :  { %9221 = vmatpush3.bf16.msra.mxu1 %v9315_v56  ;;  %v9347_v56 = vld [vmem:[%s12954_s5 + $0x180] sm:$0xff]  }
 0x44c   :  { %9250 = vmatprep.subr.bf16.mxu1 %v9332_v15 }
 0x44d   :  { %v7220_v30 = vpop.f32.mrf.mxu0 }
 0x44e   :  { %8015 = vmatmul.mubr.bf16.vlgmr.msra.gmra.mxu1 %v7416_v38  ;;  %v7221_v10 = vadd.f32 %v7220_v30, %v4097_v42 }
 0x44f   :  { %9251 = vmatpush3.bf16.msra.mxu1 %v9333_v40  ;;  %v7222_v39 = vpop.f32.mrf.mxu0 }
 0x450   :  { %9252 = vmatprep.subr.bf16.mxu1 %v9334_v60  ;;  %v7223_v23 = vadd.f32 %v7222_v39, %v4101_v1 }
 0x451   :  { %v7224_v46 = vpop.f32.mrf.mxu0 }
 0x452   :  { %v7225_v12 = vadd.f32 %v7224_v46, %v4097_v42 }
 0x453   :  { %9253 = vmatpush3.bf16.msra.mxu1 %v9335_v11  ;;  %v7226_v26 = vpop.f32.mrf.mxu0 }
 0x454   :  { %9254 = vmatprep.subr.bf16.mxu1 %v9336_v37 }
 0x457   :  { %9255 = vmatpush3.bf16.msra.mxu1 %v9337_v55 }
 0x458   :  { %9256 = vmatprep.subr.bf16.mxu1 %v9338_v0 }
 0x45b   :  { %9257 = vmatpush3.bf16.msra.mxu1 %v9339_v13 }
 0x45c   :  { %9258 = vmatprep.subr.bf16.mxu1 %v9340_v5 }
 0x45f   :  { %9259 = vmatpush3.bf16.msra.mxu1 %v9341_v18 }
 0x460   :  { %9260 = vmatprep.subr.bf16.mxu1 %v9342_v17 }
 0x463   :  { %9261 = vmatpush3.bf16.msra.mxu1 %v9343_v6 }
 0x464   :  { %9262 = vmatprep.subr.bf16.mxu1 %v9344_v35 }
 0x467   :  { %9263 = vmatpush3.bf16.msra.mxu1 %v9345_v43 }
 0x468   :  { %9264 = vmatprep.subr.bf16.mxu1 %v9346_v33 }
 0x46b   :  { %9265 = vmatpush3.bf16.msra.mxu1 %v9347_v56 }
 0x46e   :  { %v7177_v50 = vpop.f32.mrf.mxu1 }
 0x46f   :  { %v7178_v16 = vadd.f32 %v7177_v50, %v7135_v54  ;;  %v7227_v50 = vadd.f32 %v7226_v26, %v4101_v1 }
 0x470   :  { %v7179_v29 = vpop.f32.mrf.mxu1 }
 0x471   :  { %v7180_v44 = vadd.f32 %v7179_v29, %v7137_v51 }
 0x472   :  { %v7181_v24 = vpop.f32.mrf.mxu1 }
 0x473   :  { %v7182_v61 = vadd.f32 %v7181_v24, %v7139_v58 }
 0x474   :  { %v7183_v4 = vpop.f32.mrf.mxu1 }
 0x475   :  { %v7362_v52 = vpack.c.bf16 %v7182_v61, %v7178_v16  ;;  %v7184_v48 = vadd.f32 %v7183_v4, %v7141_v22 }
 0x477   :  { %v7378_v7 = vmin.bf16 %v9398_v31, %v7362_v52  ;;  %v7363_v57 = vpack.c.bf16 %v7184_v48, %v7180_v44  ;;  %vm7370_vm13 = vcmp.gt.bf16.partialorder %v7362_v52, 0 }
 0x479   :  { %v7395_v9 = vmul.bf16 1069105081, %v7378_v7  ;;  %v7379_v32 = vmin.bf16 %v9398_v31, %v7363_v57  ;;  %vm7371_vm12 = vcmp.gt.bf16.partialorder %v7363_v57, 0 }
 0x47b   :  { %9372 = vpow.bf16 %v7395_v9  ;;  %v7398_v2 = vmul.bf16 1069105081, %v7379_v32 }
 0x47d   :  { %9374 = vpow.bf16 %v7398_v2 }
 0x489   :  { %v9373_v27 = vpop.eup %9372 }
 0x48a   :  { %v7410_v38 = vsub.bf16 %v9373_v27, %v9399_v53 }
 0x48b   :  { %v9375_v36 = vpop.eup %9374 }
 0x48c   :  { %v7411_v25 = vsub.bf16 %v9375_v36, %v9399_v53  ;;  %v7418_v28 = vsel %vm7370_vm13, %v7362_v52, %v7410_v38 }
 0x48d   :  { %v7306_v47 = vpop.f32.mrf.mxu0 }
 0x48e   :  { %v7419_v8 = vsel %vm7371_vm12, %v7363_v57, %v7411_v25 }
 0x48f   :  { %8055 = vmatprep.mubr.bf16.mxu0 %v7419_v8  ;;  %v7308_v49 = vpop.f32.mrf.mxu0 }
 0x490   :  { %8056 = vmatmul.mubr.bf16.vlgmr.msra.gmra.mxu0 %v7418_v28 }
 0x491   :  { %v7310_v21 = vpop.f32.mrf.mxu0 }
 0x493   :  { %v7312_v45 = vpop.f32.mrf.mxu0 }
 0x4ad   :  { %v9200_v13 = vpop.f32.mrf.mxu0 }
 0x4ae   :  { %v7263_v41 = vpop.f32.mrf.mxu1 }
 0x4af   :  { %v7264_v15 = vadd.f32 %v7263_v41, %v7221_v10  ;;  %v9201_v5 = vpop.f32.mrf.mxu0 }
 0x4b0   :  { %v7265_v3 = vpop.f32.mrf.mxu1  ;;  %v9202_v27 = vadd.f32 %v9201_v5, %v9200_v13 }
 0x4b1   :  { %v7266_v29 = vadd.f32 %v7265_v3, %v7223_v23  ;;  %v7307_v59 = vadd.f32 %v7306_v47, %v7264_v15  ;;  %v9203_v18 = vpop.f32.mrf.mxu0 }
 0x4b2   :  { %v7267_v19 = vpop.f32.mrf.mxu1 }
 0x4b3   :  { %v7268_v14 = vadd.f32 %v7267_v19, %v7225_v12  ;;  %v7309_v34 = vadd.f32 %v7308_v49, %v7266_v29  ;;  %v9204_v17 = vpop.f32.mrf.mxu0 }
 0x4b4   :  { %v7269_v62 = vpop.f32.mrf.mxu1  ;;  %v9205_v8 = vadd.f32 %v9204_v17, %v9203_v18 }
 0x4b5   :  { %v7270_v54 = vadd.f32 %v7269_v62, %v7227_v50  ;;  %v7311_v24 = vadd.f32 %v7310_v21, %v7268_v14 }
 0x4b7   :  { %v7313_v51 = vadd.f32 %v7312_v45, %v7270_v54 }
 0x4ee   :  { %v7349_v40 = vpop.f32.mrf.mxu1 }
 0x4ef   :  { %v7350_v16 = vadd.f32 %v7349_v40, %v7307_v59 }
 0x4f0   :  { %v7351_v58 = vpop.f32.mrf.mxu1 }
 0x4f1   :  { %v7352_v22 = vadd.f32 %v7351_v58, %v7309_v34 }
 0x4f2   :  { %v7353_v60 = vpop.f32.mrf.mxu1 }
 0x4f3   :  { %v7354_v20 = vadd.f32 %v7353_v60, %v7311_v24 }
 0x4f4   :  { %v7355_v61 = vpop.f32.mrf.mxu1 }
 0x4f5   :  { %v7364_v11 = vpack.c.bf16 %v7354_v20, %v7350_v16  ;;  %v7356_v4 = vadd.f32 %v7355_v61, %v7313_v51 }
 0x4f7   :  { %v7380_v44 = vmin.bf16 %v9398_v31, %v7364_v11  ;;  %v7365_v52 = vpack.c.bf16 %v7356_v4, %v7352_v22  ;;  %vm7372_vm15 = vcmp.gt.bf16.partialorder %v7364_v11, 0 }
 0x4f9   :  { %v7401_v48 = vmul.bf16 1069105081, %v7380_v44  ;;  %v7381_v37 = vmin.bf16 %v9398_v31, %v7365_v52  ;;  %vm7373_vm14 = vcmp.gt.bf16.partialorder %v7365_v52, 0 }
 0x4fb   :  { %9376 = vpow.bf16 %v7401_v48  ;;  %v7404_v7 = vmul.bf16 1069105081, %v7381_v37 }
 0x4fd   :  { %9378 = vpow.bf16 %v7404_v7 }
 0x509   :  { %v9377_v57 = vpop.eup %9376 }
 0x50a   :  { %v7412_v9 = vsub.bf16 %v9377_v57, %v9399_v53 }
 0x50b   :  { %v9379_v55 = vpop.eup %9378 }
 0x50c   :  { %v7413_v32 = vsub.bf16 %v9379_v55, %v9399_v53  ;;  %v7420_v2 = vsel %vm7372_vm15, %v7364_v11, %v7412_v9  ;;  %v9110_v53 = vld [vmem:[%s12956_s6] ss:$0 sm:$0xff] }
 0x50d   :  { %v7976_v25 = vadd.f32 %v9202_v27, %v9110_v53  ;;  %v7979_v3 = vadd.f32 %v9205_v8, %v9110_v53 }
 0x50e   :  { %v7421_v0 = vsel %vm7373_vm14, %v7365_v52, %v7413_v32  ;;  %v9222_v31 = vpop.f32.mrf.mxu1 }
 0x50f   :  { %8096 = vmatprep.mubr.bf16.mxu1 %v7421_v0 }
 0x510   :  { %8097 = vmatmul.mubr.bf16.vlgmr.msra.gmra.mxu1 %v7420_v2  ;;  %v9223_v35 = vpop.f32.mrf.mxu1 }
 0x511   :  { %v9224_v36 = vadd.f32 %v9223_v35, %v9222_v31 }
 0x512   :  { %v9225_v33 = vpop.f32.mrf.mxu1 }
 0x513   :  { %v8017_v46 = vadd.f32 %v9224_v36, %v7976_v25 }
 0x514   :  { %v9226_v38 = vpop.f32.mrf.mxu1 }
 0x515   :  { %v9227_v41 = vadd.f32 %v9226_v38, %v9225_v33 }
 0x517   :  { %v8020_v1 = vadd.f32 %v9227_v41, %v7979_v3 }
 0x550   :  { %v9244_v6 = vpop.f32.mrf.mxu0 }
 0x552   :  { %v9245_v43 = vpop.f32.mrf.mxu0 }
 0x553   :  { %v9246_v28 = vadd.f32 %v9245_v43, %v9244_v6 }
 0x554   :  { %v9247_v56 = vpop.f32.mrf.mxu0 }
 0x555   :  { %v8058_v47 = vadd.f32 %v9246_v28, %v8017_v46 }
 0x556   :  { %v9248_v30 = vpop.f32.mrf.mxu0 }
 0x557   :  { %v9249_v63 = vadd.f32 %v9248_v30, %v9247_v56 }
 0x559   :  { %v8061_v12 = vadd.f32 %v9249_v63, %v8020_v1 }
 0x5d0   :  { %v9266_v39 = vpop.f32.mrf.mxu1 }
 0x5d2   :  { %v9267_v26 = vpop.f32.mrf.mxu1 }
 0x5d3   :  { %v9268_v42 = vadd.f32 %v9267_v26, %v9266_v39 }
 0x5d4   :  { %v9269_v19 = vpop.f32.mrf.mxu1 }
 0x5d5   :  { %v8099_v49 = vadd.f32 %v9268_v42, %v8058_v47 }
 0x5d6   :  { %v9270_v10 = vpop.f32.mrf.mxu1 }
 0x5d7   :  { %v9271_v62 = vadd.f32 %v9270_v10, %v9269_v19  ;;  %8115 = vmax.xlane.f32.xlu0 %v8099_v49 }
 0x5d9   :  { %v8102_v23 = vadd.f32 %v9271_v62, %v8061_v12 }
 0x5db   :  { %v9182_v50 = vpack.c.bf16 %v8102_v23, %v8099_v49  ;;  %8117 = vmax.xlane.f32.xlu0 %v8102_v23 }
 0x5dd   :  { %9183 = vst [vmem:[%s12957_s8] sm:$0xff] %v9182_v50  }
 0x660   :  { %v8116_v15 = vpop.xlane.xlu0 %8115 }
 0x661   :  { %v8119_v14 = vsub.f32 %v8099_v49, %v8116_v15 }
 0x663   :  { %v8121_v21 = vmul.f32 1.442695, %v8119_v14 }
 0x664   :  { %v8118_v40 = vpop.xlane.xlu0 %8117 }
 0x665   :  { %9380 = vpow2.f32 %v8121_v21  ;;  %v8120_v29 = vsub.f32 %v8102_v23, %v8118_v40 }
 0x667   :  { %v8123_v54 = vmul.f32 1.442695, %v8120_v29 }
 0x669   :  { %9382 = vpow2.f32 %v8123_v54 }
 0x672   :  { %v9381_v58 = vpop.eup %9380 }
 0x673   :  { %8125 = vadd.xlane.f32.xlu1 %v9381_v58 }
 0x676   :  { %v9383_v59 = vpop.eup %9382 }
 0x677   :  { %8127 = vadd.xlane.f32.xlu1 %v9383_v59 }
 0x6fc   :  { %v8126_v24 = vpop.xlane.xlu1 %8125 }
 0x6fd   :  { %9384 = vrcp.f32 %v8126_v24 }
 0x700   :  { %v8128_v45 = vpop.xlane.xlu1 %8127 }
 0x701   :  { %9386 = vrcp.f32 %v8128_v45 }
 0x70a   :  { %v9385_v60 = vpop.eup %9384 }
 0x70b   :  { %v8131_v16 = vmul.f32 %v9385_v60, %v9381_v58 }
 0x70d   :  { %8133 = vst [vmem:[%s12958_s7] sm:$0xff] %v8131_v16 }
 0x70e   :  { %v9387_v34 = vpop.eup %9386 }
 0x70f   :  { %v8132_v20 = vmul.f32 %v9387_v34, %v9383_v59 }
 0x711   :  { %8134 = vst [vmem:[%s12958_s7 + $0x8] sm:$0xff] %v8132_v20 }

</bundles_post_ra>
